<compile_context>
chip_gen: v7x
topology: tpu7x:2x2x1
jax: 0.10.0
libtpu: 0.0.40
codegen_flags: <defaults>
</compile_context>

<pallas_src>
import jax
import jax.numpy as jnp
from jax.experimental import pallas as pl
from jax.experimental.pallas import tpu as pltpu

EPS = 1e-6


def _normalize(x):
    # Per-pixel layernorm over channels (last axis), biased variance, NO affine
    # (affine is folded into the following 1x1 conv on the host).
    mu = jnp.mean(x, axis=-1, keepdims=True)
    ex2 = jnp.mean(x * x, axis=-1, keepdims=True)
    return (x - mu) * jax.lax.rsqrt(ex2 - mu * mu + EPS)


# ---------------- stage 1: norm1 -> conv1 -> dwconv3x3 -> SimpleGate (+ pool partials) ----------------
def _make_stage1_kernel(tile_rows, W, C):
    P = tile_rows * W

    def kernel(x_ref, xtop_ref, xbot_ref,
               w1a_ref, w1b_ref, wdwa_ref, wdwb_ref, bias_ref,
               g_ref, psum_ref):
        r = pl.program_id(1)
        last_r = pl.num_programs(1) - 1

        x = x_ref[0]             # (P, C)  pixels of this row-tile
        x_top = xtop_ref[0]      # (W, C)  image row just above the tile (clamped)
        x_bot = xbot_ref[0]      # (W, C)  image row just below the tile (clamped)

        xn = _normalize(x)
        xtn = _normalize(x_top)
        xbn = _normalize(x_bot)

        # halo rows outside the image must be zero (conv2 zero-padding)
        top_scale = jnp.where(r == 0, 0.0, 1.0)
        bot_scale = jnp.where(r == last_r, 0.0, 1.0)

        def half(w1, b1, wdw, bdw):
            # 1x1 conv (LN affine folded into w1/b1) on tile + halo rows
            t_mid = jnp.dot(xn, w1, preferred_element_type=jnp.float32) + b1
            t_top = (jnp.dot(xtn, w1, preferred_element_type=jnp.float32) + b1) * top_scale
            t_bot = (jnp.dot(xbn, w1, preferred_element_type=jnp.float32) + b1) * bot_scale
            t_ext = jnp.concatenate([t_top, t_mid, t_bot], axis=0)
            t_ext = t_ext.reshape(tile_rows + 2, W, C)      # layout no-op (W % 8 == 0)

            # 3x3 depthwise conv, padding=1.  Column shifts built once on the
            # haloed slab; row shifts are leading-dim slices (cheap).
            zc = jnp.zeros((tile_rows + 2, 1, C), jnp.float32)
            x_m = jnp.concatenate([zc, t_ext[:, :W - 1, :]], axis=1)   # col j-1
            x_p = jnp.concatenate([t_ext[:, 1:, :], zc], axis=1)       # col j+1
            R = tile_rows
            out = x_m[1:R + 1] * wdw[3] + t_ext[1:R + 1] * wdw[4] + x_p[1:R + 1] * wdw[5]
            out = out + x_m[0:R] * wdw[0] + t_ext[0:R] * wdw[1] + x_p[0:R] * wdw[2]
            out = out + x_m[2:R + 2] * wdw[6] + t_ext[2:R + 2] * wdw[7] + x_p[2:R + 2] * wdw[8]
            return (out + bdw).reshape(P, C)

        da = half(w1a_ref[...], bias_ref[0:1], wdwa_ref[...], bias_ref[2:3])
        db = half(w1b_ref[...], bias_ref[1:2], wdwb_ref[...], bias_ref[3:4])
        g = da * db                                        # SimpleGate (lane-aligned halves)
        g_ref[0] = g
        # per-tile channel sums for the SCA global average pool
        psum_ref[...] = jnp.sum(g, axis=0, keepdims=True).reshape(1, 1, 1, C)

    return kernel


# ---------------- stage 2: (sca,beta)-folded conv3 + residual -> norm2 -> FFN -> residual ----------------
def _make_stage2_kernel(C):
    def kernel(x_ref, g_ref, w3_ref, w4a_ref, w4b_ref, w5_ref, bias_ref, o_ref):
        x = x_ref[0]
        g = g_ref[0]
        # conv3 with SCA scale (per-image, folded into rows) and beta (folded into cols/bias)
        y = x + jnp.dot(g, w3_ref[0], preferred_element_type=jnp.float32) + bias_ref[0:1]
        # FFN: norm2 (affine folded into w4) -> conv4 halves -> gate -> conv5 (gamma folded)
        yn = _normalize(y)
        ua = jnp.dot(yn, w4a_ref[...], preferred_element_type=jnp.float32) + bias_ref[1:2]
        ub = jnp.dot(yn, w4b_ref[...], preferred_element_type=jnp.float32) + bias_ref[2:3]
        u = ua * ub
        o_ref[0] = y + jnp.dot(u, w5_ref[...], preferred_element_type=jnp.float32) + bias_ref[3:4]

    return kernel


# ---------------- helpers ----------------
def _vmem_limit_bytes():
    # Generation-aware scoped-VMEM limit (128 MiB physical on v5e/v6e, 64 MiB on v7x).
    try:
        info = pltpu.get_tpu_info()
        cap = getattr(info, "vmem_capacity_bytes", None)
        if cap:
            return min(int(cap) * 3 // 4, 100 * 1024 * 1024)
    except Exception:
        pass
    return 48 * 1024 * 1024


def _pick_tile_rows(H, W, C, vmem_limit):
    # ~20 live fp32 (tile_rows, W, C) buffers in stage 1 (incl. I/O double
    # buffers + compiler slack) -> largest divisor of H under half the budget.
    per_row = 20 * W * C * 4
    target = max(1, (vmem_limit // 2) // per_row)
    best = 1
    for d in range(1, H + 1):
        if H % d == 0 and d <= target:
            best = d
    return best


# ---------------- wrapper ----------------
def naf_block(x_nchw, p, tile_rows=None):
    N, C, H, W = x_nchw.shape
    HW = H * W
    assert W % 8 == 0, "W must be a multiple of 8"   # TODO(synk): auto-pad W

    vmem_limit = _vmem_limit_bytes()
    if tile_rows is None:
        tile_rows = _pick_tile_rows(H, W, C, vmem_limit)
    assert H % tile_rows == 0, "tile_rows must divide H"
    R = H // tile_rows
    P = tile_rows * W

    x_flat = jnp.transpose(x_nchw, (0, 2, 3, 1)).reshape(N, HW, C).astype(jnp.float32)

    # ---- host-side one-time parameter folding ----
    w1_eff = p['ln1_w'].reshape(C, 1) * p['w1']            # fold LN1 affine into conv1
    b1_eff = p['ln1_b'] @ p['w1'] + p['b1']
    w4_eff = p['ln2_w'].reshape(C, 1) * p['w4']            # fold LN2 affine into conv4
    b4_eff = p['ln2_b'] @ p['w4'] + p['b4']
    w3b = p['w3'] * p['beta']                              # fold beta into conv3
    b3b = p['b3'] * p['beta']
    w5g = p['w5'] * p['gamma']                             # fold gamma into conv5
    b5g = p['b5'] * p['gamma']
    sca_w = p['sca_w'] / float(HW)                         # fold 1/HW of the global pool

    w1a, w1b = w1_eff[:, :C], w1_eff[:, C:]
    wdwa, wdwb = p['wdw'][:, :C], p['wdw'][:, C:]
    w4a, w4b = w4_eff[:, :C], w4_eff[:, C:]
    bias1 = jnp.concatenate([b1_eff[:, :C], b1_eff[:, C:],
                             p['bdw'][:, :C], p['bdw'][:, C:]], axis=0)        # (4, C)
    bias2 = jnp.concatenate([b3b, b4_eff[:, :C], b4_eff[:, C:], b5g], axis=0)  # (4, C)

    def rep(a):
        nd = a.ndim
        return pl.BlockSpec(a.shape, lambda n, r, _nd=nd: (0,) * _nd)

    cparams = pltpu.CompilerParams(dimension_semantics=("parallel", "parallel"),
                                   vmem_limit_bytes=vmem_limit)

    # ---- stage 1 ----
    g, partials = pl.pallas_call(
        _make_stage1_kernel(tile_rows, W, C),
        out_shape=(jax.ShapeDtypeStruct((N, HW, C), jnp.float32),
                   jax.ShapeDtypeStruct((N, R, 1, C), jnp.float32)),
        grid=(N, R),
        in_specs=[
            pl.BlockSpec((1, P, C), lambda n, r: (n, r, 0)),                      # tile pixels
            pl.BlockSpec((1, W, C),
                         lambda n, r: (n, jnp.maximum(r * tile_rows - 1, 0), 0)),  # halo row above
            pl.BlockSpec((1, W, C),
                         lambda n, r: (n, jnp.minimum((r + 1) * tile_rows, H - 1), 0)),  # halo row below
            rep(w1a), rep(w1b), rep(wdwa), rep(wdwb), rep(bias1),
        ],
        out_specs=(pl.BlockSpec((1, P, C), lambda n, r: (n, r, 0)),
                   pl.BlockSpec((1, 1, 1, C), lambda n, r: (n, r, 0, 0))),
        compiler_params=cparams,
    )(x_flat, x_flat, x_flat, w1a, w1b, wdwa, wdwb, bias1)

    # ---- tiny per-image SCA on the host; fold it into conv3's rows ----
    sums = partials.reshape(N, R, C).sum(axis=1)           # (N, C) channel sums of g
    sca = sums @ sca_w + p['sca_b']                         # (N, C)
    w3_img = sca[:, :, None] * w3b[None, :, :]              # (N, C, C)

    # ---- stage 2 ----
    out_flat = pl.pallas_call(
        _make_stage2_kernel(C),
        out_shape=jax.ShapeDtypeStruct((N, HW, C), jnp.float32),
        grid=(N, R),
        in_specs=[
            pl.BlockSpec((1, P, C), lambda n, r: (n, r, 0)),   # x
            pl.BlockSpec((1, P, C), lambda n, r: (n, r, 0)),   # g
            pl.BlockSpec((1, C, C), lambda n, r: (n, 0, 0)),   # per-image w3
            rep(w4a), rep(w4b), rep(w5g), rep(bias2),
        ],
        out_specs=pl.BlockSpec((1, P, C), lambda n, r: (n, r, 0)),
        compiler_params=cparams,
    )(x_flat, g, w3_img, w4a, w4b, w5g, bias2)

    return out_flat.reshape(N, H, W, C).transpose(0, 3, 1, 2)   # back to NCHW


# ---------------- Pure-JAX reference (unfused params, same math) ----------------
def naf_block_ref(x_nchw, p):
    N, C, H, W = x_nchw.shape
    DW = 2 * C
    x = jnp.transpose(x_nchw, (0, 2, 3, 1)).reshape(N, H * W, C)

    def ln(z, w, b):
        mu = z.mean(-1, keepdims=True)
        var = ((z - mu) ** 2).mean(-1, keepdims=True)
        return (z - mu) / jnp.sqrt(var + EPS) * w + b

    t = ln(x, p['ln1_w'], p['ln1_b'])
    t = t @ p['w1'] + p['b1']
    t4 = t.reshape(N, H, W, DW)
    tp = jnp.pad(t4, ((0, 0), (1, 1), (1, 1), (0, 0)))
    wdw = p['wdw'].reshape(3, 3, DW)
    acc = jnp.zeros_like(t4)
    for dy in range(3):
        for dx in range(3):
            acc = acc + tp[:, dy:dy + H, dx:dx + W, :] * wdw[dy, dx]
    t = (acc + p['bdw']).reshape(N, H * W, DW)
    t = t[..., :C] * t[..., C:]
    pooled = t.mean(axis=1, keepdims=True)
    sca = pooled @ p['sca_w'] + p['sca_b']
    t = t * sca
    t = t @ p['w3'] + p['b3']
    y = x + t * p['beta']
    u = ln(y, p['ln2_w'], p['ln2_b'])
    u = u @ p['w4'] + p['b4']
    u = u[..., :C] * u[..., C:]
    u = u @ p['w5'] + p['b5']
    out = y + u * p['gamma']
    return out.reshape(N, H, W, C).transpose(0, 3, 1, 2)


# ---------------- Deterministic parameter construction ----------------
def make_params(key, c):
    dw = 2 * c
    ks = jax.random.split(key, 20)
    rnd = lambda k, shape, s=0.2: s * jax.random.normal(k, shape, jnp.float32)
    # torch inits beta/gamma (and LN bias) to zeros; small nonzero values are
    # used here so every path of the block is actually exercised.
    return dict(
        ln1_w=jnp.ones((1, c), jnp.float32) + rnd(ks[0], (1, c), 0.05),
        ln1_b=rnd(ks[1], (1, c), 0.05),
        w1=rnd(ks[2], (c, dw)),
        b1=rnd(ks[3], (1, dw), 0.05),
        wdw=rnd(ks[4], (9, dw)),
        bdw=rnd(ks[5], (1, dw), 0.05),
        sca_w=rnd(ks[6], (c, c)),
        sca_b=rnd(ks[7], (1, c), 0.05),
        w3=rnd(ks[8], (c, c)),
        b3=rnd(ks[9], (1, c), 0.05),
        beta=rnd(ks[10], (1, c)),
        ln2_w=jnp.ones((1, c), jnp.float32) + rnd(ks[11], (1, c), 0.05),
        ln2_b=rnd(ks[12], (1, c), 0.05),
        w4=rnd(ks[13], (c, dw)),
        b4=rnd(ks[14], (1, dw), 0.05),
        w5=rnd(ks[15], (c, c)),
        b5=rnd(ks[16], (1, c), 0.05),
        gamma=rnd(ks[17], (1, c)),
    )


if __name__ == "__main__":
    key = jax.random.PRNGKey(0)
    kx, kp = jax.random.split(key)
    N, C, H, W = 2, 4, 16, 16
    x = jax.random.normal(kx, (N, C, H, W), jnp.float32)
    params = make_params(kp, C)

    with jax.default_matmul_precision("float32"):
        ref = naf_block_ref(x, params)
        out_auto = jax.block_until_ready(naf_block(x, params))             # single row-tile
        out_tiled = jax.block_until_ready(naf_block(x, params, tile_rows=8))  # 2 tiles: halo path

    for out in (out_auto, out_tiled):
        assert out.shape == (N, C, H, W) and out.dtype == jnp.float32
        assert jnp.allclose(out, ref, atol=5e-3, rtol=5e-3), "Pallas output mismatch"
    print("KERNEL_OK")
</pallas_src>

<mosaic_0001>
module attributes {stable_mosaic.version = 11 : i64} {
  func.func @kernel(%arg0: i32, %arg1: i32, %arg2: memref<1x256x4xf32, #tpu.memory_space<vmem>>, %arg3: memref<1x16x4xf32, #tpu.memory_space<vmem>>, %arg4: memref<1x16x4xf32, #tpu.memory_space<vmem>>, %arg5: memref<4x4xf32, #tpu.memory_space<vmem>>, %arg6: memref<4x4xf32, #tpu.memory_space<vmem>>, %arg7: memref<9x4xf32, #tpu.memory_space<vmem>>, %arg8: memref<9x4xf32, #tpu.memory_space<vmem>>, %arg9: memref<4x4xf32, #tpu.memory_space<vmem>>, %arg10: memref<1x256x4xf32, #tpu.memory_space<vmem>>, %arg11: memref<1x1x1x4xf32, #tpu.memory_space<vmem>>) attributes {dimension_semantics = [#tpu.dimension_semantics<parallel>, #tpu.dimension_semantics<parallel>], iteration_bounds = array<i64: 2, 1>, scalar_prefetch = 0 : i64, scratch_operands = 0 : i64, tpu.core_type = #tpu.core_type<tc>, window_params = [{transform_indices = @transform_0, window_bounds = array<i64: 1, 256, 4>}, {transform_indices = @transform_1, window_bounds = array<i64: 1, 16, 4>}, {transform_indices = @transform_2, window_bounds = array<i64: 1, 16, 4>}, {pipeline_mode = #tpu.pipeline_mode<synchronous>, transform_indices = @transform_3, window_bounds = array<i64: 4, 4>}, {pipeline_mode = #tpu.pipeline_mode<synchronous>, transform_indices = @transform_4, window_bounds = array<i64: 4, 4>}, {pipeline_mode = #tpu.pipeline_mode<synchronous>, transform_indices = @transform_5, window_bounds = array<i64: 9, 4>}, {pipeline_mode = #tpu.pipeline_mode<synchronous>, transform_indices = @transform_6, window_bounds = array<i64: 9, 4>}, {pipeline_mode = #tpu.pipeline_mode<synchronous>, transform_indices = @transform_7, window_bounds = array<i64: 4, 4>}, {transform_indices = @transform_8, window_bounds = array<i64: 1, 256, 4>}, {transform_indices = @transform_9, window_bounds = array<i64: 1, 1, 1, 4>}]} {
    %c0 = arith.constant 0 : index
    %c0_0 = arith.constant 0 : index
    %c0_1 = arith.constant 0 : index
    %0 = vector.load %arg2[%c0, %c0_0, %c0_1] : memref<1x256x4xf32, #tpu.memory_space<vmem>>, vector<1x256x4xf32>
    %1 = vector.shape_cast %0 : vector<1x256x4xf32> to vector<256x4xf32>
    %c0_2 = arith.constant 0 : index
    %c0_3 = arith.constant 0 : index
    %c0_4 = arith.constant 0 : index
    %2 = vector.load %arg3[%c0_2, %c0_3, %c0_4] : memref<1x16x4xf32, #tpu.memory_space<vmem>>, vector<1x16x4xf32>
    %3 = vector.shape_cast %2 : vector<1x16x4xf32> to vector<16x4xf32>
    %c0_5 = arith.constant 0 : index
    %c0_6 = arith.constant 0 : index
    %c0_7 = arith.constant 0 : index
    %4 = vector.load %arg4[%c0_5, %c0_6, %c0_7] : memref<1x16x4xf32, #tpu.memory_space<vmem>>, vector<1x16x4xf32>
    %5 = vector.shape_cast %4 : vector<1x16x4xf32> to vector<16x4xf32>
    %cst = arith.constant dense<0.000000e+00> : vector<256xf32>
    %6 = vector.multi_reduction <add>, %1, %cst [1] : vector<256x4xf32> to vector<256xf32>
    %7 = vector.shape_cast %6 : vector<256xf32> to vector<256x1xf32>
    %cst_8 = arith.constant 4.000000e+00 : f32
    %8 = vector.broadcast %cst_8 : f32 to vector<256x1xf32>
    %9 = arith.divf %7, %8 : vector<256x1xf32>
    %10 = arith.mulf %1, %1 : vector<256x4xf32>
    %cst_9 = arith.constant dense<0.000000e+00> : vector<256xf32>
    %11 = vector.multi_reduction <add>, %10, %cst_9 [1] : vector<256x4xf32> to vector<256xf32>
    %12 = vector.shape_cast %11 : vector<256xf32> to vector<256x1xf32>
    %cst_10 = arith.constant 4.000000e+00 : f32
    %13 = vector.broadcast %cst_10 : f32 to vector<256x1xf32>
    %14 = arith.divf %12, %13 : vector<256x1xf32>
    %15 = vector.broadcast %9 : vector<256x1xf32> to vector<256x4xf32>
    %16 = arith.subf %1, %15 : vector<256x4xf32>
    %17 = arith.mulf %9, %9 : vector<256x1xf32>
    %18 = arith.subf %14, %17 : vector<256x1xf32>
    %cst_11 = arith.constant 9.99999997E-7 : f32
    %19 = vector.broadcast %cst_11 : f32 to vector<256x1xf32>
    %20 = arith.addf %18, %19 : vector<256x1xf32>
    %21 = math.rsqrt %20 : vector<256x1xf32>
    %22 = vector.broadcast %21 : vector<256x1xf32> to vector<256x4xf32>
    %23 = arith.mulf %16, %22 : vector<256x4xf32>
    %cst_12 = arith.constant dense<0.000000e+00> : vector<16xf32>
    %24 = vector.multi_reduction <add>, %3, %cst_12 [1] : vector<16x4xf32> to vector<16xf32>
    %25 = vector.shape_cast %24 : vector<16xf32> to vector<16x1xf32>
    %cst_13 = arith.constant 4.000000e+00 : f32
    %26 = vector.broadcast %cst_13 : f32 to vector<16x1xf32>
    %27 = arith.divf %25, %26 : vector<16x1xf32>
    %28 = arith.mulf %3, %3 : vector<16x4xf32>
    %cst_14 = arith.constant dense<0.000000e+00> : vector<16xf32>
    %29 = vector.multi_reduction <add>, %28, %cst_14 [1] : vector<16x4xf32> to vector<16xf32>
    %30 = vector.shape_cast %29 : vector<16xf32> to vector<16x1xf32>
    %cst_15 = arith.constant 4.000000e+00 : f32
    %31 = vector.broadcast %cst_15 : f32 to vector<16x1xf32>
    %32 = arith.divf %30, %31 : vector<16x1xf32>
    %33 = vector.broadcast %27 : vector<16x1xf32> to vector<16x4xf32>
    %34 = arith.subf %3, %33 : vector<16x4xf32>
    %35 = arith.mulf %27, %27 : vector<16x1xf32>
    %36 = arith.subf %32, %35 : vector<16x1xf32>
    %cst_16 = arith.constant 9.99999997E-7 : f32
    %37 = vector.broadcast %cst_16 : f32 to vector<16x1xf32>
    %38 = arith.addf %36, %37 : vector<16x1xf32>
    %39 = math.rsqrt %38 : vector<16x1xf32>
    %40 = vector.broadcast %39 : vector<16x1xf32> to vector<16x4xf32>
    %41 = arith.mulf %34, %40 : vector<16x4xf32>
    %cst_17 = arith.constant dense<0.000000e+00> : vector<16xf32>
    %42 = vector.multi_reduction <add>, %5, %cst_17 [1] : vector<16x4xf32> to vector<16xf32>
    %43 = vector.shape_cast %42 : vector<16xf32> to vector<16x1xf32>
    %cst_18 = arith.constant 4.000000e+00 : f32
    %44 = vector.broadcast %cst_18 : f32 to vector<16x1xf32>
    %45 = arith.divf %43, %44 : vector<16x1xf32>
    %46 = arith.mulf %5, %5 : vector<16x4xf32>
    %cst_19 = arith.constant dense<0.000000e+00> : vector<16xf32>
    %47 = vector.multi_reduction <add>, %46, %cst_19 [1] : vector<16x4xf32> to vector<16xf32>
    %48 = vector.shape_cast %47 : vector<16xf32> to vector<16x1xf32>
    %cst_20 = arith.constant 4.000000e+00 : f32
    %49 = vector.broadcast %cst_20 : f32 to vector<16x1xf32>
    %50 = arith.divf %48, %49 : vector<16x1xf32>
    %51 = vector.broadcast %45 : vector<16x1xf32> to vector<16x4xf32>
    %52 = arith.subf %5, %51 : vector<16x4xf32>
    %53 = arith.mulf %45, %45 : vector<16x1xf32>
    %54 = arith.subf %50, %53 : vector<16x1xf32>
    %cst_21 = arith.constant 9.99999997E-7 : f32
    %55 = vector.broadcast %cst_21 : f32 to vector<16x1xf32>
    %56 = arith.addf %54, %55 : vector<16x1xf32>
    %57 = math.rsqrt %56 : vector<16x1xf32>
    %58 = vector.broadcast %57 : vector<16x1xf32> to vector<16x4xf32>
    %59 = arith.mulf %52, %58 : vector<16x4xf32>
    %c0_i32 = arith.constant 0 : i32
    %60 = arith.cmpi eq, %arg1, %c0_i32 : i32
    %cst_22 = arith.constant 0.000000e+00 : f32
    %cst_23 = arith.constant 1.000000e+00 : f32
    %61 = arith.select %60, %cst_22, %cst_23 : f32
    %c0_i32_24 = arith.constant 0 : i32
    %62 = arith.cmpi eq, %arg1, %c0_i32_24 : i32
    %cst_25 = arith.constant 0.000000e+00 : f32
    %cst_26 = arith.constant 1.000000e+00 : f32
    %63 = arith.select %62, %cst_25, %cst_26 : f32
    %c0_27 = arith.constant 0 : index
    %c0_28 = arith.constant 0 : index
    %64 = vector.load %arg5[%c0_27, %c0_28] : memref<4x4xf32, #tpu.memory_space<vmem>>, vector<4x4xf32>
    %c0_29 = arith.constant 0 : index
    %c0_30 = arith.constant 0 : index
    %65 = vector.load %arg9[%c0_29, %c0_30] : memref<4x4xf32, #tpu.memory_space<vmem>>, vector<1x4xf32>
    %c0_31 = arith.constant 0 : index
    %c0_32 = arith.constant 0 : index
    %66 = vector.load %arg7[%c0_31, %c0_32] : memref<9x4xf32, #tpu.memory_space<vmem>>, vector<9x4xf32>
    %c2 = arith.constant 2 : index
    %c0_33 = arith.constant 0 : index
    %67 = vector.load %arg9[%c2, %c0_33] : memref<4x4xf32, #tpu.memory_space<vmem>>, vector<1x4xf32>
    %cst_34 = arith.constant dense<0.000000e+00> : vector<256x4xf32>
    %68 = tpu.matmul %23, %64, %cst_34 {dimension_numbers = #tpu.dot_dimension_numbers<[1], [0], [0], [1], [0, 0, 1, 1], [], []>, precision = #tpu.contract_precision<fp32>} : vector<256x4xf32>, vector<4x4xf32>, vector<256x4xf32> -> vector<256x4xf32>
    %69 = vector.broadcast %65 : vector<1x4xf32> to vector<256x4xf32>
    %70 = arith.addf %68, %69 : vector<256x4xf32>
    %cst_35 = arith.constant dense<0.000000e+00> : vector<16x4xf32>
    %71 = tpu.matmul %41, %64, %cst_35 {dimension_numbers = #tpu.dot_dimension_numbers<[1], [0], [0], [1], [0, 0, 1, 1], [], []>, precision = #tpu.contract_precision<fp32>} : vector<16x4xf32>, vector<4x4xf32>, vector<16x4xf32> -> vector<16x4xf32>
    %72 = vector.broadcast %65 : vector<1x4xf32> to vector<16x4xf32>
    %73 = arith.addf %71, %72 : vector<16x4xf32>
    %74 = vector.broadcast %61 : f32 to vector<16x4xf32>
    %75 = arith.mulf %73, %74 : vector<16x4xf32>
    %cst_36 = arith.constant dense<0.000000e+00> : vector<16x4xf32>
    %76 = tpu.matmul %59, %64, %cst_36 {dimension_numbers = #tpu.dot_dimension_numbers<[1], [0], [0], [1], [0, 0, 1, 1], [], []>, precision = #tpu.contract_precision<fp32>} : vector<16x4xf32>, vector<4x4xf32>, vector<16x4xf32> -> vector<16x4xf32>
    %77 = vector.broadcast %65 : vector<1x4xf32> to vector<16x4xf32>
    %78 = arith.addf %76, %77 : vector<16x4xf32>
    %79 = vector.broadcast %63 : f32 to vector<16x4xf32>
    %80 = arith.mulf %78, %79 : vector<16x4xf32>
    %81 = tpu.concatenate %75, %70, %80 in 0 : vector<16x4xf32>, vector<256x4xf32>, vector<16x4xf32> -> vector<288x4xf32>
    %82 = vector.shape_cast %81 : vector<288x4xf32> to vector<18x16x4xf32>
    %cst_37 = arith.constant 0.000000e+00 : f32
    %83 = vector.broadcast %cst_37 : f32 to vector<18x1x4xf32>
    %84 = vector.extract_strided_slice %82 {offsets = [0, 0, 0], sizes = [18, 15, 4], strides = [1, 1, 1]} : vector<18x16x4xf32> to vector<18x15x4xf32>
    %85 = tpu.concatenate %83, %84 in 1 : vector<18x1x4xf32>, vector<18x15x4xf32> -> vector<18x16x4xf32>
    %86 = vector.extract_strided_slice %82 {offsets = [0, 1, 0], sizes = [18, 15, 4], strides = [1, 1, 1]} : vector<18x16x4xf32> to vector<18x15x4xf32>
    %87 = tpu.concatenate %86, %83 in 1 : vector<18x15x4xf32>, vector<18x1x4xf32> -> vector<18x16x4xf32>
    %88 = vector.extract_strided_slice %85 {offsets = [1, 0, 0], sizes = [16, 16, 4], strides = [1, 1, 1]} : vector<18x16x4xf32> to vector<16x16x4xf32>
    %89 = vector.extract_strided_slice %66 {offsets = [3, 0], sizes = [1, 4], strides = [1, 1]} : vector<9x4xf32> to vector<1x4xf32>
    %90 = vector.shape_cast %89 : vector<1x4xf32> to vector<4xf32>
    %91 = vector.shape_cast %90 : vector<4xf32> to vector<1x1x4xf32>
    %92 = vector.broadcast %91 : vector<1x1x4xf32> to vector<16x16x4xf32>
    %93 = arith.mulf %88, %92 : vector<16x16x4xf32>
    %94 = vector.extract_strided_slice %82 {offsets = [1, 0, 0], sizes = [16, 16, 4], strides = [1, 1, 1]} : vector<18x16x4xf32> to vector<16x16x4xf32>
    %95 = vector.extract_strided_slice %66 {offsets = [4, 0], sizes = [1, 4], strides = [1, 1]} : vector<9x4xf32> to vector<1x4xf32>
    %96 = vector.shape_cast %95 : vector<1x4xf32> to vector<4xf32>
    %97 = vector.shape_cast %96 : vector<4xf32> to vector<1x1x4xf32>
    %98 = vector.broadcast %97 : vector<1x1x4xf32> to vector<16x16x4xf32>
    %99 = arith.mulf %94, %98 : vector<16x16x4xf32>
    %100 = arith.addf %93, %99 : vector<16x16x4xf32>
    %101 = vector.extract_strided_slice %87 {offsets = [1, 0, 0], sizes = [16, 16, 4], strides = [1, 1, 1]} : vector<18x16x4xf32> to vector<16x16x4xf32>
    %102 = vector.extract_strided_slice %66 {offsets = [5, 0], sizes = [1, 4], strides = [1, 1]} : vector<9x4xf32> to vector<1x4xf32>
    %103 = vector.shape_cast %102 : vector<1x4xf32> to vector<4xf32>
    %104 = vector.shape_cast %103 : vector<4xf32> to vector<1x1x4xf32>
    %105 = vector.broadcast %104 : vector<1x1x4xf32> to vector<16x16x4xf32>
    %106 = arith.mulf %101, %105 : vector<16x16x4xf32>
    %107 = arith.addf %100, %106 : vector<16x16x4xf32>
    %108 = vector.extract_strided_slice %85 {offsets = [0, 0, 0], sizes = [16, 16, 4], strides = [1, 1, 1]} : vector<18x16x4xf32> to vector<16x16x4xf32>
    %109 = vector.extract_strided_slice %66 {offsets = [0, 0], sizes = [1, 4], strides = [1, 1]} : vector<9x4xf32> to vector<1x4xf32>
    %110 = vector.shape_cast %109 : vector<1x4xf32> to vector<4xf32>
    %111 = vector.shape_cast %110 : vector<4xf32> to vector<1x1x4xf32>
    %112 = vector.broadcast %111 : vector<1x1x4xf32> to vector<16x16x4xf32>
    %113 = arith.mulf %108, %112 : vector<16x16x4xf32>
    %114 = arith.addf %107, %113 : vector<16x16x4xf32>
    %115 = vector.extract_strided_slice %82 {offsets = [0, 0, 0], sizes = [16, 16, 4], strides = [1, 1, 1]} : vector<18x16x4xf32> to vector<16x16x4xf32>
    %116 = vector.extract_strided_slice %66 {offsets = [1, 0], sizes = [1, 4], strides = [1, 1]} : vector<9x4xf32> to vector<1x4xf32>
    %117 = vector.shape_cast %116 : vector<1x4xf32> to vector<4xf32>
    %118 = vector.shape_cast %117 : vector<4xf32> to vector<1x1x4xf32>
    %119 = vector.broadcast %118 : vector<1x1x4xf32> to vector<16x16x4xf32>
    %120 = arith.mulf %115, %119 : vector<16x16x4xf32>
    %121 = arith.addf %114, %120 : vector<16x16x4xf32>
    %122 = vector.extract_strided_slice %87 {offsets = [0, 0, 0], sizes = [16, 16, 4], strides = [1, 1, 1]} : vector<18x16x4xf32> to vector<16x16x4xf32>
    %123 = vector.extract_strided_slice %66 {offsets = [2, 0], sizes = [1, 4], strides = [1, 1]} : vector<9x4xf32> to vector<1x4xf32>
    %124 = vector.shape_cast %123 : vector<1x4xf32> to vector<4xf32>
    %125 = vector.shape_cast %124 : vector<4xf32> to vector<1x1x4xf32>
    %126 = vector.broadcast %125 : vector<1x1x4xf32> to vector<16x16x4xf32>
    %127 = arith.mulf %122, %126 : vector<16x16x4xf32>
    %128 = arith.addf %121, %127 : vector<16x16x4xf32>
    %129 = vector.extract_strided_slice %85 {offsets = [2, 0, 0], sizes = [16, 16, 4], strides = [1, 1, 1]} : vector<18x16x4xf32> to vector<16x16x4xf32>
    %130 = vector.extract_strided_slice %66 {offsets = [6, 0], sizes = [1, 4], strides = [1, 1]} : vector<9x4xf32> to vector<1x4xf32>
    %131 = vector.shape_cast %130 : vector<1x4xf32> to vector<4xf32>
    %132 = vector.shape_cast %131 : vector<4xf32> to vector<1x1x4xf32>
    %133 = vector.broadcast %132 : vector<1x1x4xf32> to vector<16x16x4xf32>
    %134 = arith.mulf %129, %133 : vector<16x16x4xf32>
    %135 = arith.addf %128, %134 : vector<16x16x4xf32>
    %136 = vector.extract_strided_slice %82 {offsets = [2, 0, 0], sizes = [16, 16, 4], strides = [1, 1, 1]} : vector<18x16x4xf32> to vector<16x16x4xf32>
    %137 = vector.extract_strided_slice %66 {offsets = [7, 0], sizes = [1, 4], strides = [1, 1]} : vector<9x4xf32> to vector<1x4xf32>
    %138 = vector.shape_cast %137 : vector<1x4xf32> to vector<4xf32>
    %139 = vector.shape_cast %138 : vector<4xf32> to vector<1x1x4xf32>
    %140 = vector.broadcast %139 : vector<1x1x4xf32> to vector<16x16x4xf32>
    %141 = arith.mulf %136, %140 : vector<16x16x4xf32>
    %142 = arith.addf %135, %141 : vector<16x16x4xf32>
    %143 = vector.extract_strided_slice %87 {offsets = [2, 0, 0], sizes = [16, 16, 4], strides = [1, 1, 1]} : vector<18x16x4xf32> to vector<16x16x4xf32>
    %144 = vector.extract_strided_slice %66 {offsets = [8, 0], sizes = [1, 4], strides = [1, 1]} : vector<9x4xf32> to vector<1x4xf32>
    %145 = vector.shape_cast %144 : vector<1x4xf32> to vector<4xf32>
    %146 = vector.shape_cast %145 : vector<4xf32> to vector<1x1x4xf32>
    %147 = vector.broadcast %146 : vector<1x1x4xf32> to vector<16x16x4xf32>
    %148 = arith.mulf %143, %147 : vector<16x16x4xf32>
    %149 = arith.addf %142, %148 : vector<16x16x4xf32>
    %150 = vector.shape_cast %67 : vector<1x4xf32> to vector<1x1x4xf32>
    %151 = vector.broadcast %150 : vector<1x1x4xf32> to vector<16x16x4xf32>
    %152 = arith.addf %149, %151 : vector<16x16x4xf32>
    %153 = vector.shape_cast %152 : vector<16x16x4xf32> to vector<256x4xf32>
    %c0_38 = arith.constant 0 : index
    %c0_39 = arith.constant 0 : index
    %154 = vector.load %arg6[%c0_38, %c0_39] : memref<4x4xf32, #tpu.memory_space<vmem>>, vector<4x4xf32>
    %c1 = arith.constant 1 : index
    %c0_40 = arith.constant 0 : index
    %155 = vector.load %arg9[%c1, %c0_40] : memref<4x4xf32, #tpu.memory_space<vmem>>, vector<1x4xf32>
    %c0_41 = arith.constant 0 : index
    %c0_42 = arith.constant 0 : index
    %156 = vector.load %arg8[%c0_41, %c0_42] : memref<9x4xf32, #tpu.memory_space<vmem>>, vector<9x4xf32>
    %c3 = arith.constant 3 : index
    %c0_43 = arith.constant 0 : index
    %157 = vector.load %arg9[%c3, %c0_43] : memref<4x4xf32, #tpu.memory_space<vmem>>, vector<1x4xf32>
    %cst_44 = arith.constant dense<0.000000e+00> : vector<256x4xf32>
    %158 = tpu.matmul %23, %154, %cst_44 {dimension_numbers = #tpu.dot_dimension_numbers<[1], [0], [0], [1], [0, 0, 1, 1], [], []>, precision = #tpu.contract_precision<fp32>} : vector<256x4xf32>, vector<4x4xf32>, vector<256x4xf32> -> vector<256x4xf32>
    %159 = vector.broadcast %155 : vector<1x4xf32> to vector<256x4xf32>
    %160 = arith.addf %158, %159 : vector<256x4xf32>
    %cst_45 = arith.constant dense<0.000000e+00> : vector<16x4xf32>
    %161 = tpu.matmul %41, %154, %cst_45 {dimension_numbers = #tpu.dot_dimension_numbers<[1], [0], [0], [1], [0, 0, 1, 1], [], []>, precision = #tpu.contract_precision<fp32>} : vector<16x4xf32>, vector<4x4xf32>, vector<16x4xf32> -> vector<16x4xf32>
    %162 = vector.broadcast %155 : vector<1x4xf32> to vector<16x4xf32>
    %163 = arith.addf %161, %162 : vector<16x4xf32>
    %164 = vector.broadcast %61 : f32 to vector<16x4xf32>
    %165 = arith.mulf %163, %164 : vector<16x4xf32>
    %cst_46 = arith.constant dense<0.000000e+00> : vector<16x4xf32>
    %166 = tpu.matmul %59, %154, %cst_46 {dimension_numbers = #tpu.dot_dimension_numbers<[1], [0], [0], [1], [0, 0, 1, 1], [], []>, precision = #tpu.contract_precision<fp32>} : vector<16x4xf32>, vector<4x4xf32>, vector<16x4xf32> -> vector<16x4xf32>
    %167 = vector.broadcast %155 : vector<1x4xf32> to vector<16x4xf32>
    %168 = arith.addf %166, %167 : vector<16x4xf32>
    %169 = vector.broadcast %63 : f32 to vector<16x4xf32>
    %170 = arith.mulf %168, %169 : vector<16x4xf32>
    %171 = tpu.concatenate %165, %160, %170 in 0 : vector<16x4xf32>, vector<256x4xf32>, vector<16x4xf32> -> vector<288x4xf32>
    %172 = vector.shape_cast %171 : vector<288x4xf32> to vector<18x16x4xf32>
    %cst_47 = arith.constant 0.000000e+00 : f32
    %173 = vector.broadcast %cst_47 : f32 to vector<18x1x4xf32>
    %174 = vector.extract_strided_slice %172 {offsets = [0, 0, 0], sizes = [18, 15, 4], strides = [1, 1, 1]} : vector<18x16x4xf32> to vector<18x15x4xf32>
    %175 = tpu.concatenate %173, %174 in 1 : vector<18x1x4xf32>, vector<18x15x4xf32> -> vector<18x16x4xf32>
    %176 = vector.extract_strided_slice %172 {offsets = [0, 1, 0], sizes = [18, 15, 4], strides = [1, 1, 1]} : vector<18x16x4xf32> to vector<18x15x4xf32>
    %177 = tpu.concatenate %176, %173 in 1 : vector<18x15x4xf32>, vector<18x1x4xf32> -> vector<18x16x4xf32>
    %178 = vector.extract_strided_slice %175 {offsets = [1, 0, 0], sizes = [16, 16, 4], strides = [1, 1, 1]} : vector<18x16x4xf32> to vector<16x16x4xf32>
    %179 = vector.extract_strided_slice %156 {offsets = [3, 0], sizes = [1, 4], strides = [1, 1]} : vector<9x4xf32> to vector<1x4xf32>
    %180 = vector.shape_cast %179 : vector<1x4xf32> to vector<4xf32>
    %181 = vector.shape_cast %180 : vector<4xf32> to vector<1x1x4xf32>
    %182 = vector.broadcast %181 : vector<1x1x4xf32> to vector<16x16x4xf32>
    %183 = arith.mulf %178, %182 : vector<16x16x4xf32>
    %184 = vector.extract_strided_slice %172 {offsets = [1, 0, 0], sizes = [16, 16, 4], strides = [1, 1, 1]} : vector<18x16x4xf32> to vector<16x16x4xf32>
    %185 = vector.extract_strided_slice %156 {offsets = [4, 0], sizes = [1, 4], strides = [1, 1]} : vector<9x4xf32> to vector<1x4xf32>
    %186 = vector.shape_cast %185 : vector<1x4xf32> to vector<4xf32>
    %187 = vector.shape_cast %186 : vector<4xf32> to vector<1x1x4xf32>
    %188 = vector.broadcast %187 : vector<1x1x4xf32> to vector<16x16x4xf32>
    %189 = arith.mulf %184, %188 : vector<16x16x4xf32>
    %190 = arith.addf %183, %189 : vector<16x16x4xf32>
    %191 = vector.extract_strided_slice %177 {offsets = [1, 0, 0], sizes = [16, 16, 4], strides = [1, 1, 1]} : vector<18x16x4xf32> to vector<16x16x4xf32>
    %192 = vector.extract_strided_slice %156 {offsets = [5, 0], sizes = [1, 4], strides = [1, 1]} : vector<9x4xf32> to vector<1x4xf32>
    %193 = vector.shape_cast %192 : vector<1x4xf32> to vector<4xf32>
    %194 = vector.shape_cast %193 : vector<4xf32> to vector<1x1x4xf32>
    %195 = vector.broadcast %194 : vector<1x1x4xf32> to vector<16x16x4xf32>
    %196 = arith.mulf %191, %195 : vector<16x16x4xf32>
    %197 = arith.addf %190, %196 : vector<16x16x4xf32>
    %198 = vector.extract_strided_slice %175 {offsets = [0, 0, 0], sizes = [16, 16, 4], strides = [1, 1, 1]} : vector<18x16x4xf32> to vector<16x16x4xf32>
    %199 = vector.extract_strided_slice %156 {offsets = [0, 0], sizes = [1, 4], strides = [1, 1]} : vector<9x4xf32> to vector<1x4xf32>
    %200 = vector.shape_cast %199 : vector<1x4xf32> to vector<4xf32>
    %201 = vector.shape_cast %200 : vector<4xf32> to vector<1x1x4xf32>
    %202 = vector.broadcast %201 : vector<1x1x4xf32> to vector<16x16x4xf32>
    %203 = arith.mulf %198, %202 : vector<16x16x4xf32>
    %204 = arith.addf %197, %203 : vector<16x16x4xf32>
    %205 = vector.extract_strided_slice %172 {offsets = [0, 0, 0], sizes = [16, 16, 4], strides = [1, 1, 1]} : vector<18x16x4xf32> to vector<16x16x4xf32>
    %206 = vector.extract_strided_slice %156 {offsets = [1, 0], sizes = [1, 4], strides = [1, 1]} : vector<9x4xf32> to vector<1x4xf32>
    %207 = vector.shape_cast %206 : vector<1x4xf32> to vector<4xf32>
    %208 = vector.shape_cast %207 : vector<4xf32> to vector<1x1x4xf32>
    %209 = vector.broadcast %208 : vector<1x1x4xf32> to vector<16x16x4xf32>
    %210 = arith.mulf %205, %209 : vector<16x16x4xf32>
    %211 = arith.addf %204, %210 : vector<16x16x4xf32>
    %212 = vector.extract_strided_slice %177 {offsets = [0, 0, 0], sizes = [16, 16, 4], strides = [1, 1, 1]} : vector<18x16x4xf32> to vector<16x16x4xf32>
    %213 = vector.extract_strided_slice %156 {offsets = [2, 0], sizes = [1, 4], strides = [1, 1]} : vector<9x4xf32> to vector<1x4xf32>
    %214 = vector.shape_cast %213 : vector<1x4xf32> to vector<4xf32>
    %215 = vector.shape_cast %214 : vector<4xf32> to vector<1x1x4xf32>
    %216 = vector.broadcast %215 : vector<1x1x4xf32> to vector<16x16x4xf32>
    %217 = arith.mulf %212, %216 : vector<16x16x4xf32>
    %218 = arith.addf %211, %217 : vector<16x16x4xf32>
    %219 = vector.extract_strided_slice %175 {offsets = [2, 0, 0], sizes = [16, 16, 4], strides = [1, 1, 1]} : vector<18x16x4xf32> to vector<16x16x4xf32>
    %220 = vector.extract_strided_slice %156 {offsets = [6, 0], sizes = [1, 4], strides = [1, 1]} : vector<9x4xf32> to vector<1x4xf32>
    %221 = vector.shape_cast %220 : vector<1x4xf32> to vector<4xf32>
    %222 = vector.shape_cast %221 : vector<4xf32> to vector<1x1x4xf32>
    %223 = vector.broadcast %222 : vector<1x1x4xf32> to vector<16x16x4xf32>
    %224 = arith.mulf %219, %223 : vector<16x16x4xf32>
    %225 = arith.addf %218, %224 : vector<16x16x4xf32>
    %226 = vector.extract_strided_slice %172 {offsets = [2, 0, 0], sizes = [16, 16, 4], strides = [1, 1, 1]} : vector<18x16x4xf32> to vector<16x16x4xf32>
    %227 = vector.extract_strided_slice %156 {offsets = [7, 0], sizes = [1, 4], strides = [1, 1]} : vector<9x4xf32> to vector<1x4xf32>
    %228 = vector.shape_cast %227 : vector<1x4xf32> to vector<4xf32>
    %229 = vector.shape_cast %228 : vector<4xf32> to vector<1x1x4xf32>
    %230 = vector.broadcast %229 : vector<1x1x4xf32> to vector<16x16x4xf32>
    %231 = arith.mulf %226, %230 : vector<16x16x4xf32>
    %232 = arith.addf %225, %231 : vector<16x16x4xf32>
    %233 = vector.extract_strided_slice %177 {offsets = [2, 0, 0], sizes = [16, 16, 4], strides = [1, 1, 1]} : vector<18x16x4xf32> to vector<16x16x4xf32>
    %234 = vector.extract_strided_slice %156 {offsets = [8, 0], sizes = [1, 4], strides = [1, 1]} : vector<9x4xf32> to vector<1x4xf32>
    %235 = vector.shape_cast %234 : vector<1x4xf32> to vector<4xf32>
    %236 = vector.shape_cast %235 : vector<4xf32> to vector<1x1x4xf32>
    %237 = vector.broadcast %236 : vector<1x1x4xf32> to vector<16x16x4xf32>
    %238 = arith.mulf %233, %237 : vector<16x16x4xf32>
    %239 = arith.addf %232, %238 : vector<16x16x4xf32>
    %240 = vector.shape_cast %157 : vector<1x4xf32> to vector<1x1x4xf32>
    %241 = vector.broadcast %240 : vector<1x1x4xf32> to vector<16x16x4xf32>
    %242 = arith.addf %239, %241 : vector<16x16x4xf32>
    %243 = vector.shape_cast %242 : vector<16x16x4xf32> to vector<256x4xf32>
    %244 = arith.mulf %153, %243 : vector<256x4xf32>
    %c0_48 = arith.constant 0 : index
    %c0_49 = arith.constant 0 : index
    %c0_50 = arith.constant 0 : index
    %245 = vector.load %arg10[%c0_48, %c0_49, %c0_50] : memref<1x256x4xf32, #tpu.memory_space<vmem>>, vector<1x256x4xf32>
    %246 = vector.shape_cast %245 : vector<1x256x4xf32> to vector<256x4xf32>
    %247 = vector.shape_cast %244 : vector<256x4xf32> to vector<1x256x4xf32>
    tpu.vector_store %arg10[%c0_48, %c0_49, %c0_50], %247 {strides = array<i32>} : memref<1x256x4xf32, #tpu.memory_space<vmem>>, vector<1x256x4xf32>,
    %cst_51 = arith.constant dense<0.000000e+00> : vector<4xf32>
    %248 = vector.multi_reduction <add>, %244, %cst_51 [0] : vector<256x4xf32> to vector<4xf32>
    %249 = vector.shape_cast %248 : vector<4xf32> to vector<1x4xf32>
    %250 = vector.shape_cast %249 : vector<1x4xf32> to vector<1x1x1x4xf32>
    %c0_52 = arith.constant 0 : index
    %c0_53 = arith.constant 0 : index
    %c0_54 = arith.constant 0 : index
    %c0_55 = arith.constant 0 : index
    %251 = vector.load %arg11[%c0_52, %c0_53, %c0_54, %c0_55] : memref<1x1x1x4xf32, #tpu.memory_space<vmem>>, vector<1x1x1x4xf32>
    tpu.vector_store %arg11[%c0_52, %c0_53, %c0_54, %c0_55], %250 {strides = array<i32>} : memref<1x1x1x4xf32, #tpu.memory_space<vmem>>, vector<1x1x1x4xf32>,
    return
  }
  func.func @transform_0(%arg0: i32, %arg1: i32) -> (i32, i32, i32) {
    %c0_i32 = arith.constant 0 : i32
    %c0_i32_0 = arith.constant 0 : i32
    return %arg0, %arg1, %c0_i32 : i32, i32, i32
  }
  func.func @transform_1(%arg0: i32, %arg1: i32) -> (i32, i32, i32) {
    %c16_i32 = arith.constant 16 : i32
    %0 = arith.muli %arg1, %c16_i32 : i32
    %c1_i32 = arith.constant 1 : i32
    %1 = arith.subi %0, %c1_i32 : i32
    %c0_i32 = arith.constant 0 : i32
    %2 = arith.maxsi %1, %c0_i32 : i32
    %c0_i32_0 = arith.constant 0 : i32
    %c0_i32_1 = arith.constant 0 : i32
    return %arg0, %2, %c0_i32_0 : i32, i32, i32
  }
  func.func @transform_2(%arg0: i32, %arg1: i32) -> (i32, i32, i32) {
    %c1_i32 = arith.constant 1 : i32
    %0 = arith.addi %arg1, %c1_i32 : i32
    %c16_i32 = arith.constant 16 : i32
    %1 = arith.muli %0, %c16_i32 : i32
    %c15_i32 = arith.constant 15 : i32
    %2 = arith.minsi %1, %c15_i32 : i32
    %c0_i32 = arith.constant 0 : i32
    %c0_i32_0 = arith.constant 0 : i32
    return %arg0, %2, %c0_i32 : i32, i32, i32
  }
  func.func @transform_3(%arg0: i32, %arg1: i32) -> (i32, i32) {
    %c0_i32 = arith.constant 0 : i32
    %c0_i32_0 = arith.constant 0 : i32
    %c0_i32_1 = arith.constant 0 : i32
    return %c0_i32, %c0_i32_0 : i32, i32
  }
  func.func @transform_4(%arg0: i32, %arg1: i32) -> (i32, i32) {
    %c0_i32 = arith.constant 0 : i32
    %c0_i32_0 = arith.constant 0 : i32
    %c0_i32_1 = arith.constant 0 : i32
    return %c0_i32, %c0_i32_0 : i32, i32
  }
  func.func @transform_5(%arg0: i32, %arg1: i32) -> (i32, i32) {
    %c0_i32 = arith.constant 0 : i32
    %c0_i32_0 = arith.constant 0 : i32
    %c0_i32_1 = arith.constant 0 : i32
    return %c0_i32, %c0_i32_0 : i32, i32
  }
  func.func @transform_6(%arg0: i32, %arg1: i32) -> (i32, i32) {
    %c0_i32 = arith.constant 0 : i32
    %c0_i32_0 = arith.constant 0 : i32
    %c0_i32_1 = arith.constant 0 : i32
    return %c0_i32, %c0_i32_0 : i32, i32
  }
  func.func @transform_7(%arg0: i32, %arg1: i32) -> (i32, i32) {
    %c0_i32 = arith.constant 0 : i32
    %c0_i32_0 = arith.constant 0 : i32
    %c0_i32_1 = arith.constant 0 : i32
    return %c0_i32, %c0_i32_0 : i32, i32
  }
  func.func @transform_8(%arg0: i32, %arg1: i32) -> (i32, i32, i32) {
    %c0_i32 = arith.constant 0 : i32
    %c0_i32_0 = arith.constant 0 : i32
    return %arg0, %arg1, %c0_i32 : i32, i32, i32
  }
  func.func @transform_9(%arg0: i32, %arg1: i32) -> (i32, i32, i32, i32) {
    %c0_i32 = arith.constant 0 : i32
    %c0_i32_0 = arith.constant 0 : i32
    %c0_i32_1 = arith.constant 0 : i32
    return %arg0, %arg1, %c0_i32, %c0_i32_0 : i32, i32, i32, i32
  }
}

</mosaic_0001>

<bundles_post_ra>
// kernel: tpu_custom_call.1
= control target key start
LH: loop header
LB: loop body
LE: loop exit
PB: predicated region body
PF: predicated region fallthrough
CT: control target
= control target key end

     0   :  { %15 = vsyncpa [#allocation3], 0  ;;  %s14259_s0 = inlined_call_operand.vmem [shape: f32[2,256,4], index: 0, kind: input, shape index: {}]   ;;  %s14260_s1 = inlined_call_operand.vmem [shape: f32[2,256,4], index: 1, kind: input, shape index: {}]   ;;  %s14261_s2 = inlined_call_operand.vmem [shape: f32[2,256,4], index: 2, kind: input, shape index: {}]   ;;  %s14262_s3 = inlined_call_operand.vmem [shape: f32[4,4], index: 3, kind: input, shape index: {}]   ;;  %s14263_s4 = inlined_call_operand.vmem [shape: f32[4,4], index: 4, kind: input, shape index: {}]   ;;  %s14264_s5 = inlined_call_operand.vmem [shape: f32[9,4], index: 5, kind: input, shape index: {}]   ;;  %s14265_s6 = inlined_call_operand.vmem [shape: f32[9,4], index: 6, kind: input, shape index: {}]   ;;  %s14266_s7 = inlined_call_operand.vmem [shape: f32[4,4], index: 7, kind: input, shape index: {}]   ;;  %s14267_s8 = inlined_call_operand.vmem [shape: f32[2,256,4], index: 8, kind: output, shape index: {0}]   ;;  %s14268_s9 = inlined_call_operand.hbm [shape: f32[2,1,1,4], index: 9, kind: output, shape index: {1}]  }
   0x1   :  { %17 = vsyncpa [#allocation3 + $0x1], 0  ;;  %s10719_s30 = smov 0   ;;  %s10721_s10 = smov 0  }
   0x2   :  { %s10723_s11 = smov 0   ;;  %s10725_s12 = smov 0  }
   0x3   :  { %s10727_s13 = smov 0   ;;  %s10729_s14 = smov 0  }
   0x4 LB: > { %s8791_s15 = sadd.s32 4294967295, %s10666_s14   ;;  %s8792_s16 = sadd.s32 4294967294, %s10666_s14   ;;  %s10666_s14 = sphi %s10729_s14, %s23_s14   ;;  %s10662_s13 = sphi %s10727_s13, %s14882_s13   ;;  %s10658_s12 = sphi %s10725_s12, %s14881_s12   ;;  %s10654_s11 = sphi %s10723_s11, %s14880_s11   ;;  %s10650_s10 = sphi %s10721_s10, %s14879_s10   ;;  %s10646_s30 = sphi %s10719_s30, %s14878_s30  }
   0x5   : > { %s35_s17 = sadd.s32 1, %s10662_s13  ;;  %s277_s18 = sadd.s32 1, %s10654_s11 }
   0x6   : > { %p37_p0 = scmp.ge.s32.totalorder %s35_s17, 2  ;;  %p287_p1 = scmp.ne.s32.totalorder %s10654_s11, %s10650_s10 }
   0x7   : > { %p288_p2 = scmp.eq.s32.totalorder %s8791_s15, 1  ;;  %p293_p3 = scmp.ne.s32.totalorder %s10650_s10, %s10646_s30 }
   0x8   : > { %s14884_s17 = smov (%p37_p0, %s35_s17), 0  ;;  %p294_p5 = scmp.eq.s32.totalorder %s8792_s16, 1 }
   0x9   : > { %p10759_p4 = por %p288_p2, %p287_p1  ;;  %s272_s20 = ssub.s32 %s10662_s13, %s14884_s17 }
   0xa   : > { %p8795_p6 = scmp.ge.s32.totalorder %s10666_s14, 1  ;;  %p275_p7 = scmp.eq.s32.totalorder %s272_s20, 0 }
   0xb   : > { %p10766_p8 = por %p294_p5, %p293_p3  ;;  %p382_p9 = scmp.lt.s32.totalorder %s10666_s14, 3 }
   0xc   : > { %s10772_s22 = scalar_select %p275_p7, %s10654_s11, %s277_s18  }
   0xd   : > { %p383_p10 = pnand %p8795_p6, %p382_p9 }
   0xf   : > { %386 = sbr.rel (%p383_p10) target bundleno = 1251 (0x4e3), region = 52 }
  0x16   : > { %p457_p11 = scmp.lt.s32.totalorder %s10658_s12, 1  ;;  %vm548_vm0 = vcmask 31744   ;;  %v1092_v54 = vld [vmem:[%s14262_s3] sm:$0xf]  ;;  %vm1197_vm1 = vcmask 1043456   ;;  %vm4120_vm2 = vcmask 1046528  }
  0x17   : > { %v1199_v55 = vsel %vm1197_vm1, %v1092_v54, 0  ;;  %vm4011_vm3 = vcmask 1040384   ;;  %vm8619_vm4 = vcmask 24576  }
  0x18   : > { %s458_s23 = scalar_select %p457_p11, %s10658_s12, 1  ;;  %v10902_v58 = vand.u32 4294901760, %v1199_v55 }
  0x1a   : > { %s10776_s24 = sshll.u32 %s458_s23, 8  ;;  %9287 = vmatprep.subr.mxu0 %v10902_v58  ;;  %9587 = vmatprep.subr.mxu1 %v10902_v58  ;;  %s8810_s23 = sshll.u32 %s10658_s12, 4 }
  0x1b   : > { %s10782_s27 = scalar_lea.vmem %s14259_s0, %s10776_s24  ;;  %s478_s15 = scalar_lea.vmem %s14260_s1, %s10776_s24  ;;  %9288 = vmatpush3.msra.mxu0 %v10902_v58  ;;  %9588 = vmatpush3.msra.mxu1 %v10902_v58 }
  0x1c   : > { %v10785_v0 = vld [vmem:[%s10782_s27 + $0x18] sm:$0xff]  ;;  %v10788_v1 = vld [vmem:[%s10782_s27] sm:$0xff]  ;;  %v10791_v2 = vld [vmem:[%s10782_s27 + $0x8] sm:$0xff]  ;;  %s8816_s20 = sadd.s32 240, %s10776_s24  ;;  %s13388_s25 = scalar_lea.vmem %s14267_s8, %s10776_s24 }
  0x1d   : > { %v558_v3 = vsel %vm548_vm0, %v10785_v0, 0.0  ;;  %v549_v4 = vsel %vm548_vm0, %v10788_v1, 0.0  ;;  %v678_v5 = vmul.f32 %v10788_v1, %v10788_v1  ;;  %v552_v7 = vsel %vm548_vm0, %v10791_v2, 0.0  ;;  %v10805_v9 = vld [vmem:[%s10782_s27 + $0x10] sm:$0xff]  ;;  %v10817_v16 = vld [vmem:[%s10782_s27 + $0x28] sm:$0xff]  ;;  %v10820_v17 = vld [vmem:[%s10782_s27 + $0x20] sm:$0xff]  ;;  %s11010_s26 = scalar_lea.vmem %s14261_s2, %s8816_s20 }
  0x1e   : > { %559 = vadd.xlane.f32.xlu1 %v558_v3  ;;  %550 = vadd.xlane.f32.xlu0 %v549_v4  ;;  %v679_v8 = vmul.f32 %v10791_v2, %v10791_v2  ;;  %v555_v11 = vsel %vm548_vm0, %v10805_v9, 0.0  ;;  %v681_v12 = vmul.f32 %v10785_v0, %v10785_v0  ;;  %v680_v13 = vmul.f32 %v10805_v9, %v10805_v9  ;;  %v10836_v24 = vld [vmem:[%s478_s15] sm:$0xff]  ;;  %v10839_v25 = vld [vmem:[%s10782_s27 + $0x30] sm:$0xff]  ;;  %v10845_v28 = vld [vmem:[%s478_s15 + $0x8] sm:$0xff]  ;;  %s454_s20 = sand.u32 1, %s10650_s10   ;;  %s10668_s12 = smov [#allocation2]  }
  0x1f   : > { %v710_v6 = vsel %vm548_vm0, %v678_v5, 0.0  ;;  %v564_v18 = vsel %vm548_vm0, %v10817_v16, 0.0  ;;  %v561_v19 = vsel %vm548_vm0, %v10820_v17, 0.0  ;;  %v683_v20 = vmul.f32 %v10817_v16, %v10817_v16  ;;  %v10848_v29 = vld [vmem:[%s10782_s27 + $0x38] sm:$0xff]  ;;  %v10867_v40 = vld [vmem:[%s10782_s27 + $0x48] sm:$0xff]  ;;  %v10870_v41 = vld [vmem:[%s10782_s27 + $0x40] sm:$0xff] }
  0x20   : > { %v713_v10 = vsel %vm548_vm0, %v679_v8, 0.0  ;;  %v719_v14 = vsel %vm548_vm0, %v681_v12, 0.0  ;;  %v716_v15 = vsel %vm548_vm0, %v680_v13, 0.0  ;;  %v682_v21 = vmul.f32 %v10820_v17, %v10820_v17  ;;  %v10883_v48 = vld [vmem:[%s10782_s27 + $0x58] sm:$0xff]  ;;  %v10886_v49 = vld [vmem:[%s10782_s27 + $0x50] sm:$0xff]  ;;  %v10905_v59 = vld [vmem:[%s10782_s27 + $0x68] sm:$0xff] }
  0x21   : > { %v725_v22 = vsel %vm548_vm0, %v683_v20, 0.0  ;;  %v1030_v26 = vsel %vm548_vm0, %v10836_v24, 0.0  ;;  %v567_v27 = vsel %vm548_vm0, %v10839_v25, 0.0  ;;  %v1033_v30 = vsel %vm548_vm0, %v10845_v28, 0.0  ;;  %v10908_v60 = vld [vmem:[%s10782_s27 + $0x60] sm:$0xff]  ;;  %v534_v54 = vld [vmem:[%s10782_s27 + $0xb0] sm:$0xff] }
  0x22   : > { %711 = vadd.xlane.f32.xlu1 %v710_v6  ;;  %553 = vadd.xlane.f32.xlu0 %v552_v7  ;;  %v722_v23 = vsel %vm548_vm0, %v682_v21, 0.0  ;;  %v570_v31 = vsel %vm548_vm0, %v10848_v29, 0.0  ;;  %v1038_v32 = vmul.f32 %v10836_v24, %v10836_v24  ;;  %v684_v33 = vmul.f32 %v10839_v25, %v10839_v25  ;;  %v10925_v6 = vld [vmem:[%s10782_s27 + $0x78] sm:$0xff]  ;;  %v10928_v7 = vld [vmem:[%s10782_s27 + $0x70] sm:$0xff]  ;;  %s455_s24 = scalar_lea.vmem [#allocation2], %s454_s20  ;;  %s8631_s29 = scalar_lea.sflag [#allocation3], %s454_s20 }
  0x23   : > { %v1039_v36 = vmul.f32 %v10845_v28, %v10845_v28  ;;  %v685_v37 = vmul.f32 %v10848_v29, %v10848_v29  ;;  %v576_v42 = vsel %vm548_vm0, %v10867_v40, 0.0  ;;  %v573_v43 = vsel %vm548_vm0, %v10870_v41, 0.0  ;;  %s10592_s16 = sshll.u32 %s10668_s12, 4  ;;  %s10593_s16 = int_to_ptr.vmem [resolvable:$false] %s10592_s16 }
  0x24   : > { %v1040_v34 = vsel %vm548_vm0, %v1038_v32, 0.0  ;;  %v728_v35 = vsel %vm548_vm0, %v684_v33, 0.0  ;;  %v687_v44 = vmul.f32 %v10867_v40, %v10867_v40  ;;  %v686_v45 = vmul.f32 %v10870_v41, %v10870_v41  ;;  %s10594_s18 = scalar_lea.vmem %s10593_s16, 32 }
  0x25   : > { %v1043_v38 = vsel %vm548_vm0, %v1039_v36, 0.0  ;;  %v731_v39 = vsel %vm548_vm0, %v685_v37, 0.0  ;;  %v582_v50 = vsel %vm548_vm0, %v10883_v48, 0.0  ;;  %v579_v51 = vsel %vm548_vm0, %v10886_v49, 0.0  ;;  %v533_v37 = vld [vmem:[%s10782_s27 + $0xa8] sm:$0xff] }
  0x26   : > { %714 = vadd.xlane.f32.xlu1 %v713_v10  ;;  %556 = vadd.xlane.f32.xlu0 %v555_v11  ;;  %v737_v46 = vsel %vm548_vm0, %v687_v44, 0.0  ;;  %v734_v47 = vsel %vm548_vm0, %v686_v45, 0.0  ;;  %v689_v52 = vmul.f32 %v10883_v48, %v10883_v48  ;;  %v688_v53 = vmul.f32 %v10886_v49, %v10886_v49 }
  0x27   : > { %v588_v61 = vsel %vm548_vm0, %v10905_v59, 0.0  ;;  %v585_v62 = vsel %vm548_vm0, %v10908_v60, 0.0  ;;  %v691_v63 = vmul.f32 %v10905_v59, %v10905_v59  ;;  %v690_v3 = vmul.f32 %v10908_v60, %v10908_v60 }
  0x28   : > { %v743_v56 = vsel %vm548_vm0, %v689_v52, 0.0  ;;  %v740_v57 = vsel %vm548_vm0, %v688_v53, 0.0  ;;  %v594_v8 = vsel %vm548_vm0, %v10925_v6, 0.0  ;;  %v591_v10 = vsel %vm548_vm0, %v10928_v7, 0.0  ;;  %v535_v53 = vld [vmem:[%s10782_s27 + $0xb8] sm:$0xff] }
  0x29   : > { %v749_v4 = vsel %vm548_vm0, %v691_v63, 0.0  ;;  %v746_v5 = vsel %vm548_vm0, %v690_v3, 0.0  ;;  %v693_v11 = vmul.f32 %v10925_v6, %v10925_v6  ;;  %v692_v12 = vmul.f32 %v10928_v7, %v10928_v7  ;;  %v537_v3 = vld [vmem:[%s10782_s27 + $0xc8] sm:$0xff] }
  0x2a   : > { %720 = vadd.xlane.f32.xlu1 %v719_v14  ;;  %717 = vadd.xlane.f32.xlu0 %v716_v15  ;;  %v10941_v15 = vld [vmem:[%s10782_s27 + $0x88] sm:$0xff]  ;;  %v699_v44 = vmul.f32 %v533_v37, %v533_v37 }
  0x2b   : > { %v755_v13 = vsel %vm548_vm0, %v693_v11, 0.0  ;;  %v752_v14 = vsel %vm548_vm0, %v692_v12, 0.0  ;;  %v695_v21 = vmul.f32 %v10941_v15, %v10941_v15 }
  0x2e   : > { %565 = vadd.xlane.f32.xlu1 %v564_v18  ;;  %562 = vadd.xlane.f32.xlu0 %v561_v19  ;;  %v10944_v18 = vld [vmem:[%s10782_s27 + $0x80] sm:$0xff]  ;;  %v600_v19 = vsel %vm548_vm0, %v10941_v15, 0.0 }
  0x2f   : > { %v597_v20 = vsel %vm548_vm0, %v10944_v18, 0.0 }
  0x32   : > { %726 = vadd.xlane.f32.xlu1 %v725_v22  ;;  %723 = vadd.xlane.f32.xlu0 %v722_v23  ;;  %v694_v22 = vmul.f32 %v10944_v18, %v10944_v18  ;;  %v761_v23 = vsel %vm548_vm0, %v695_v21, 0.0 }
  0x36   : > { %1031 = vadd.xlane.f32.xlu1 %v1030_v26  ;;  %568 = vadd.xlane.f32.xlu0 %v567_v27  ;;  %v758_v26 = vsel %vm548_vm0, %v694_v22, 0.0  ;;  %v10957_v27 = vld [vmem:[%s10782_s27 + $0x98] sm:$0xff] }
  0x37   : > { %v697_v33 = vmul.f32 %v10957_v27, %v10957_v27 }
  0x3a   : > { %1034 = vadd.xlane.f32.xlu1 %v1033_v30  ;;  %571 = vadd.xlane.f32.xlu0 %v570_v31  ;;  %v10960_v30 = vld [vmem:[%s10782_s27 + $0x90] sm:$0xff]  ;;  %v606_v31 = vsel %vm548_vm0, %v10957_v27, 0.0 }
  0x3b   : > { %v603_v32 = vsel %vm548_vm0, %v10960_v30, 0.0 }
  0x3e   : > { %1041 = vadd.xlane.f32.xlu1 %v1040_v34  ;;  %729 = vadd.xlane.f32.xlu0 %v728_v35  ;;  %v696_v34 = vmul.f32 %v10960_v30, %v10960_v30  ;;  %v767_v35 = vsel %vm548_vm0, %v697_v33, 0.0  ;;  %v540_v33 = vld [vmem:[%s10782_s27 + $0xe0] sm:$0xff] }
  0x40   : > { %v764_v36 = vsel %vm548_vm0, %v696_v34, 0.0 }
  0x42   : > { %1044 = vadd.xlane.f32.xlu1 %v1043_v38  ;;  %732 = vadd.xlane.f32.xlu0 %v731_v39  ;;  %v532_v38 = vld [vmem:[%s10782_s27 + $0xa0] sm:$0xff]  ;;  %v10975_v39 = vsub.f32 %v1199_v55, %v10902_v58  ;;  %v618_v55 = vsel %vm548_vm0, %v535_v53, 0.0 }
  0x43   : > { %v698_v45 = vmul.f32 %v532_v38, %v532_v38 }
  0x46   : > { %577 = vadd.xlane.f32.xlu1 %v576_v42  ;;  %574 = vadd.xlane.f32.xlu0 %v573_v43  ;;  %v612_v42 = vsel %vm548_vm0, %v533_v37, 0.0  ;;  %v609_v43 = vsel %vm548_vm0, %v532_v38, 0.0  ;;  %v541_v37 = vld [vmem:[%s10782_s27 + $0xe8] sm:$0xff] }
  0x4a   : > { %738 = vadd.xlane.f32.xlu1 %v737_v46  ;;  %735 = vadd.xlane.f32.xlu0 %v734_v47  ;;  %v10980_v46 = vand.u32 4294901760, %v10975_v39 }
  0x4c   : > { %v1591_v47 = vsub.f32 %v10975_v39, %v10980_v46 }
  0x4e   : > { %583 = vadd.xlane.f32.xlu1 %v582_v50  ;;  %580 = vadd.xlane.f32.xlu0 %v579_v51  ;;  %v773_v50 = vsel %vm548_vm0, %v699_v44, 0.0  ;;  %v770_v51 = vsel %vm548_vm0, %v698_v45, 0.0  ;;  %v10986_v52 = vand.u32 4294901760, %v1591_v47  ;;  %v706_v44 = vmul.f32 %v540_v33, %v540_v33 }
  0x50   : > { %9592 = vmatprep.subr.mxu1 %v10986_v52  ;;  %9337 = vmatprep.subr.mxu0 %v10986_v52  ;;  %v794_v47 = vsel %vm548_vm0, %v706_v44, 0.0 }
  0x52   : > { %744 = vadd.xlane.f32.xlu1 %v743_v56  ;;  %741 = vadd.xlane.f32.xlu0 %v740_v57  ;;  %v615_v56 = vsel %vm548_vm0, %v534_v54, 0.0  ;;  %v701_v57 = vmul.f32 %v535_v53, %v535_v53 }
  0x56   : > { %589 = vadd.xlane.f32.xlu1 %v588_v61  ;;  %586 = vadd.xlane.f32.xlu0 %v585_v62  ;;  %v700_v61 = vmul.f32 %v534_v54, %v534_v54  ;;  %v779_v62 = vsel %vm548_vm0, %v701_v57, 0.0 }
  0x58   : > { %v776_v63 = vsel %vm548_vm0, %v700_v61, 0.0 }
  0x5a   : > { %750 = vadd.xlane.f32.xlu1 %v749_v4  ;;  %747 = vadd.xlane.f32.xlu0 %v746_v5  ;;  %v536_v4 = vld [vmem:[%s10782_s27 + $0xc0] sm:$0xff]  ;;  %v624_v5 = vsel %vm548_vm0, %v537_v3, 0.0 }
  0x5b   : > { %v702_v11 = vmul.f32 %v536_v4, %v536_v4 }
  0x5e   : > { %595 = vadd.xlane.f32.xlu1 %v594_v8  ;;  %592 = vadd.xlane.f32.xlu0 %v591_v10  ;;  %v621_v8 = vsel %vm548_vm0, %v536_v4, 0.0  ;;  %v703_v10 = vmul.f32 %v537_v3, %v537_v3 }
  0x60   : > { %v785_v12 = vsel %vm548_vm0, %v703_v10, 0.0 }
  0x62   : > { %756 = vadd.xlane.f32.xlu1 %v755_v13  ;;  %753 = vadd.xlane.f32.xlu0 %v752_v14  ;;  %v782_v13 = vsel %vm548_vm0, %v702_v11, 0.0  ;;  %v539_v14 = vld [vmem:[%s10782_s27 + $0xd8] sm:$0xff] }
  0x63   : > { %v705_v22 = vmul.f32 %v539_v14, %v539_v14 }
  0x66   : > { %601 = vadd.xlane.f32.xlu1 %v600_v19  ;;  %598 = vadd.xlane.f32.xlu0 %v597_v20  ;;  %v538_v19 = vld [vmem:[%s10782_s27 + $0xd0] sm:$0xff]  ;;  %v630_v20 = vsel %vm548_vm0, %v539_v14, 0.0 }
  0x67   : > { %v627_v21 = vsel %vm548_vm0, %v538_v19, 0.0 }
  0x6a   : > { %762 = vadd.xlane.f32.xlu1 %v761_v23  ;;  %759 = vadd.xlane.f32.xlu0 %v758_v26  ;;  %v704_v23 = vmul.f32 %v538_v19, %v538_v19  ;;  %v791_v26 = vsel %vm548_vm0, %v705_v22, 0.0 }
  0x6e   : > { %607 = vadd.xlane.f32.xlu1 %v606_v31  ;;  %604 = vadd.xlane.f32.xlu0 %v603_v32  ;;  %v788_v31 = vsel %vm548_vm0, %v704_v23, 0.0  ;;  %v546_v32 = vld [vmem:[%s11010_s26] sm:$0xff] }
  0x6f   : > { %v1060_v34 = vsel %vm548_vm0, %v546_v32, 0.0 }
  0x72   : > { %768 = vadd.xlane.f32.xlu1 %v767_v35  ;;  %765 = vadd.xlane.f32.xlu0 %v764_v36  ;;  %v633_v35 = vsel %vm548_vm0, %v540_v33, 0.0  ;;  %v547_v36 = vld [vmem:[%s11010_s26 + $0x8] sm:$0xff] }
  0x73   : > { %v1063_v38 = vsel %vm548_vm0, %v547_v36, 0.0 }
  0x76   : > { %613 = vadd.xlane.f32.xlu1 %v612_v42  ;;  %610 = vadd.xlane.f32.xlu0 %v609_v43  ;;  %v636_v42 = vsel %vm548_vm0, %v541_v37, 0.0  ;;  %v1068_v43 = vmul.f32 %v546_v32, %v546_v32 }
  0x78   : > { %v1070_v45 = vsel %vm548_vm0, %v1068_v43, 0.0 }
  0x7a   : > { %774 = vadd.xlane.f32.xlu1 %v773_v50  ;;  %771 = vadd.xlane.f32.xlu0 %v770_v51  ;;  %v1069_v50 = vmul.f32 %v547_v36, %v547_v36  ;;  %v707_v51 = vmul.f32 %v541_v37, %v541_v37 }
  0x7c   : > { %v1073_v53 = vsel %vm548_vm0, %v1069_v50, 0.0  ;;  %v797_v54 = vsel %vm548_vm0, %v707_v51, 0.0 }
  0x7e   : > { %619 = vadd.xlane.f32.xlu1 %v618_v55  ;;  %616 = vadd.xlane.f32.xlu0 %v615_v56  ;;  %v543_v55 = vld [vmem:[%s10782_s27 + $0xf8] sm:$0xff]  ;;  %v542_v56 = vld [vmem:[%s10782_s27 + $0xf0] sm:$0xff] }
  0x7f   : > { %v642_v57 = vsel %vm548_vm0, %v543_v55, 0.0  ;;  %v639_v61 = vsel %vm548_vm0, %v542_v56, 0.0 }
  0x82   : > { %780 = vadd.xlane.f32.xlu1 %v779_v62  ;;  %777 = vadd.xlane.f32.xlu0 %v776_v63  ;;  %v709_v62 = vmul.f32 %v543_v55, %v543_v55  ;;  %v708_v63 = vmul.f32 %v542_v56, %v542_v56 }
  0x84   : > { %v803_v3 = vsel %vm548_vm0, %v709_v62, 0.0  ;;  %v800_v4 = vsel %vm548_vm0, %v708_v63, 0.0 }
  0x86   : > { %625 = vadd.xlane.f32.xlu1 %v624_v5  ;;  %622 = vadd.xlane.f32.xlu0 %v621_v8 }
  0x8a   : > { %786 = vadd.xlane.f32.xlu1 %v785_v12  ;;  %783 = vadd.xlane.f32.xlu0 %v782_v13 }
  0x8e   : > { %631 = vadd.xlane.f32.xlu1 %v630_v20  ;;  %628 = vadd.xlane.f32.xlu0 %v627_v21 }
  0x92   : > { %792 = vadd.xlane.f32.xlu1 %v791_v26  ;;  %789 = vadd.xlane.f32.xlu0 %v788_v31 }
  0x96   : > { %1061 = vadd.xlane.f32.xlu1 %v1060_v34  ;;  %634 = vadd.xlane.f32.xlu0 %v633_v35 }
  0x9a   : > { %1064 = vadd.xlane.f32.xlu1 %v1063_v38  ;;  %637 = vadd.xlane.f32.xlu0 %v636_v42 }
  0x9e   : > { %1071 = vadd.xlane.f32.xlu1 %v1070_v45  ;;  %795 = vadd.xlane.f32.xlu0 %v794_v47 }
  0xa2   : > { %1074 = vadd.xlane.f32.xlu1 %v1073_v53  ;;  %798 = vadd.xlane.f32.xlu0 %v797_v54 }
  0xa6   : > { %643 = vadd.xlane.f32.xlu1 %v642_v57  ;;  %640 = vadd.xlane.f32.xlu0 %v639_v61 }
  0xaa   : > { %804 = vadd.xlane.f32.xlu1 %v803_v3  ;;  %801 = vadd.xlane.f32.xlu0 %v800_v4 }
  0xab   : > { %v560_v5 = vpop.xlane.xlu1 %559  ;;  %v551_v8 = vpop.xlane.xlu0 %550 }
  0xac   : > { %v646_v10 = vmul.f32 0.25, %v551_v8  ;;  %v649_v21 = vmul.f32 0.25, %v560_v5 }
  0xae   : > { %v870_v13 = vmul.f32 %v646_v10, %v646_v10  ;;  %v873_v35 = vmul.f32 %v649_v21, %v649_v21  ;;  %v838_v61 = vsub.f32 %v10788_v1, %v646_v10 }
  0xaf   : > { %v712_v11 = vpop.xlane.xlu1 %711  ;;  %v554_v12 = vpop.xlane.xlu0 %553 }
  0xb0   : > { %v806_v14 = vmul.f32 0.25, %v712_v11  ;;  %v647_v19 = vmul.f32 0.25, %v554_v12 }
  0xb2   : > { %v902_v20 = vsub.f32 %v806_v14, %v870_v13  ;;  %v871_v31 = vmul.f32 %v647_v19, %v647_v19  ;;  %v839_v14 = vsub.f32 %v10791_v2, %v647_v19 }
  0xb3   : > { %v715_v22 = vpop.xlane.xlu1 %714  ;;  %v557_v23 = vpop.xlane.xlu0 %556 }
  0xb4   : > { %v934_v26 = vadd.f32 1e-06, %v902_v20  ;;  %v807_v32 = vmul.f32 0.25, %v715_v22  ;;  %v648_v33 = vmul.f32 0.25, %v557_v23 }
  0xb6   : > { %10494 = vrsqrt.f32 %v934_v26  ;;  %v903_v34 = vsub.f32 %v807_v32, %v871_v31  ;;  %v872_v42 = vmul.f32 %v648_v33, %v648_v33 }
  0xb7   : > { %v721_v36 = vpop.xlane.xlu1 %720  ;;  %v718_v37 = vpop.xlane.xlu0 %717 }
  0xb8   : > { %v935_v38 = vadd.f32 1e-06, %v903_v34  ;;  %v809_v43 = vmul.f32 0.25, %v721_v36  ;;  %v808_v44 = vmul.f32 0.25, %v718_v37  ;;  %v841_v36 = vsub.f32 %v10785_v0, %v649_v21 }
  0xba   : > { %10496 = vrsqrt.f32 %v935_v38  ;;  %v905_v45 = vsub.f32 %v809_v43, %v873_v35  ;;  %v904_v47 = vsub.f32 %v808_v44, %v872_v42  ;;  %v840_v43 = vsub.f32 %v10805_v9, %v648_v33 }
  0xbb   : > { %v566_v50 = vpop.xlane.xlu1 %565  ;;  %v563_v51 = vpop.xlane.xlu0 %562 }
  0xbc   : > { %v937_v53 = vadd.f32 1e-06, %v905_v45  ;;  %v936_v54 = vadd.f32 1e-06, %v904_v47  ;;  %v11032_v55 = vmul.f32 0.25, %v566_v50  ;;  %v11034_v56 = vmul.f32 0.25, %v563_v51 }
  0xbe   : > { %10498 = vrsqrt.f32 %v937_v53  ;;  %v875_v57 = vmul.f32 %v11032_v55, %v11032_v55  ;;  %v874_v4 = vmul.f32 %v11034_v56, %v11034_v56 }
  0xbf   : > { %10500 = vrsqrt.f32 %v936_v54  ;;  %v727_v62 = vpop.xlane.xlu1 %726  ;;  %v724_v63 = vpop.xlane.xlu0 %723 }
  0xc0   : > { %v10495_v3 = vpop.eup %10494  ;;  %v811_v5 = vmul.f32 0.25, %v727_v62  ;;  %v810_v8 = vmul.f32 0.25, %v724_v63 }
  0xc1   : > { %v998_v11 = vmul.f32 %v10495_v3, %v838_v61 }
  0xc2   : > { %v907_v12 = vsub.f32 %v811_v5, %v875_v57  ;;  %v906_v13 = vsub.f32 %v810_v8, %v874_v4  ;;  %v843_v8 = vsub.f32 %v10817_v16, %v11032_v55 }
  0xc3   : > { %v1032_v20 = vpop.xlane.xlu1 %1031  ;;  %v569_v22 = vpop.xlane.xlu0 %568  ;;  %v1102_v23 = vsel %vm548_vm0, %v998_v11, 0 }
  0xc4   : > { %v10497_v26 = vpop.eup %10496  ;;  %v939_v1 = vadd.f32 1e-06, %v907_v12  ;;  %v938_v10 = vadd.f32 1e-06, %v906_v13  ;;  %v11043_v32 = vand.u32 4294901760, %v1102_v23  ;;  %v11045_v34 = vmul.f32 0.25, %v1032_v20 }
  0xc5   : > { %v999_v31 = vmul.f32 %v10497_v26, %v839_v14  ;;  %v11047_v35 = vmul.f32 0.25, %v569_v22  ;;  %v842_v14 = vsub.f32 %v10820_v17, %v11034_v56 }
  0xc6   : > { %10502 = vrsqrt.f32 %v939_v1  ;;  %v11051_v19 = vsub.f32 %v1102_v23, %v11043_v32  ;;  %v1050_v0 = vmul.f32 %v11045_v34, %v11045_v34 }
  0xc7   : > { %10504 = vrsqrt.f32 %v938_v10  ;;  %v1035_v37 = vpop.xlane.xlu1 %1034  ;;  %v572_v2 = vpop.xlane.xlu0 %571  ;;  %v1105_v38 = vsel %vm548_vm0, %v999_v31, 0  ;;  %v876_v21 = vmul.f32 %v11047_v35, %v11047_v35 }
  0xc8   : > { %14496 = vst [vmem:[#allocation5_spill] sm:$0xff] %v11051_v19  ;;  %v10499_v42 = vpop.eup %10498  ;;  %v11055_v44 = vand.u32 4294901760, %v1105_v38  ;;  %v11058_v50 = vand.u32 4294901760, %v11051_v19  ;;  %v11064_v53 = vmul.f32 0.25, %v1035_v37  ;;  %v11066_v54 = vmul.f32 0.25, %v572_v2 }
  0xc9   : > { %v10501_v45 = vpop.eup %10500  ;;  %v1001_v47 = vmul.f32 %v10499_v42, %v841_v36 }
  0xca   : > { %14497 = vst [vmem:[#allocation6_spill] sm:$0xff] %v11055_v44  ;;  %14498 = vst [vmem:[#allocation7_spill] sm:$0xff] %v11058_v50  ;;  %v1000_v51 = vmul.f32 %v10501_v45, %v840_v43  ;;  %v1270_v33 = vsub.f32 %v11051_v19, %v11058_v50  ;;  %v11071_v61 = vsub.f32 %v1105_v38, %v11055_v44 }
  0xcb   : > { %v1042_v57 = vpop.xlane.xlu1 %1041  ;;  %v730_v9 = vpop.xlane.xlu0 %729  ;;  %v1111_v62 = vsel %vm548_vm0, %v1001_v47, 0  ;;  %v1051_v26 = vmul.f32 %v11064_v53, %v11064_v53  ;;  %v877_v16 = vmul.f32 %v11066_v54, %v11066_v54 }
  0xcc   : > { %14499 = vst [vmem:[#allocation8_spill] sm:$0xff] %v11071_v61  ;;  %v1046_v63 = vmul.f32 0.25, %v1042_v57  ;;  %v812_v3 = vmul.f32 0.25, %v730_v9  ;;  %v1108_v4 = vsel %vm548_vm0, %v1000_v51, 0  ;;  %v11075_v5 = vand.u32 4294901760, %v1111_v62 }
  0xcd   : > { %v11079_v11 = vand.u32 4294901760, %v1270_v33  ;;  %v11082_v12 = vand.u32 4294901760, %v11071_v61  ;;  %v11084_v13 = vand.u32 4294901760, %v1108_v4 }
  0xce   : > { %14500 = vst [vmem:[#allocation9_spill] sm:$0xff] %v11075_v5  ;;  %v1052_v20 = vsub.f32 %v1046_v63, %v1050_v0  ;;  %v908_v22 = vsub.f32 %v812_v3, %v876_v21  ;;  %v11089_v23 = vsub.f32 %v1111_v62, %v11075_v5 }
  0xcf   : > { %14501 = vst [vmem:[#allocation10_spill] sm:$0xff] %v11082_v12  ;;  %14502 = vst [vmem:[#allocation11_spill] sm:$0xff] %v11084_v13  ;;  %9289 = vmatprep.mubr.f32.mxu0 %v11079_v11  ;;  %v1045_v55 = vpop.xlane.xlu1 %1044  ;;  %v733_v1 = vpop.xlane.xlu0 %732  ;;  %v1280_v10 = vsub.f32 %v11071_v61, %v11082_v12  ;;  %v11099_v17 = vsub.f32 %v1108_v4, %v11084_v13 }
  0xd0   : > { %14503 = vst [vmem:[#allocation12_spill] sm:$0xff] %v11089_v23  ;;  %v10503_v56 = vpop.eup %10502  ;;  %v1054_v31 = vadd.f32 1e-06, %v1052_v20  ;;  %v940_v36 = vadd.f32 1e-06, %v908_v22  ;;  %v1047_v37 = vmul.f32 0.25, %v1045_v55 }
  0xd1   : > { %14504 = vst [vmem:[#allocation13_spill] sm:$0xff] %v11099_v17  ;;  %v813_v2 = vmul.f32 0.25, %v733_v1  ;;  %v10505_v38 = vpop.eup %10504  ;;  %v1003_v42 = vmul.f32 %v10503_v56, %v843_v8  ;;  %v11101_v43 = vand.u32 4294901760, %v1280_v10  ;;  %v11104_v45 = vand.u32 4294901760, %v11099_v17 }
  0xd2   : > { %v11107_v47 = vand.u32 4294901760, %v11089_v23  ;;  %v1002_v51 = vmul.f32 %v10505_v38, %v842_v14  ;;  %10506 = vrsqrt.f32 %v1054_v31  ;;  %v1053_v0 = vsub.f32 %v1047_v37, %v1051_v26 }
  0xd3   : > { %14505 = vst [vmem:[#allocation14_spill] sm:$0xff] %v11104_v45  ;;  %v909_v21 = vsub.f32 %v813_v2, %v877_v16  ;;  %10508 = vrsqrt.f32 %v940_v36  ;;  %9290 = vmatmul.mubr.f32.vlgmr.msra.gmra.mrb[0].mxu0 %v11101_v43  ;;  %v578_v57 = vpop.xlane.xlu1 %577  ;;  %v575_v9 = vpop.xlane.xlu0 %574  ;;  %v1290_v33 = vsub.f32 %v11099_v17, %v11104_v45  ;;  %v1117_v63 = vsel %vm548_vm0, %v1003_v42, 0 }
  0xd4   : > { %14506 = vst [vmem:[#allocation15_spill] sm:$0xff] %v11107_v47  ;;  %v1300_v62 = vsub.f32 %v11089_v23, %v11107_v47  ;;  %v1055_v3 = vadd.f32 1e-06, %v1053_v0  ;;  %v11115_v8 = vmul.f32 0.25, %v578_v57  ;;  %v11117_v14 = vmul.f32 0.25, %v575_v9  ;;  %9338 = vmatpush3.msra.mxu0 %v10986_v52 }
  0xd5   : > { %v941_v4 = vadd.f32 1e-06, %v909_v21  ;;  %v11120_v20 = vand.u32 4294901760, %v1290_v33  ;;  %v1114_v26 = vsel %vm548_vm0, %v1002_v51, 0  ;;  %v11125_v16 = vand.u32 4294901760, %v1117_v63  ;;  %9387 = vmatprep.subr.mxu0 %v10975_v39 }
  0xd6   : > { %v11122_v22 = vand.u32 4294901760, %v1300_v62  ;;  %10510 = vrsqrt.f32 %v1055_v3  ;;  %v879_v55 = vmul.f32 %v11115_v8, %v11115_v8  ;;  %v11131_v56 = vand.u32 4294901760, %v1114_v26 }
  0xd7   : > { %14507 = vst [vmem:[#allocation16_spill] sm:$0xff] %v11125_v16  ;;  %10512 = vrsqrt.f32 %v941_v4  ;;  %9292 = vmatprep.mubr.f32.mxu0 %v11120_v20  ;;  %v739_v1 = vpop.xlane.xlu1 %738  ;;  %v736_v10 = vpop.xlane.xlu0 %735  ;;  %v11134_v31 = vsub.f32 %v1117_v63, %v11125_v16  ;;  %v878_v36 = vmul.f32 %v11117_v14, %v11117_v14  ;;  %v1048_v21 = vsub.f32 %v10836_v24, %v11045_v34 }
  0xd8   : > { %14508 = vst [vmem:[#allocation17_spill] sm:$0xff] %v11131_v56  ;;  %v815_v37 = vmul.f32 0.25, %v739_v1  ;;  %9293 = vmatmul.mubr.f32.gmra.mrb[2].mxu0 %v11122_v22  ;;  %v814_v2 = vmul.f32 0.25, %v736_v10  ;;  %v11140_v38 = vsub.f32 %v1114_v26, %v11131_v56  ;;  %v844_v57 = vsub.f32 %v10839_v25, %v11047_v35 }
  0xd9   : > { %14509 = vst [vmem:[#allocation18_spill] sm:$0xff] %v11134_v31  ;;  %v11143_v42 = vand.u32 4294901760, %v11134_v31  ;;  %v1049_v24 = vsub.f32 %v10845_v28, %v11064_v53 }
  0xda   : > { %14510 = vst [vmem:[#allocation19_spill] sm:$0xff] %v11140_v38  ;;  %v911_v51 = vsub.f32 %v815_v37, %v879_v55  ;;  %v910_v0 = vsub.f32 %v814_v2, %v878_v36  ;;  %v11150_v62 = vand.u32 4294901760, %v11140_v38  ;;  %v845_v2 = vsub.f32 %v10848_v29, %v11066_v54 }
  0xdb   : > { %14511 = vst [vmem:[#allocation20_spill] sm:$0xff] %v11143_v42  ;;  %v584_v9 = vpop.xlane.xlu1 %583  ;;  %v581_v33 = vpop.xlane.xlu0 %580  ;;  %v1320_v63 = vsub.f32 %v11134_v31, %v11143_v42 }
  0xdc   : > { %14512 = vst [vmem:[#allocation21_spill] sm:$0xff] %v11150_v62  ;;  %v10507_v3 = vpop.eup %10506  ;;  %v943_v4 = vadd.f32 1e-06, %v911_v51  ;;  %v942_v26 = vadd.f32 1e-06, %v910_v0  ;;  %v11154_v1 = vmul.f32 0.25, %v584_v9  ;;  %v1310_v25 = vsub.f32 %v11140_v38, %v11150_v62 }
  0xdd   : > { %v11156_v55 = vmul.f32 0.25, %v581_v33  ;;  %v10509_v10 = vpop.eup %10508  ;;  %v1058_v34 = vmul.f32 %v10507_v3, %v1048_v21  ;;  %v11164_v37 = vand.u32 4294901760, %v1320_v63 }
  0xde   : > { %v1004_v35 = vmul.f32 %v10509_v10, %v844_v57  ;;  %10514 = vrsqrt.f32 %v943_v4  ;;  %v881_v36 = vmul.f32 %v11154_v1, %v11154_v1  ;;  %v11170_v0 = vand.u32 4294901760, %v1310_v25 }
  0xdf   : > { %10516 = vrsqrt.f32 %v942_v26  ;;  %v880_v51 = vmul.f32 %v11156_v55, %v11156_v55  ;;  %v745_v28 = vpop.xlane.xlu1 %744  ;;  %v742_v53 = vpop.xlane.xlu0 %741  ;;  %v2981_v3 = vsel %vm548_vm0, %v1058_v34, 0 }
  0xe0   : > { %v10511_v9 = vpop.eup %10510  ;;  %v817_v21 = vmul.f32 0.25, %v745_v28  ;;  %v816_v57 = vmul.f32 0.25, %v742_v53  ;;  %v1120_v33 = vsel %vm548_vm0, %v1004_v35, 0  ;;  %9295 = vmatprep.mubr.f32.mxu0 %v11170_v0  ;;  %v11177_v54 = vand.u32 4294901760, %v2981_v3 }
  0xe1   : > { %v10513_v63 = vpop.eup %10512  ;;  %v1059_v4 = vmul.f32 %v10511_v9, %v1049_v24  ;;  %v11175_v29 = vand.u32 4294901760, %v1120_v33  ;;  %9296 = vmatmul.mubr.f32.gmra.mrb[4].mxu0 %v11164_v37 }
  0xe2   : > { %14514 = vst [vmem:[#allocation23_spill] sm:$0xff] %v11177_v54  ;;  %v1005_v26 = vmul.f32 %v10513_v63, %v845_v2  ;;  %v913_v10 = vsub.f32 %v817_v21, %v881_v36  ;;  %v912_v25 = vsub.f32 %v816_v57, %v880_v51  ;;  %v11184_v34 = vsub.f32 %v2981_v3, %v11177_v54 }
  0xe3   : > { %14513 = vst [vmem:[#allocation22_spill] sm:$0xff] %v11175_v29  ;;  %v590_v42 = vpop.xlane.xlu1 %589  ;;  %v587_v28 = vpop.xlane.xlu0 %586  ;;  %v11181_v53 = vsub.f32 %v1120_v33, %v11175_v29  ;;  %v2984_v24 = vsel %vm548_vm0, %v1059_v4, 0  ;;  %v847_v57 = vsub.f32 %v10867_v40, %v11115_v8  ;;  %v846_v33 = vsub.f32 %v10870_v41, %v11117_v14 }
  0xe4   : > { %14516 = vst [vmem:[#allocation25_spill] sm:$0xff] %v11184_v34  ;;  %v945_v35 = vadd.f32 1e-06, %v913_v10  ;;  %v944_v9 = vadd.f32 1e-06, %v912_v25  ;;  %v11187_v62 = vmul.f32 0.25, %v590_v42 }
  0xe5   : > { %14515 = vst [vmem:[#allocation24_spill] sm:$0xff] %v11181_v53  ;;  %v11189_v47 = vmul.f32 0.25, %v587_v28  ;;  %v11192_v36 = vand.u32 4294901760, %v11181_v53  ;;  %v11195_v2 = vand.u32 4294901760, %v11184_v34  ;;  %v1123_v51 = vsel %vm548_vm0, %v1005_v26, 0 }
  0xe6   : > { %v11198_v21 = vand.u32 4294901760, %v2984_v24  ;;  %10518 = vrsqrt.f32 %v945_v35  ;;  %v883_v42 = vmul.f32 %v11187_v62, %v11187_v62  ;;  %v11212_v41 = vand.u32 4294901760, %v1123_v51 }
  0xe7   : > { %14517 = vst [vmem:[#allocation26_spill] sm:$0xff] %v11192_v36  ;;  %14518 = vst [vmem:[#allocation27_spill] sm:$0xff] %v11195_v2  ;;  %10520 = vrsqrt.f32 %v944_v9  ;;  %v882_v3 = vmul.f32 %v11189_v47, %v11189_v47  ;;  %v751_v63 = vpop.xlane.xlu1 %750  ;;  %v748_v4 = vpop.xlane.xlu0 %747  ;;  %v1330_v26 = vsub.f32 %v11181_v53, %v11192_v36  ;;  %v3055_v10 = vsub.f32 %v11184_v34, %v11195_v2 }
  0xe8   : > { %14519 = vst [vmem:[#allocation28_spill] sm:$0xff] %v11198_v21  ;;  %v10515_v40 = vpop.eup %10514  ;;  %v819_v8 = vmul.f32 0.25, %v751_v63  ;;  %v818_v25 = vmul.f32 0.25, %v748_v4  ;;  %v11215_v14 = vsub.f32 %v2984_v24, %v11198_v21  ;;  %v11222_v53 = vsub.f32 %v1123_v51, %v11212_v41 }
  0xe9   : > { %v10517_v28 = vpop.eup %10516  ;;  %v1007_v35 = vmul.f32 %v10515_v40, %v847_v57  ;;  %v11217_v9 = vand.u32 4294901760, %v1330_v26  ;;  %v11219_v45 = vand.u32 4294901760, %v3055_v10 }
  0xea   : > { %14520 = vst [vmem:[#allocation29_spill] sm:$0xff] %v11215_v14  ;;  %v1006_v12 = vmul.f32 %v10517_v28, %v846_v33  ;;  %v915_v50 = vsub.f32 %v819_v8, %v883_v42  ;;  %v914_v36 = vsub.f32 %v818_v25, %v882_v3  ;;  %14522 = vst [vmem:[#allocation31_spill] sm:$0xff] %v11222_v53  ;;  %v11227_v24 = vand.u32 4294901760, %v11215_v14 }
  0xeb   : > { %14521 = vst [vmem:[#allocation30_spill] sm:$0xff] %v11219_v45  ;;  %9298 = vmatprep.mubr.f32.mxu0 %v11217_v9  ;;  %9589 = vmatprep.mubr.f32.mxu1 %v11219_v45  ;;  %v596_v63 = vpop.xlane.xlu1 %595  ;;  %v593_v4 = vpop.xlane.xlu0 %592  ;;  %v1129_v57 = vsel %vm548_vm0, %v1007_v35, 0  ;;  %v11235_v51 = vand.u32 4294901760, %v11222_v53  ;;  %v849_v25 = vsub.f32 %v10883_v48, %v11154_v1 }
  0xec   : > { %14523 = vst [vmem:[#allocation32_spill] sm:$0xff] %v11227_v24  ;;  %v947_v26 = vadd.f32 1e-06, %v915_v50  ;;  %v946_v10 = vadd.f32 1e-06, %v914_v36  ;;  %v11230_v40 = vmul.f32 0.25, %v596_v63  ;;  %v3065_v42 = vsub.f32 %v11215_v14, %v11227_v24 }
  0xed   : > { %v11232_v33 = vmul.f32 0.25, %v593_v4  ;;  %14524 = vst [vmem:[#allocation33_spill] sm:$0xff] %v11235_v51  ;;  %v1126_v3 = vsel %vm548_vm0, %v1006_v12, 0  ;;  %v11240_v8 = vand.u32 4294901760, %v1129_v57  ;;  %v848_v50 = vsub.f32 %v10886_v49, %v11156_v55 }
  0xee   : > { %10522 = vrsqrt.f32 %v947_v26  ;;  %v885_v36 = vmul.f32 %v11230_v40, %v11230_v40  ;;  %v1340_v35 = vsub.f32 %v11222_v53, %v11235_v51  ;;  %v11252_v12 = vand.u32 4294901760, %v3065_v42 }
  0xef   : > { %10524 = vrsqrt.f32 %v946_v10  ;;  %v884_v28 = vmul.f32 %v11232_v33, %v11232_v33  ;;  %v757_v63 = vpop.xlane.xlu1 %756  ;;  %v754_v4 = vpop.xlane.xlu0 %753  ;;  %v11254_v31 = vand.u32 4294901760, %v1126_v3  ;;  %v11257_v49 = vsub.f32 %v1129_v57, %v11240_v8 }
  0xf0   : > { %14525 = vst [vmem:[#allocation34_spill] sm:$0xff] %v11252_v12  ;;  %v10519_v45 = vpop.eup %10518  ;;  %v821_v48 = vmul.f32 0.25, %v757_v63  ;;  %v820_v1 = vmul.f32 0.25, %v754_v4  ;;  %v11259_v10 = vand.u32 4294901760, %v1340_v35  ;;  %9590 = vmatmul.mubr.f32.vlgmr.msra.gmra.mrb[0].mxu1 %v11252_v12  ;;  %v851_v12 = vsub.f32 %v10905_v59, %v11187_v62 }
  0xf1   : > { %14526 = vst [vmem:[#allocation35_spill] sm:$0xff] %v11257_v49  ;;  %v10521_v55 = vpop.eup %10520  ;;  %v1009_v26 = vmul.f32 %v10519_v45, %v849_v25  ;;  %9594 = vmatprep.mubr.f32.mxu1 %v11177_v54  ;;  %9593 = vmatpush3.msra.mxu1 %v10986_v52  ;;  %v11265_v63 = vand.u32 4294901760, %v11257_v49  ;;  %v11269_v45 = vsub.f32 %v1126_v3, %v11254_v31 }
  0xf2   : > { %14527 = vst [vmem:[#allocation36_spill] sm:$0xff] %v11259_v10  ;;  %v1008_v38 = vmul.f32 %v10521_v55, %v848_v50  ;;  %v917_v42 = vsub.f32 %v821_v48, %v885_v36  ;;  %v916_v51 = vsub.f32 %v820_v1, %v884_v28  ;;  %9299 = vmatmul.mubr.f32.gmra.mrb[6].mxu0 %v11259_v10 }
  0xf3   : > { %14528 = vst [vmem:[#allocation37_spill] sm:$0xff] %v11265_v63  ;;  %v602_v57 = vpop.xlane.xlu1 %601  ;;  %v599_v4 = vpop.xlane.xlu0 %598  ;;  %14529 = vst [vmem:[#allocation38_spill] sm:$0xff] %v11269_v45  ;;  %9597 = vmatprep.subr.mxu1 %v10975_v39  ;;  %v1135_v25 = vsel %vm548_vm0, %v1009_v26, 0  ;;  %v11278_v48 = vand.u32 4294901760, %v11269_v45  ;;  %v1360_v1 = vsub.f32 %v11257_v49, %v11265_v63 }
  0xf4   : > { %v949_v50 = vadd.f32 1e-06, %v917_v42  ;;  %v948_v35 = vadd.f32 1e-06, %v916_v51  ;;  %v11273_v36 = vmul.f32 0.25, %v602_v57  ;;  %v11275_v28 = vmul.f32 0.25, %v599_v4 }
  0xf5   : > { %14530 = vst [vmem:[#allocation39_spill] sm:$0xff] %v11278_v48  ;;  %v1132_v55 = vsel %vm548_vm0, %v1008_v38, 0  ;;  %v11283_v3 = vand.u32 4294901760, %v1135_v25  ;;  %v850_v51 = vsub.f32 %v10908_v60, %v11189_v47  ;;  %v1350_v57 = vsub.f32 %v11269_v45, %v11278_v48 }
  0xf6   : > { %10526 = vrsqrt.f32 %v949_v50  ;;  %v887_v26 = vmul.f32 %v11273_v36, %v11273_v36  ;;  %v886_v42 = vmul.f32 %v11275_v28, %v11275_v28  ;;  %v11295_v4 = vand.u32 4294901760, %v1360_v1 }
  0xf7   : > { %14531 = vst [vmem:[#allocation40_spill] sm:$0xff] %v11283_v3  ;;  %10528 = vrsqrt.f32 %v948_v35  ;;  %v763_v38 = vpop.xlane.xlu1 %762  ;;  %v760_v63 = vpop.xlane.xlu0 %759  ;;  %v11297_v53 = vand.u32 4294901760, %v1132_v55  ;;  %v11300_v60 = vsub.f32 %v1135_v25, %v11283_v3  ;;  %v11302_v35 = vand.u32 4294901760, %v1350_v57 }
  0xf8   : > { %14532 = vst [vmem:[#allocation41_spill] sm:$0xff] %v11295_v4  ;;  %v10523_v49 = vpop.eup %10522  ;;  %v823_v59 = vmul.f32 0.25, %v763_v38  ;;  %v822_v62 = vmul.f32 0.25, %v760_v63  ;;  %9595 = vmatmul.mubr.f32.vlgmr.msra.gmra.mrb[0].mxu1 %v11198_v21 }
  0xf9   : > { %14533 = vst [vmem:[#allocation42_spill] sm:$0xff] %v11300_v60  ;;  %v10525_v47 = vpop.eup %10524  ;;  %v1011_v50 = vmul.f32 %v10523_v49, %v851_v12  ;;  %14534 = vst [vmem:[#allocation43_spill] sm:$0xff] %v11302_v35  ;;  %9599 = vmatprep.mubr.f32.mxu1 %v11184_v34  ;;  %9598 = vmatpush3.msra.mxu1 %v10975_v39  ;;  %v11308_v63 = vand.u32 4294901760, %v11300_v60  ;;  %v11312_v12 = vsub.f32 %v1132_v55, %v11297_v53 }
  0xfa   : > { %v1010_v23 = vmul.f32 %v10525_v47, %v850_v51  ;;  %v919_v1 = vsub.f32 %v823_v59, %v887_v26  ;;  %v918_v48 = vsub.f32 %v822_v62, %v886_v42  ;;  %9301 = vmatprep.mubr.f32.mxu0 %v11302_v35  ;;  %9602 = vmatprep.subr.mxu1 %v10902_v58 }
  0xfb   : > { %14535 = vst [vmem:[#allocation44_spill] sm:$0xff] %v11308_v63  ;;  %v608_v25 = vpop.xlane.xlu1 %607  ;;  %v605_v38 = vpop.xlane.xlu0 %604  ;;  %14536 = vst [vmem:[#allocation45_spill] sm:$0xff] %v11312_v12  ;;  %v1141_v49 = vsel %vm548_vm0, %v1011_v50, 0  ;;  %9302 = vmatmul.mubr.f32.gmra.mrb[8].mxu0 %v11295_v4  ;;  %v11322_v59 = vand.u32 4294901760, %v11312_v12  ;;  %v1380_v62 = vsub.f32 %v11300_v60, %v11308_v63  ;;  %v853_v50 = vsub.f32 %v10925_v6, %v11230_v40 }
  0xfc   : > { %v951_v51 = vadd.f32 1e-06, %v919_v1  ;;  %v950_v26 = vadd.f32 1e-06, %v918_v48  ;;  %v11317_v42 = vmul.f32 0.25, %v608_v25  ;;  %v11319_v57 = vmul.f32 0.25, %v605_v38 }
  0xfd   : > { %14537 = vst [vmem:[#allocation46_spill] sm:$0xff] %v11322_v59  ;;  %v1138_v55 = vsel %vm548_vm0, %v1010_v23, 0  ;;  %v11327_v47 = vand.u32 4294901760, %v1141_v49  ;;  %v852_v48 = vsub.f32 %v10928_v7, %v11232_v33  ;;  %v1370_v38 = vsub.f32 %v11312_v12, %v11322_v59 }
  0xfe   : > { %10530 = vrsqrt.f32 %v951_v51  ;;  %v889_v1 = vmul.f32 %v11317_v42, %v11317_v42  ;;  %v888_v25 = vmul.f32 %v11319_v57, %v11319_v57  ;;  %v11339_v34 = vand.u32 4294901760, %v1380_v62 }
  0xff   : > { %10532 = vrsqrt.f32 %v950_v26  ;;  %v769_v23 = vpop.xlane.xlu1 %768  ;;  %v766_v63 = vpop.xlane.xlu0 %765  ;;  %v11341_v45 = vand.u32 4294901760, %v1138_v55  ;;  %v11344_v7 = vsub.f32 %v1141_v49, %v11327_v47  ;;  %v11346_v26 = vand.u32 4294901760, %v1370_v38 }
 0x100   : > { %14538 = vst [vmem:[#allocation47_spill] sm:$0xff] %v11339_v34  ;;  %v10527_v60 = vpop.eup %10526  ;;  %v825_v6 = vmul.f32 0.25, %v769_v23  ;;  %v824_v40 = vmul.f32 0.25, %v766_v63  ;;  %9600 = vmatmul.mubr.f32.vlgmr.msra.gmra.mrb[0].mxu1 %v11215_v14 }
 0x101   : > { %14539 = vst [vmem:[#allocation48_spill] sm:$0xff] %v11341_v45  ;;  %14540 = vst [vmem:[#allocation49_spill] sm:$0xff] %v11344_v7  ;;  %v10529_v33 = vpop.eup %10528  ;;  %v1013_v51 = vmul.f32 %v10527_v60, %v853_v50  ;;  %9604 = vmatprep.mubr.f32.mxu1 %v11195_v2  ;;  %9603 = vmatpush3.msra.mxu1 %v10902_v58  ;;  %v11352_v63 = vand.u32 4294901760, %v11344_v7  ;;  %v11356_v60 = vsub.f32 %v1138_v55, %v11341_v45 }
 0x102   : > { %14541 = vst [vmem:[#allocation50_spill] sm:$0xff] %v11346_v26  ;;  %v1012_v17 = vmul.f32 %v10529_v33, %v852_v48  ;;  %v921_v62 = vsub.f32 %v825_v6, %v889_v1  ;;  %v920_v59 = vsub.f32 %v824_v40, %v888_v25  ;;  %9304 = vmatprep.mubr.f32.mxu0 %v11346_v26 }
 0x103   : > { %14542 = vst [vmem:[#allocation51_spill] sm:$0xff] %v11352_v63  ;;  %v614_v49 = vpop.xlane.xlu1 %613  ;;  %v611_v23 = vpop.xlane.xlu0 %610  ;;  %14543 = vst [vmem:[#allocation52_spill] sm:$0xff] %v11356_v60  ;;  %9607 = vmatprep.subr.mxu1 %v10980_v46  ;;  %v1147_v50 = vsel %vm548_vm0, %v1013_v51, 0  ;;  %9305 = vmatmul.mubr.f32.gmra.mrb[10].mxu0 %v11339_v34  ;;  %v11366_v6 = vand.u32 4294901760, %v11356_v60  ;;  %v1400_v40 = vsub.f32 %v11344_v7, %v11352_v63 }
 0x104   : > { %v953_v48 = vadd.f32 1e-06, %v921_v62  ;;  %v952_v1 = vadd.f32 1e-06, %v920_v59  ;;  %v11361_v25 = vmul.f32 0.25, %v614_v49  ;;  %v11363_v38 = vmul.f32 0.25, %v611_v23 }
 0x105   : > { %14544 = vst [vmem:[#allocation53_spill] sm:$0xff] %v11366_v6  ;;  %v1144_v55 = vsel %vm548_vm0, %v1012_v17, 0  ;;  %v11371_v33 = vand.u32 4294901760, %v1147_v50  ;;  %v855_v51 = vsub.f32 %v10941_v15, %v11273_v36  ;;  %v854_v59 = vsub.f32 %v10944_v18, %v11275_v28 }
 0x106   : > { %10534 = vrsqrt.f32 %v953_v48  ;;  %v891_v62 = vmul.f32 %v11361_v25, %v11361_v25  ;;  %v890_v49 = vmul.f32 %v11363_v38, %v11363_v38  ;;  %v1390_v23 = vsub.f32 %v11356_v60, %v11366_v6 }
 0x107   : > { %14545 = vst [vmem:[#allocation54_spill] sm:$0xff] %v11371_v33  ;;  %10536 = vrsqrt.f32 %v952_v1  ;;  %v775_v17 = vpop.xlane.xlu1 %774  ;;  %v11383_v2 = vand.u32 4294901760, %v1400_v40  ;;  %v772_v14 = vpop.xlane.xlu0 %771  ;;  %v11385_v7 = vand.u32 4294901760, %v1144_v55  ;;  %v11388_v18 = vsub.f32 %v1147_v50, %v11371_v33 }
 0x108   : > { %v10531_v63 = vpop.eup %10530  ;;  %v827_v15 = vmul.f32 0.25, %v775_v17  ;;  %v826_v36 = vmul.f32 0.25, %v772_v14  ;;  %v11390_v1 = vand.u32 4294901760, %v1390_v23  ;;  %9605 = vmatmul.mubr.f32.vlgmr.msra.gmra.mrb[0].mxu1 %v11227_v24 }
 0x109   : > { %14546 = vst [vmem:[#allocation55_spill] sm:$0xff] %v11383_v2  ;;  %14547 = vst [vmem:[#allocation56_spill] sm:$0xff] %v11385_v7  ;;  %v10533_v28 = vpop.eup %10532  ;;  %v1015_v48 = vmul.f32 %v10531_v63, %v855_v51  ;;  %9609 = vmatprep.mubr.f32.mxu1 %v11177_v54  ;;  %9608 = vmatpush3.msra.mxu1 %v10980_v46  ;;  %v11396_v14 = vand.u32 4294901760, %v11388_v18  ;;  %v11400_v63 = vsub.f32 %v1144_v55, %v11385_v7 }
 0x10a   : > { %14548 = vst [vmem:[#allocation57_spill] sm:$0xff] %v11388_v18  ;;  %14549 = vst [vmem:[#allocation58_spill] sm:$0xff] %v11390_v1  ;;  %v1014_v12 = vmul.f32 %v10533_v28, %v854_v59  ;;  %v923_v40 = vsub.f32 %v827_v15, %v891_v62  ;;  %v922_v6 = vsub.f32 %v826_v36, %v890_v49  ;;  %9307 = vmatprep.mubr.f32.mxu0 %v11390_v1 }
 0x10b   : > { %14550 = vst [vmem:[#allocation59_spill] sm:$0xff] %v11396_v14  ;;  %v620_v50 = vpop.xlane.xlu1 %619  ;;  %v617_v17 = vpop.xlane.xlu0 %616  ;;  %14551 = vst [vmem:[#allocation60_spill] sm:$0xff] %v11400_v63  ;;  %9612 = vmatprep.subr.mxu1 %v10902_v58  ;;  %v1153_v51 = vsel %vm548_vm0, %v1015_v48, 0  ;;  %9308 = vmatmul.mubr.f32.gmra.mrb[12].mxu0 %v11383_v2  ;;  %v11410_v15 = vand.u32 4294901760, %v11400_v63  ;;  %v1420_v36 = vsub.f32 %v11388_v18, %v11396_v14 }
 0x10c   : > { %v955_v59 = vadd.f32 1e-06, %v923_v40  ;;  %v954_v62 = vadd.f32 1e-06, %v922_v6  ;;  %v11405_v49 = vmul.f32 0.25, %v620_v50  ;;  %v11407_v23 = vmul.f32 0.25, %v617_v17 }
 0x10d   : > { %14552 = vst [vmem:[#allocation61_spill] sm:$0xff] %v11410_v15  ;;  %v1150_v55 = vsel %vm548_vm0, %v1014_v12, 0  ;;  %v11415_v28 = vand.u32 4294901760, %v1153_v51  ;;  %v857_v48 = vsub.f32 %v10957_v27, %v11317_v42  ;;  %v856_v6 = vsub.f32 %v10960_v30, %v11319_v57 }
 0x10e   : > { %10538 = vrsqrt.f32 %v955_v59  ;;  %v893_v40 = vmul.f32 %v11405_v49, %v11405_v49  ;;  %v892_v50 = vmul.f32 %v11407_v23, %v11407_v23  ;;  %v1410_v17 = vsub.f32 %v11400_v63, %v11410_v15 }
 0x10f   : > { %14553 = vst [vmem:[#allocation62_spill] sm:$0xff] %v11415_v28  ;;  %10540 = vrsqrt.f32 %v954_v62  ;;  %v781_v12 = vpop.xlane.xlu1 %780  ;;  %v11427_v24 = vand.u32 4294901760, %v1420_v36  ;;  %v778_v14 = vpop.xlane.xlu0 %777  ;;  %v11429_v60 = vand.u32 4294901760, %v1150_v55  ;;  %v11432_v30 = vsub.f32 %v1153_v51, %v11415_v28 }
 0x110   : > { %v10535_v18 = vpop.eup %10534  ;;  %v829_v27 = vmul.f32 0.25, %v781_v12  ;;  %v828_v42 = vmul.f32 0.25, %v778_v14  ;;  %v11434_v62 = vand.u32 4294901760, %v1410_v17  ;;  %9610 = vmatmul.mubr.f32.vlgmr.msra.gmra.mrb[0].mxu1 %v11198_v21 }
 0x111   : > { %14554 = vst [vmem:[#allocation63_spill] sm:$0xff] %v11427_v24  ;;  %14555 = vst [vmem:[#allocation64_spill] sm:$0xff] %v11429_v60  ;;  %v10537_v57 = vpop.eup %10536  ;;  %v1017_v59 = vmul.f32 %v10535_v18, %v857_v48  ;;  %9614 = vmatprep.mubr.f32.mxu1 %v11177_v54  ;;  %9613 = vmatpush3.msra.mxu1 %v10902_v58  ;;  %v11440_v14 = vand.u32 4294901760, %v11432_v30  ;;  %v11444_v48 = vsub.f32 %v1150_v55, %v11429_v60  ;;  %v10567_v54 = vld [vmem:[%s10782_s27 + $0xa0] sm:$0xff] }
 0x112   : > { %14556 = vst [vmem:[#allocation65_spill] sm:$0xff] %v11432_v30  ;;  %14557 = vst [vmem:[#allocation66_spill] sm:$0xff] %v11434_v62  ;;  %v1016_v61 = vmul.f32 %v10537_v57, %v856_v6  ;;  %v925_v36 = vsub.f32 %v829_v27, %v893_v40  ;;  %v924_v15 = vsub.f32 %v828_v42, %v892_v50  ;;  %9310 = vmatprep.mubr.f32.mxu0 %v11434_v62 }
 0x113   : > { %14558 = vst [vmem:[#allocation67_spill] sm:$0xff] %v11440_v14  ;;  %v626_v51 = vpop.xlane.xlu1 %625  ;;  %v623_v18 = vpop.xlane.xlu0 %622  ;;  %14559 = vst [vmem:[#allocation68_spill] sm:$0xff] %v11444_v48  ;;  %v1159_v6 = vsel %vm548_vm0, %v1017_v59, 0  ;;  %9617 = vmatprep.subr.mxu1 %v10902_v58  ;;  %9311 = vmatmul.mubr.f32.gmra.mrb[14].mxu0 %v11427_v24  ;;  %v11454_v27 = vand.u32 4294901760, %v11444_v48  ;;  %v1440_v42 = vsub.f32 %v11432_v30, %v11440_v14  ;;  %v10566_v59 = vld [vmem:[%s10782_s27 + $0xa8] sm:$0xff] }
 0x114   : > { %v957_v40 = vadd.f32 1e-06, %v925_v36  ;;  %v956_v50 = vadd.f32 1e-06, %v924_v15  ;;  %v11449_v17 = vmul.f32 0.25, %v626_v51  ;;  %v11451_v12 = vmul.f32 0.25, %v623_v18 }
 0x115   : > { %14560 = vst [vmem:[#allocation69_spill] sm:$0xff] %v11454_v27  ;;  %v1156_v55 = vsel %vm548_vm0, %v1016_v61, 0  ;;  %v11459_v57 = vand.u32 4294901760, %v1159_v6  ;;  %v859_v36 = vsub.f32 %v10566_v59, %v11361_v25  ;;  %v858_v15 = vsub.f32 %v10567_v54, %v11363_v38 }
 0x116   : > { %10542 = vrsqrt.f32 %v957_v40  ;;  %v895_v51 = vmul.f32 %v11449_v17, %v11449_v17  ;;  %v894_v18 = vmul.f32 %v11451_v12, %v11451_v12  ;;  %v1430_v14 = vsub.f32 %v11444_v48, %v11454_v27 }
 0x117   : > { %14561 = vst [vmem:[#allocation70_spill] sm:$0xff] %v11459_v57  ;;  %10544 = vrsqrt.f32 %v956_v50  ;;  %v787_v61 = vpop.xlane.xlu1 %786  ;;  %v11471_v30 = vand.u32 4294901760, %v1440_v42  ;;  %v784_v63 = vpop.xlane.xlu0 %783  ;;  %v11473_v24 = vand.u32 4294901760, %v1156_v55  ;;  %v11476_v54 = vsub.f32 %v1159_v6, %v11459_v57 }
 0x118   : > { %v10539_v19 = vpop.eup %10538  ;;  %v831_v25 = vmul.f32 0.25, %v787_v61  ;;  %v830_v59 = vmul.f32 0.25, %v784_v63  ;;  %v11478_v50 = vand.u32 4294901760, %v1430_v14  ;;  %9615 = vmatmul.mubr.f32.vlgmr.msra.gmra.mrb[0].mxu1 %v11198_v21 }
 0x119   : > { %14562 = vst [vmem:[#allocation71_spill] sm:$0xff] %v11471_v30  ;;  %14563 = vst [vmem:[#allocation72_spill] sm:$0xff] %v11473_v24  ;;  %v10541_v38 = vpop.eup %10540  ;;  %v1019_v40 = vmul.f32 %v10539_v19, %v859_v36  ;;  %v11482_v42 = vsub.f32 %v1156_v55, %v11473_v24  ;;  %9618 = vmatpush3.msra.mxu1 %v10902_v58  ;;  %v11487_v19 = vand.u32 4294901760, %v11476_v54 }
 0x11a   : > { %14564 = vst [vmem:[#allocation73_spill] sm:$0xff] %v11476_v54  ;;  %14565 = vst [vmem:[#allocation74_spill] sm:$0xff] %v11478_v50  ;;  %v1018_v62 = vmul.f32 %v10541_v38, %v858_v15  ;;  %v927_v27 = vsub.f32 %v831_v25, %v895_v51  ;;  %v926_v48 = vsub.f32 %v830_v59, %v894_v18  ;;  %9313 = vmatprep.mubr.f32.mxu0 %v11478_v50  ;;  %v10568_v38 = vld [vmem:[%s10782_s27 + $0xb8] sm:$0xff] }
 0x11b   : > { %14566 = vst [vmem:[#allocation75_spill] sm:$0xff] %v11482_v42  ;;  %v632_v63 = vpop.xlane.xlu1 %631  ;;  %v629_v6 = vpop.xlane.xlu0 %628  ;;  %14567 = vst [vmem:[#allocation76_spill] sm:$0xff] %v11487_v19  ;;  %v1165_v14 = vsel %vm548_vm0, %v1019_v40, 0  ;;  %9622 = vmatprep.subr.mxu1 %v10986_v52  ;;  %9314 = vmatmul.mubr.f32.gmra.mrb[16].mxu0 %v11471_v30  ;;  %v11497_v18 = vand.u32 4294901760, %v11482_v42  ;;  %v1460_v61 = vsub.f32 %v11476_v54, %v11487_v19  ;;  %v10569_v40 = vld [vmem:[%s10782_s27 + $0xb0] sm:$0xff] }
 0x11c   : > { %v959_v36 = vadd.f32 1e-06, %v927_v27  ;;  %v958_v55 = vadd.f32 1e-06, %v926_v48  ;;  %v11492_v15 = vmul.f32 0.25, %v632_v63  ;;  %v11494_v51 = vmul.f32 0.25, %v629_v6 }
 0x11d   : > { %14568 = vst [vmem:[#allocation77_spill] sm:$0xff] %v11497_v18  ;;  %v1162_v25 = vsel %vm548_vm0, %v1018_v62, 0  ;;  %v11502_v59 = vand.u32 4294901760, %v1165_v14  ;;  %v861_v27 = vsub.f32 %v10568_v38, %v11405_v49  ;;  %v860_v48 = vsub.f32 %v10569_v40, %v11407_v23 }
 0x11e   : > { %10546 = vrsqrt.f32 %v959_v36  ;;  %v897_v63 = vmul.f32 %v11492_v15, %v11492_v15  ;;  %v896_v6 = vmul.f32 %v11494_v51, %v11494_v51  ;;  %v1450_v21 = vsub.f32 %v11482_v42, %v11497_v18 }
 0x11f   : > { %14569 = vst [vmem:[#allocation78_spill] sm:$0xff] %v11502_v59  ;;  %10548 = vrsqrt.f32 %v958_v55  ;;  %v793_v62 = vpop.xlane.xlu1 %792  ;;  %v11514_v19 = vand.u32 4294901760, %v1460_v61  ;;  %v790_v54 = vpop.xlane.xlu0 %789  ;;  %v11516_v50 = vand.u32 4294901760, %v1162_v25  ;;  %v11519_v23 = vsub.f32 %v1165_v14, %v11502_v59 }
 0x120   : > { %v10543_v30 = vpop.eup %10542  ;;  %v833_v49 = vmul.f32 0.25, %v793_v62  ;;  %v832_v38 = vmul.f32 0.25, %v790_v54  ;;  %v11521_v40 = vand.u32 4294901760, %v1450_v21 }
 0x121   : > { %14570 = vst [vmem:[#allocation79_spill] sm:$0xff] %v11514_v19  ;;  %14571 = vst [vmem:[#allocation80_spill] sm:$0xff] %v11516_v50  ;;  %v10545_v36 = vpop.eup %10544  ;;  %v1021_v55 = vmul.f32 %v10543_v30, %v861_v27  ;;  %v11524_v18 = vsub.f32 %v1162_v25, %v11516_v50  ;;  %v11528_v62 = vand.u32 4294901760, %v11519_v23 }
 0x122   : > { %14572 = vst [vmem:[#allocation81_spill] sm:$0xff] %v11519_v23  ;;  %14573 = vst [vmem:[#allocation82_spill] sm:$0xff] %v11521_v40  ;;  %v1020_v2 = vmul.f32 %v10545_v36, %v860_v48  ;;  %v929_v1 = vsub.f32 %v833_v49, %v897_v63  ;;  %v928_v34 = vsub.f32 %v832_v38, %v896_v6  ;;  %9316 = vmatprep.mubr.f32.mxu0 %v11521_v40 }
 0x123   : > { %14574 = vst [vmem:[#allocation83_spill] sm:$0xff] %v11524_v18  ;;  %v1062_v61 = vpop.xlane.xlu1 %1061  ;;  %v635_v54 = vpop.xlane.xlu0 %634  ;;  %14575 = vst [vmem:[#allocation84_spill] sm:$0xff] %v11528_v62  ;;  %v1171_v14 = vsel %vm548_vm0, %v1021_v55, 0  ;;  %9317 = vmatmul.mubr.f32.gmra.mrb[18].mxu0 %v11514_v19  ;;  %v11533_v30 = vand.u32 4294901760, %v11524_v18  ;;  %v1480_v25 = vsub.f32 %v11519_v23, %v11528_v62  ;;  %v10571_v62 = vld [vmem:[%s10782_s27 + $0xc0] sm:$0xff] }
 0x124   : > { %v961_v42 = vadd.f32 1e-06, %v929_v1  ;;  %v960_v21 = vadd.f32 1e-06, %v928_v34  ;;  %v1168_v27 = vsel %vm548_vm0, %v1020_v2, 0  ;;  %v11538_v48 = vand.u32 4294901760, %v1171_v14 }
 0x125   : > { %14576 = vst [vmem:[#allocation85_spill] sm:$0xff] %v11533_v30  ;;  %v11540_v63 = vmul.f32 0.25, %v1062_v61  ;;  %v11542_v6 = vmul.f32 0.25, %v635_v54  ;;  %v10570_v1 = vld [vmem:[%s10782_s27 + $0xc8] sm:$0xff]  ;;  %v1470_v34 = vsub.f32 %v11524_v18, %v11533_v30  ;;  %v862_v2 = vsub.f32 %v10571_v62, %v11451_v12 }
 0x126   : > { %14577 = vst [vmem:[#allocation86_spill] sm:$0xff] %v11538_v48  ;;  %10550 = vrsqrt.f32 %v961_v42  ;;  %v863_v49 = vsub.f32 %v10570_v1, %v11449_v17  ;;  %v11550_v23 = vand.u32 4294901760, %v1480_v25  ;;  %v11552_v42 = vand.u32 4294901760, %v1168_v27  ;;  %v10572_v17 = vld [vmem:[%s10782_s27 + $0xd8] sm:$0xff] }
 0x127   : > { %10552 = vrsqrt.f32 %v960_v21  ;;  %v1065_v38 = vpop.xlane.xlu1 %1064  ;;  %v638_v36 = vpop.xlane.xlu0 %637  ;;  %v11555_v61 = vsub.f32 %v1171_v14, %v11538_v48  ;;  %v865_v21 = vsub.f32 %v10572_v17, %v11492_v15  ;;  %v11559_v1 = vand.u32 4294901760, %v1470_v34 }
 0x128   : > { %v10547_v55 = vpop.eup %10546  ;;  %14578 = vst [vmem:[#allocation87_spill] sm:$0xff] %v11550_v23  ;;  %14579 = vst [vmem:[#allocation88_spill] sm:$0xff] %v11552_v42  ;;  %v1080_v18 = vmul.f32 %v11540_v63, %v11540_v63  ;;  %v898_v12 = vmul.f32 %v11542_v6, %v11542_v6  ;;  %v11565_v62 = vmul.f32 0.25, %v1065_v38  ;;  %v11568_v14 = vmul.f32 0.25, %v638_v36  ;;  %v10573_v36 = vld [vmem:[%s10782_s27 + $0xd0] sm:$0xff] }
 0x129   : > { %14580 = vst [vmem:[#allocation89_spill] sm:$0xff] %v11555_v61  ;;  %v10549_v54 = vpop.eup %10548  ;;  %v1023_v19 = vmul.f32 %v10547_v55, %v863_v49  ;;  %14581 = vst [vmem:[#allocation90_spill] sm:$0xff] %v11559_v1  ;;  %9319 = vmatprep.mubr.f32.mxu0 %v11559_v1  ;;  %v11571_v15 = vsub.f32 %v1168_v27, %v11552_v42  ;;  %v11574_v34 = vand.u32 4294901760, %v11555_v61 }
 0x12a   : > { %v1022_v30 = vmul.f32 %v10549_v54, %v862_v2  ;;  %9320 = vmatmul.mubr.f32.gmra.mrb[20].mxu0 %v11550_v23  ;;  %v864_v1 = vsub.f32 %v10573_v36, %v11494_v51  ;;  %v899_v23 = vmul.f32 %v11568_v14, %v11568_v14 }
 0x12b   : > { %v1072_v25 = vpop.xlane.xlu1 %1071  ;;  %v796_v49 = vpop.xlane.xlu0 %795  ;;  %14582 = vst [vmem:[#allocation91_spill] sm:$0xff] %v11571_v15  ;;  %14583 = vst [vmem:[#allocation92_spill] sm:$0xff] %v11574_v34  ;;  %v1177_v55 = vsel %vm548_vm0, %v1023_v19, 0  ;;  %v11584_v40 = vand.u32 4294901760, %v11571_v15  ;;  %v1500_v27 = vsub.f32 %v11555_v61, %v11574_v34  ;;  %v1081_v19 = vmul.f32 %v11565_v62, %v11565_v62 }
 0x12c   : > { %v1076_v2 = vmul.f32 0.25, %v1072_v25  ;;  %v834_v54 = vmul.f32 0.25, %v796_v49  ;;  %v1174_v38 = vsel %vm548_vm0, %v1022_v30, 0  ;;  %v11579_v17 = vand.u32 4294901760, %v1177_v55 }
 0x12d   : > { %14585 = vst [vmem:[#allocation94_spill] sm:$0xff] %v11584_v40  ;;  %v11588_v26 = vand.u32 4294901760, %v1174_v38  ;;  %v1490_v51 = vsub.f32 %v11571_v15, %v11584_v40  ;;  %v11599_v4 = vand.u32 4294901760, %v1500_v27 }
 0x12e   : > { %14584 = vst [vmem:[#allocation93_spill] sm:$0xff] %v11579_v17  ;;  %v1082_v25 = vsub.f32 %v1076_v2, %v1080_v18  ;;  %v930_v49 = vsub.f32 %v834_v54, %v898_v12  ;;  %v11593_v30 = vsub.f32 %v1177_v55, %v11579_v17 }
 0x12f   : > { %14586 = vst [vmem:[#allocation95_spill] sm:$0xff] %v11588_v26  ;;  %v1075_v36 = vpop.xlane.xlu1 %1074  ;;  %v799_v34 = vpop.xlane.xlu0 %798  ;;  %v11602_v61 = vsub.f32 %v1174_v38, %v11588_v26  ;;  %v11604_v17 = vand.u32 4294901760, %v1490_v51 }
 0x130   : > { %14587 = vst [vmem:[#allocation96_spill] sm:$0xff] %v11593_v30  ;;  %v10551_v48 = vpop.eup %10550  ;;  %v1084_v35 = vadd.f32 1e-06, %v1082_v25  ;;  %v962_v18 = vadd.f32 1e-06, %v930_v49  ;;  %v1077_v12 = vmul.f32 0.25, %v1075_v36 }
 0x131   : > { %14588 = vst [vmem:[#allocation97_spill] sm:$0xff] %v11602_v61  ;;  %v835_v2 = vmul.f32 0.25, %v799_v34  ;;  %v10553_v55 = vpop.eup %10552  ;;  %v1025_v54 = vmul.f32 %v10551_v48, %v865_v21  ;;  %v11607_v10 = vand.u32 4294901760, %v11602_v61  ;;  %v11610_v40 = vand.u32 4294901760, %v11593_v30  ;;  %9322 = vmatprep.mubr.f32.mxu0 %v11604_v17 }
 0x132   : > { %v1024_v27 = vmul.f32 %v10553_v55, %v864_v1  ;;  %10554 = vrsqrt.f32 %v1084_v35  ;;  %v1083_v15 = vsub.f32 %v1077_v12, %v1081_v19  ;;  %9323 = vmatmul.mubr.f32.gmra.mrb[22].mxu0 %v11599_v4 }
 0x133   : > { %14589 = vst [vmem:[#allocation98_spill] sm:$0xff] %v11607_v10  ;;  %14590 = vst [vmem:[#allocation99_spill] sm:$0xff] %v11610_v40  ;;  %v931_v38 = vsub.f32 %v835_v2, %v899_v23  ;;  %10556 = vrsqrt.f32 %v962_v18  ;;  %v644_v25 = vpop.xlane.xlu1 %643  ;;  %v641_v49 = vpop.xlane.xlu0 %640  ;;  %v1510_v48 = vsub.f32 %v11602_v61, %v11607_v10  ;;  %v1520_v21 = vsub.f32 %v11593_v30, %v11610_v40  ;;  %v10574_v40 = vld [vmem:[%s11010_s26] sm:$0xff] }
 0x134   : > { %v1183_v34 = vsel %vm548_vm0, %v1025_v54, 0  ;;  %v1085_v51 = vadd.f32 1e-06, %v1083_v15  ;;  %v11619_v35 = vmul.f32 0.25, %v644_v25  ;;  %v11621_v23 = vmul.f32 0.25, %v641_v49 }
 0x135   : > { %v963_v1 = vadd.f32 1e-06, %v931_v38  ;;  %v11623_v19 = vand.u32 4294901760, %v1510_v48  ;;  %v11625_v36 = vand.u32 4294901760, %v1520_v21  ;;  %v1180_v18 = vsel %vm548_vm0, %v1024_v27, 0 }
 0x136   : > { %v11628_v12 = vand.u32 4294901760, %v1183_v34  ;;  %10558 = vrsqrt.f32 %v1085_v51  ;;  %v901_v15 = vmul.f32 %v11619_v35, %v11619_v35  ;;  %v11633_v54 = vand.u32 4294901760, %v1180_v18 }
 0x137   : > { %14591 = vst [vmem:[#allocation100_spill] sm:$0xff] %v11623_v19  ;;  %14592 = vst [vmem:[#allocation101_spill] sm:$0xff] %v11625_v36  ;;  %10560 = vrsqrt.f32 %v963_v1  ;;  %9325 = vmatprep.mubr.f32.mxu0 %v11623_v19  ;;  %v805_v2 = vpop.xlane.xlu1 %804  ;;  %v802_v55 = vpop.xlane.xlu0 %801  ;;  %v900_v27 = vmul.f32 %v11621_v23, %v11621_v23 }
 0x138   : > { %14593 = vst [vmem:[#allocation102_spill] sm:$0xff] %v11628_v12  ;;  %14594 = vst [vmem:[#allocation103_spill] sm:$0xff] %v11633_v54  ;;  %v11636_v38 = vsub.f32 %v1183_v34, %v11628_v12  ;;  %v837_v25 = vmul.f32 0.25, %v805_v2  ;;  %9326 = vmatmul.mubr.f32.gmra.mrb[24].mxu0 %v11625_v36  ;;  %v836_v49 = vmul.f32 0.25, %v802_v55  ;;  %v11642_v48 = vsub.f32 %v1180_v18, %v11633_v54  ;;  %v10575_v55 = vld [vmem:[%s10782_s27 + $0xe0] sm:$0xff] }
 0x139   : > { %v1078_v34 = vsub.f32 %v10574_v40, %v11540_v63  ;;  %v866_v18 = vsub.f32 %v10575_v55, %v11542_v6  ;;  %v10576_v63 = vld [vmem:[%s11010_s26 + $0x8] sm:$0xff]  ;;  %s8648_s26 = sshll.u32 %s455_s24, 4  ;;  %s14214_s26 = int_to_ptr.vmem [resolvable:$true] %s8648_s26 }
 0x13a   : > { %14595 = vst [vmem:[#allocation104_spill] sm:$0xff] %v11636_v38  ;;  %14596 = vst [vmem:[#allocation105_spill] sm:$0xff] %v11642_v48  ;;  %v11645_v21 = vand.u32 4294901760, %v11636_v38  ;;  %v933_v51 = vsub.f32 %v837_v25, %v901_v15  ;;  %v932_v1 = vsub.f32 %v836_v49, %v900_v27  ;;  %v11650_v10 = vand.u32 4294901760, %v11642_v48  ;;  %s10588_s15 = scalar_lea.vmem %s14214_s26, 16  ;;  %p10595_p1 = scmp.lt.s32.totalorder %s14214_s26, %s10593_s16 }
 0x13b   : > { %v1079_v49 = vsub.f32 %v10576_v63, %v11565_v62  ;;  %p10589_p12 = scmp.ne.s32.totalorder %s14214_s26, %s10588_s15  ;;  %p10596_p2 = scmp.lt.s32.totalorder %s10594_s18, %s10588_s15 }
 0x13c   : > { %14597 = vst [vmem:[#allocation106_spill] sm:$0xff] %v11645_v21  ;;  %14598 = vst [vmem:[#allocation107_spill] sm:$0xff] %v11650_v10  ;;  %v1540_v2 = vsub.f32 %v11636_v38, %v11645_v21  ;;  %v10555_v30 = vpop.eup %10554  ;;  %v965_v61 = vadd.f32 1e-06, %v933_v51  ;;  %v964_v36 = vadd.f32 1e-06, %v932_v1  ;;  %v1530_v27 = vsub.f32 %v11642_v48, %v11650_v10 }
 0x13d   : > { %v10557_v19 = vpop.eup %10556  ;;  %v1088_v15 = vmul.f32 %v10555_v30, %v1078_v34  ;;  %v10577_v51 = vld [vmem:[%s10782_s27 + $0xe8] sm:$0xff]  ;;  %p10590_p13 = pnand %p10589_p12, %p10759_p4  ;;  %p10597_p3 = por %p10596_p2, %p10595_p1 }
 0x13e   : > { %v1026_v25 = vmul.f32 %v10557_v19, %v866_v18  ;;  %10562 = vrsqrt.f32 %v965_v61  ;;  %v11658_v40 = vand.u32 4294901760, %v1540_v2  ;;  %v11662_v21 = vand.u32 4294901760, %v1530_v27 }
 0x13f   : > { %10564 = vrsqrt.f32 %v964_v36  ;;  %v3479_v38 = vsel %vm548_vm0, %v1088_v15, 0  ;;  %v867_v1 = vsub.f32 %v10577_v51, %v11568_v14  ;;  %p10591_p0 = pneg %p10590_p13 }
 0x140   : > { %14599 = vst [vmem:[#allocation108_spill] sm:$0xff] %v11658_v40  ;;  %14600 = vst [vmem:[#allocation109_spill] sm:$0xff] %v11662_v21  ;;  %v10559_v6 = vpop.eup %10558  ;;  %v1186_v30 = vsel %vm548_vm0, %v1026_v25, 0  ;;  %v11668_v34 = vand.u32 4294901760, %v3479_v38  ;;  %9328 = vmatprep.mubr.f32.mxu0 %v11662_v21 }
 0x141   : > { %v10561_v19 = vpop.eup %10560  ;;  %v1089_v61 = vmul.f32 %v10559_v6, %v1079_v49  ;;  %v11671_v2 = vand.u32 4294901760, %v1186_v30  ;;  %9329 = vmatmul.mubr.f32.gmra.mrb[26].mxu0 %v11658_v40  ;;  %v10578_v6 = vld [vmem:[%s10782_s27 + $0xf8] sm:$0xff]  ;;  %p10598_p5 = pnand %p10597_p3, %p10591_p0 }
 0x142   : > { %14601 = vst [vmem:[#allocation110_spill] sm:$0xff] %v11668_v34  ;;  %v1027_v62 = vmul.f32 %v10561_v19, %v867_v1  ;;  %v11675_v36 = vsub.f32 %v3479_v38, %v11668_v34  ;;  %v869_v51 = vsub.f32 %v10578_v6, %v11619_v35 }
 0x143   : > { %14602 = vst [vmem:[#allocation111_spill] sm:$0xff] %v11671_v2  ;;  %v3482_v14 = vsel %vm548_vm0, %v1089_v61, 0  ;;  %v11679_v55 = vsub.f32 %v1186_v30, %v11671_v2  ;;  %v10579_v61 = vld [vmem:[%s10782_s27 + $0xf0] sm:$0xff] }
 0x144   : > { %14603 = vst [vmem:[#allocation112_spill] sm:$0xff] %v11675_v36  ;;  %v11681_v18 = vand.u32 4294901760, %v3482_v14  ;;  %v11684_v15 = vand.u32 4294901760, %v11675_v36  ;;  %v1189_v27 = vsel %vm548_vm0, %v1027_v62, 0  ;;  %v868_v62 = vsub.f32 %v10579_v61, %v11621_v23 }
 0x145   : > { %v11688_v25 = vand.u32 4294901760, %v11679_v55  ;;  %v11690_v63 = vand.u32 4294901760, %v1189_v27 }
 0x146   : > { %14604 = vst [vmem:[#allocation113_spill] sm:$0xff] %v11681_v18  ;;  %14605 = vst [vmem:[#allocation114_spill] sm:$0xff] %v11684_v15  ;;  %v3553_v38 = vsub.f32 %v11675_v36, %v11684_v15  ;;  %v11695_v49 = vsub.f32 %v3482_v14, %v11681_v18 }
 0x147   : > { %14606 = vst [vmem:[#allocation115_spill] sm:$0xff] %v11690_v63  ;;  %v1550_v1 = vsub.f32 %v11679_v55, %v11688_v25  ;;  %v11702_v30 = vsub.f32 %v1189_v27, %v11690_v63 }
 0x148   : > { %14607 = vst [vmem:[#allocation116_spill] sm:$0xff] %v11695_v49  ;;  %v10563_v19 = vpop.eup %10562  ;;  %v11706_v10 = vand.u32 4294901760, %v3553_v38  ;;  %v11709_v48 = vand.u32 4294901760, %v11695_v49 }
 0x149   : > { %v10565_v14 = vpop.eup %10564  ;;  %v1029_v40 = vmul.f32 %v10563_v19, %v869_v51  ;;  %v11711_v21 = vand.u32 4294901760, %v1550_v1  ;;  %v11714_v35 = vand.u32 4294901760, %v11702_v30 }
 0x14a   : > { %14608 = vst [vmem:[#allocation117_spill] sm:$0xff] %v11706_v10  ;;  %14609 = vst [vmem:[#allocation118_spill] sm:$0xff] %v11709_v48  ;;  %v1028_v6 = vmul.f32 %v10565_v14, %v868_v62  ;;  %9619 = vmatprep.mubr.f32.mxu1 %v11706_v10  ;;  %v3563_v27 = vsub.f32 %v11695_v49, %v11709_v48  ;;  %v14642_v10 = vld [vmem:[#allocation38_spill] sm:$0xff] }
 0x14b   : > { %9331 = vmatprep.mubr.f32.mxu0 %v11711_v21  ;;  %v1560_v23 = vsub.f32 %v11702_v30, %v11714_v35  ;;  %v1195_v38 = vsel %vm548_vm0, %v1029_v40, 0 }
 0x14c   : > { %v11723_v61 = vand.u32 4294901760, %v3563_v27  ;;  %v1192_v51 = vsel %vm548_vm0, %v1028_v6, 0  ;;  %v11726_v1 = vand.u32 4294901760, %v1195_v38 }
 0x14d   : > { %v11728_v19 = vand.u32 4294901760, %v1560_v23  ;;  %v11730_v62 = vand.u32 4294901760, %v1192_v51 }
 0x14e   : > { %14610 = vst [vmem:[#allocation119_spill] sm:$0xff] %v11723_v61  ;;  %9620 = vmatmul.mubr.f32.vlgmr.msra.gmra.mrb[2].mxu1 %v11723_v61  ;;  %v11734_v14 = vsub.f32 %v1195_v38, %v11726_v1 }
 0x14f   : > { %14611 = vst [vmem:[#allocation120_spill] sm:$0xff] %v11730_v62  ;;  %9332 = vmatmul.mubr.f32.gmra.mrb[28].mxu0 %v11728_v19  ;;  %9624 = vmatprep.mubr.f32.mxu1 %v11668_v34  ;;  %v11739_v40 = vsub.f32 %v1192_v51, %v11730_v62 }
 0x150   : > { %9623 = vmatpush3.msra.mxu1 %v10986_v52  ;;  %v11743_v6 = vand.u32 4294901760, %v11734_v14  ;;  %v4845_v52 = vld [vmem:[%s14263_s4] sm:$0xf] }
 0x151   : > { %v11746_v27 = vand.u32 4294901760, %v11739_v40  ;;  %9627 = vmatprep.subr.mxu1 %v10975_v39 }
 0x152   : > { %14612 = vst [vmem:[#allocation121_spill] sm:$0xff] %v11743_v6  ;;  %v1580_v23 = vsub.f32 %v11734_v14, %v11743_v6  ;;  %v14645_v6 = vld [vmem:[#allocation35_spill] sm:$0xff] }
 0x153   : > { %14613 = vst [vmem:[#allocation122_spill] sm:$0xff] %v11746_v27  ;;  %v1570_v38 = vsub.f32 %v11739_v40, %v11746_v27  ;;  %v14648_v27 = vld [vmem:[#allocation42_spill] sm:$0xff] }
 0x154   : > { %v11753_v61 = vand.u32 4294901760, %v1580_v23 }
 0x155   : > { %v11755_v51 = vand.u32 4294901760, %v1570_v38 }
 0x156   : > { %9625 = vmatmul.mubr.f32.vlgmr.msra.gmra.mrb[2].mxu1 %v11681_v18 }
 0x157   : > { %9334 = vmatprep.mubr.f32.mxu0 %v11755_v51  ;;  %9629 = vmatprep.mubr.f32.mxu1 %v11675_v36  ;;  %v14636_v36 = vld [vmem:[#allocation19_spill] sm:$0xff] }
 0x158   : > { %9335 = vmatmul.mubr.f32.gmra.mrb[30].mxu0 %v11753_v61  ;;  %9628 = vmatpush3.msra.mxu1 %v10975_v39 }
 0x159   : > { %9339 = vmatprep.mubr.f32.mxu0 %v11043_v32  ;;  %9632 = vmatprep.subr.mxu1 %v10902_v58 }
 0x15c   : > { %9340 = vmatmul.mubr.f32.vlgmr.msra.gmra.mrb[0].mxu0 %v11055_v44 }
 0x15d   : > { %9388 = vmatpush3.msra.mxu0 %v10975_v39  ;;  %9342 = vmatprep.mubr.f32.mxu0 %v11084_v13  ;;  %v4855_v39 = vsel %vm1197_vm1, %v4845_v52, 0 }
 0x15e   : > { %9630 = vmatmul.mubr.f32.vlgmr.msra.gmra.mrb[2].mxu1 %v11695_v49  ;;  %9437 = vmatprep.subr.mxu0 %v10902_v58  ;;  %v11781_v23 = vand.u32 4294901760, %v4855_v39  ;;  %v14631_v49 = vld [vmem:[#allocation8_spill] sm:$0xff] }
 0x15f   : > { %9634 = vmatprep.mubr.f32.mxu1 %v11684_v15  ;;  %9633 = vmatpush3.msra.mxu1 %v10902_v58  ;;  %v14630_v15 = vld [vmem:[#allocation82_spill] sm:$0xff] }
 0x160   : > { %9343 = vmatmul.mubr.f32.gmra.mrb[2].mxu0 %v11075_v5  ;;  %9637 = vmatprep.subr.mxu1 %v10980_v46  ;;  %v11788_v38 = vsub.f32 %v4855_v39, %v11781_v23 }
 0x161   : > { %9345 = vmatprep.mubr.f32.mxu0 %v11131_v56 }
 0x162   : > { %14614 = vst [vmem:[#allocation123_spill] sm:$0xff] %v11788_v38  ;;  %v11793_v52 = vand.u32 4294901760, %v11788_v38 }
 0x164   : > { %9346 = vmatmul.mubr.f32.gmra.mrb[4].mxu0 %v11125_v16  ;;  %v5247_v39 = vsub.f32 %v11788_v38, %v11793_v52 }
 0x165   : > { %9348 = vmatprep.mubr.f32.mxu0 %v11175_v29 }
 0x166   : > { %9635 = vmatmul.mubr.f32.vlgmr.msra.gmra.mrb[2].mxu1 %v11709_v48  ;;  %v11805_v48 = vand.u32 4294901760, %v5247_v39  ;;  %v14621_v39 = vld [vmem:[#allocation93_spill] sm:$0xff] }
 0x167   : > { %9639 = vmatprep.mubr.f32.mxu1 %v11668_v34  ;;  %9638 = vmatpush3.msra.mxu1 %v10980_v46 }
 0x168   : > { %9349 = vmatmul.mubr.f32.gmra.mrb[6].mxu0 %v11212_v41  ;;  %9642 = vmatprep.subr.mxu1 %v10902_v58  ;;  %14615 = vst [vmem:[#allocation124_spill] sm:$0xff] %v11805_v48 }
 0x169   : > { %9351 = vmatprep.mubr.f32.mxu0 %v11254_v31 }
 0x16c   : > { %9352 = vmatmul.mubr.f32.gmra.mrb[8].mxu0 %v11240_v8 }
 0x16d   : > { %9354 = vmatprep.mubr.f32.mxu0 %v11297_v53 }
 0x16e   : > { %9640 = vmatmul.mubr.f32.vlgmr.msra.gmra.mrb[2].mxu1 %v11681_v18 }
 0x16f   : > { %9644 = vmatprep.mubr.f32.mxu1 %v11668_v34  ;;  %9643 = vmatpush3.msra.mxu1 %v10902_v58  ;;  %v14640_v34 = vld [vmem:[#allocation100_spill] sm:$0xff] }
 0x170   : > { %9355 = vmatmul.mubr.f32.gmra.mrb[10].mxu0 %v11283_v3  ;;  %9647 = vmatprep.subr.mxu1 %v11781_v23 }
 0x171   : > { %9357 = vmatprep.mubr.f32.mxu0 %v11341_v45 }
 0x174   : > { %9358 = vmatmul.mubr.f32.gmra.mrb[12].mxu0 %v11327_v47 }
 0x175   : > { %9360 = vmatprep.mubr.f32.mxu0 %v11385_v7 }
 0x176   : > { %9645 = vmatmul.mubr.f32.vlgmr.msra.gmra.mrb[2].mxu1 %v11681_v18  ;;  %v14637_v18 = vld [vmem:[#allocation87_spill] sm:$0xff] }
 0x177   : > { %9649 = vmatprep.mubr.f32.mxu1 %v11079_v11  ;;  %9648 = vmatpush3.msra.mxu1 %v11781_v23  ;;  %v14616_v11 = vld [vmem:[#allocation36_spill] sm:$0xff] }
 0x178   : > { %9361 = vmatmul.mubr.f32.gmra.mrb[14].mxu0 %v11371_v33  ;;  %9697 = vmatprep.subr.mxu1 %v11805_v48 }
 0x179   : > { %9363 = vmatprep.mubr.f32.mxu0 %v11429_v60 }
 0x17a   : > { %9650 = vmatmul.mubr.f32.vlgmr.msra.gmra.mrb[4].mxu1 %v11101_v43  ;;  %v14617_v43 = vld [vmem:[#allocation43_spill] sm:$0xff] }
 0x17b   : > { %9652 = vmatprep.mubr.f32.mxu1 %v11120_v20  ;;  %9698 = vmatpush3.msra.mxu1 %v11805_v48  ;;  %v14618_v20 = vld [vmem:[#allocation86_spill] sm:$0xff]  ;;  %v14644_v48 = vld [vmem:[#allocation109_spill] sm:$0xff] }
 0x17c   : > { %9364 = vmatmul.mubr.f32.gmra.mrb[16].mxu0 %v11415_v28  ;;  %9747 = vmatprep.subr.mxu1 %v11788_v38 }
 0x17d   : > { %9366 = vmatprep.mubr.f32.mxu0 %v11473_v24 }
 0x17e   : > { %9653 = vmatmul.mubr.f32.gmra.mrb[6].mxu1 %v11122_v22  ;;  %v14619_v22 = vld [vmem:[#allocation41_spill] sm:$0xff] }
 0x17f   : > { %9655 = vmatprep.mubr.f32.mxu1 %v11170_v0  ;;  %v14620_v0 = vld [vmem:[#allocation50_spill] sm:$0xff] }
 0x180   : > { %9367 = vmatmul.mubr.f32.gmra.mrb[18].mxu0 %v11459_v57 }
 0x181   : > { %9369 = vmatprep.mubr.f32.mxu0 %v11516_v50 }
 0x182   : > { %9656 = vmatmul.mubr.f32.gmra.mrb[8].mxu1 %v11164_v37  ;;  %v14622_v37 = vld [vmem:[#allocation47_spill] sm:$0xff] }
 0x183   : > { %9658 = vmatprep.mubr.f32.mxu1 %v11217_v9  ;;  %v14623_v9 = vld [vmem:[#allocation58_spill] sm:$0xff] }
 0x184   : > { %9370 = vmatmul.mubr.f32.gmra.mrb[20].mxu0 %v11502_v59 }
 0x185   : > { %9372 = vmatprep.mubr.f32.mxu0 %v11552_v42 }
 0x186   : > { %9659 = vmatmul.mubr.f32.gmra.mrb[10].mxu1 %v14616_v11  ;;  %v14624_v11 = vld [vmem:[#allocation55_spill] sm:$0xff] }
 0x187   : > { %9661 = vmatprep.mubr.f32.mxu1 %v14617_v43  ;;  %v14625_v43 = vld [vmem:[#allocation66_spill] sm:$0xff] }
 0x188   : > { %9373 = vmatmul.mubr.f32.gmra.mrb[22].mxu0 %v14618_v20 }
 0x189   : > { %9375 = vmatprep.mubr.f32.mxu0 %v11588_v26 }
 0x18a   : > { %9662 = vmatmul.mubr.f32.gmra.mrb[12].mxu1 %v14619_v22  ;;  %v14626_v22 = vld [vmem:[#allocation63_spill] sm:$0xff] }
 0x18b   : > { %9664 = vmatprep.mubr.f32.mxu1 %v14620_v0  ;;  %v14627_v0 = vld [vmem:[#allocation74_spill] sm:$0xff] }
 0x18c   : > { %9376 = vmatmul.mubr.f32.gmra.mrb[24].mxu0 %v14621_v39 }
 0x18d   : > { %9378 = vmatprep.mubr.f32.mxu0 %v11633_v54 }
 0x18e   : > { %9665 = vmatmul.mubr.f32.gmra.mrb[14].mxu1 %v14622_v37  ;;  %v14628_v37 = vld [vmem:[#allocation5_spill] sm:$0xff] }
 0x18f   : > { %9667 = vmatprep.mubr.f32.mxu1 %v14623_v9  ;;  %v14629_v9 = vld [vmem:[#allocation71_spill] sm:$0xff] }
 0x190   : > { %9379 = vmatmul.mubr.f32.gmra.mrb[26].mxu0 %v11628_v12 }
 0x191   : > { %9381 = vmatprep.mubr.f32.mxu0 %v11671_v2 }
 0x192   : > { %9668 = vmatmul.mubr.f32.gmra.mrb[16].mxu1 %v14624_v11  ;;  %v14632_v11 = vld [vmem:[#allocation13_spill] sm:$0xff] }
 0x193   : > { %9670 = vmatprep.mubr.f32.mxu1 %v14625_v43  ;;  %v14633_v43 = vld [vmem:[#allocation79_spill] sm:$0xff] }
 0x194   : > { %9382 = vmatmul.mubr.f32.gmra.mrb[28].mxu0 %v11690_v63 }
 0x195   : > { %9384 = vmatprep.mubr.f32.mxu0 %v11730_v62 }
 0x196   : > { %9671 = vmatmul.mubr.f32.gmra.mrb[18].mxu1 %v14626_v22  ;;  %v14634_v22 = vld [vmem:[#allocation90_spill] sm:$0xff] }
 0x197   : > { %9673 = vmatprep.mubr.f32.mxu1 %v14627_v0  ;;  %v14635_v0 = vld [vmem:[#allocation12_spill] sm:$0xff] }
 0x198   : > { %9385 = vmatmul.mubr.f32.gmra.mrb[30].mxu0 %v11726_v1 }
 0x199   : > { %9389 = vmatprep.mubr.f32.mxu0 %v14628_v37 }
 0x19a   : > { %9674 = vmatmul.mubr.f32.gmra.mrb[20].mxu1 %v14629_v9  ;;  %v14639_v9 = vld [vmem:[#allocation24_spill] sm:$0xff] }
 0x19b   : > { %9676 = vmatprep.mubr.f32.mxu1 %v14630_v15  ;;  %v14638_v15 = vld [vmem:[#allocation18_spill] sm:$0xff] }
 0x19c   : > { %9390 = vmatmul.mubr.f32.vlgmr.msra.gmra.mrb[0].mxu0 %v14631_v49 }
 0x19d   : > { %9438 = vmatpush3.msra.mxu0 %v10902_v58  ;;  %9392 = vmatprep.mubr.f32.mxu0 %v14632_v11 }
 0x19e   : > { %9677 = vmatmul.mubr.f32.gmra.mrb[22].mxu1 %v14633_v43  ;;  %9487 = vmatprep.subr.mxu0 %v10980_v46  ;;  %v14641_v43 = vld [vmem:[#allocation31_spill] sm:$0xff] }
 0x19f   : > { %9679 = vmatprep.mubr.f32.mxu1 %v14634_v22  ;;  %v14643_v22 = vld [vmem:[#allocation101_spill] sm:$0xff] }
 0x1a0   : > { %9393 = vmatmul.mubr.f32.gmra.mrb[2].mxu0 %v14635_v0 }
 0x1a1   : > { %9395 = vmatprep.mubr.f32.mxu0 %v14636_v36 }
 0x1a2   : > { %9680 = vmatmul.mubr.f32.gmra.mrb[24].mxu1 %v14637_v18  ;;  %v14646_v18 = vld [vmem:[#allocation45_spill] sm:$0xff] }
 0x1a3   : > { %9682 = vmatprep.mubr.f32.mxu1 %v11604_v17  ;;  %v14647_v17 = vld [vmem:[#allocation108_spill] sm:$0xff] }
 0x1a4   : > { %9396 = vmatmul.mubr.f32.gmra.mrb[4].mxu0 %v14638_v15 }
 0x1a5   : > { %9398 = vmatprep.mubr.f32.mxu0 %v14639_v9 }
 0x1a6   : > { %9683 = vmatmul.mubr.f32.gmra.mrb[26].mxu1 %v11599_v4  ;;  %v14649_v4 = vld [vmem:[#allocation52_spill] sm:$0xff] }
 0x1a7   : > { %9685 = vmatprep.mubr.f32.mxu1 %v14640_v34  ;;  %v14650_v34 = vld [vmem:[#allocation49_spill] sm:$0xff] }
 0x1a8   : > { %9399 = vmatmul.mubr.f32.gmra.mrb[6].mxu0 %v14641_v43 }
 0x1a9   : > { %9401 = vmatprep.mubr.f32.mxu0 %v14642_v10 }
 0x1aa   : > { %9686 = vmatmul.mubr.f32.gmra.mrb[28].mxu1 %v14643_v22  ;;  %v14651_v22 = vld [vmem:[#allocation60_spill] sm:$0xff] }
 0x1ab   : > { %9688 = vmatprep.mubr.f32.mxu1 %v14644_v48  ;;  %v14652_v48 = vld [vmem:[#allocation57_spill] sm:$0xff] }
 0x1ac   : > { %9402 = vmatmul.mubr.f32.gmra.mrb[8].mxu0 %v14645_v6 }
 0x1ad   : > { %9404 = vmatprep.mubr.f32.mxu0 %v14646_v18 }
 0x1ae   : > { %9689 = vmatmul.mubr.f32.gmra.mrb[30].mxu1 %v14647_v17  ;;  %v14653_v17 = vld [vmem:[#allocation68_spill] sm:$0xff] }
 0x1af   : > { %9691 = vmatprep.mubr.f32.mxu1 %v11711_v21  ;;  %v14654_v21 = vld [vmem:[#allocation65_spill] sm:$0xff] }
 0x1b0   : > { %9405 = vmatmul.mubr.f32.gmra.mrb[10].mxu0 %v14648_v27 }
 0x1b1   : > { %9407 = vmatprep.mubr.f32.mxu0 %v14649_v4 }
 0x1b2   : > { %9692 = vmatmul.mubr.f32.gmra.mrb[32].mxu1 %v11728_v19  ;;  %v14655_v19 = vld [vmem:[#allocation75_spill] sm:$0xff] }
 0x1b3   : > { %9694 = vmatprep.mubr.f32.mxu1 %v11755_v51  ;;  %v14657_v51 = vld [vmem:[#allocation83_spill] sm:$0xff] }
 0x1b4   : > { %9408 = vmatmul.mubr.f32.gmra.mrb[12].mxu0 %v14650_v34 }
 0x1b5   : > { %9410 = vmatprep.mubr.f32.mxu0 %v14651_v22 }
 0x1b6   : > { %9695 = vmatmul.mubr.f32.gmra.mrb[34].mxu1 %v11753_v61  ;;  %v14656_v61 = vld [vmem:[#allocation73_spill] sm:$0xff] }
 0x1b7   : > { %9699 = vmatprep.mubr.f32.mxu1 %v11043_v32 }
 0x1b8   : > { %9411 = vmatmul.mubr.f32.gmra.mrb[14].mxu0 %v14652_v48 }
 0x1b9   : > { %9413 = vmatprep.mubr.f32.mxu0 %v14653_v17 }
 0x1ba   : > { %9700 = vmatmul.mubr.f32.vlgmr.msra.gmra.mrb[4].mxu1 %v11055_v44  ;;  %v14660_v44 = vld [vmem:[#allocation89_spill] sm:$0xff] }
 0x1bb   : > { %9702 = vmatprep.mubr.f32.mxu1 %v11084_v13  ;;  %9748 = vmatpush3.msra.mxu1 %v11788_v38  ;;  %v14658_v13 = vld [vmem:[#allocation81_spill] sm:$0xff]  ;;  %v14659_v38 = vld [vmem:[#allocation91_spill] sm:$0xff] }
 0x1bc   : > { %9414 = vmatmul.mubr.f32.gmra.mrb[16].mxu0 %v14654_v21  ;;  %9797 = vmatprep.subr.mxu1 %v11781_v23 }
 0x1bd   : > { %9416 = vmatprep.mubr.f32.mxu0 %v14655_v19 }
 0x1be   : > { %9703 = vmatmul.mubr.f32.gmra.mrb[6].mxu1 %v11075_v5  ;;  %v14661_v5 = vld [vmem:[#allocation97_spill] sm:$0xff] }
 0x1bf   : > { %9705 = vmatprep.mubr.f32.mxu1 %v11131_v56  ;;  %v14662_v56 = vld [vmem:[#allocation96_spill] sm:$0xff] }
 0x1c0   : > { %9417 = vmatmul.mubr.f32.gmra.mrb[18].mxu0 %v14656_v61 }
 0x1c1   : > { %9419 = vmatprep.mubr.f32.mxu0 %v14657_v51 }
 0x1c2   : > { %9706 = vmatmul.mubr.f32.gmra.mrb[8].mxu1 %v11125_v16  ;;  %v14663_v16 = vld [vmem:[#allocation105_spill] sm:$0xff] }
 0x1c3   : > { %9708 = vmatprep.mubr.f32.mxu1 %v11175_v29  ;;  %v14664_v29 = vld [vmem:[#allocation104_spill] sm:$0xff] }
 0x1c4   : > { %9420 = vmatmul.mubr.f32.gmra.mrb[20].mxu0 %v14658_v13 }
 0x1c5   : > { %9422 = vmatprep.mubr.f32.mxu0 %v14659_v38 }
 0x1c6   : > { %9709 = vmatmul.mubr.f32.gmra.mrb[10].mxu1 %v11212_v41 }
 0x1c7   : > { %9711 = vmatprep.mubr.f32.mxu1 %v11254_v31 }
 0x1c8   : > { %9423 = vmatmul.mubr.f32.gmra.mrb[22].mxu0 %v14660_v44 }
 0x1c9   : > { %9425 = vmatprep.mubr.f32.mxu0 %v14661_v5 }
 0x1ca   : > { %9712 = vmatmul.mubr.f32.gmra.mrb[12].mxu1 %v11240_v8 }
 0x1cb   : > { %9714 = vmatprep.mubr.f32.mxu1 %v11297_v53 }
 0x1cc   : > { %9426 = vmatmul.mubr.f32.gmra.mrb[24].mxu0 %v14662_v56 }
 0x1cd   : > { %9428 = vmatprep.mubr.f32.mxu0 %v14663_v16 }
 0x1ce   : > { %9715 = vmatmul.mubr.f32.gmra.mrb[14].mxu1 %v11283_v3  ;;  %v14665_v3 = vld [vmem:[#allocation7_spill] sm:$0xff] }
 0x1cf   : > { %9717 = vmatprep.mubr.f32.mxu1 %v11341_v45  ;;  %v14666_v45 = vld [vmem:[#allocation10_spill] sm:$0xff] }
 0x1d0   : > { %9429 = vmatmul.mubr.f32.gmra.mrb[26].mxu0 %v14664_v29 }
 0x1d1   : > { %9431 = vmatprep.mubr.f32.mxu0 %v11679_v55 }
 0x1d2   : > { %9718 = vmatmul.mubr.f32.gmra.mrb[16].mxu1 %v11327_v47 }
 0x1d3   : > { %9720 = vmatprep.mubr.f32.mxu1 %v11385_v7  ;;  %v14667_v7 = vld [vmem:[#allocation14_spill] sm:$0xff] }
 0x1d4   : > { %9432 = vmatmul.mubr.f32.gmra.mrb[28].mxu0 %v11702_v30 }
 0x1d5   : > { %9434 = vmatprep.mubr.f32.mxu0 %v11739_v40 }
 0x1d6   : > { %9721 = vmatmul.mubr.f32.gmra.mrb[18].mxu1 %v11371_v33  ;;  %v14669_v33 = vld [vmem:[#allocation21_spill] sm:$0xff] }
 0x1d7   : > { %9723 = vmatprep.mubr.f32.mxu1 %v11429_v60  ;;  %v14668_v60 = vld [vmem:[#allocation15_spill] sm:$0xff] }
 0x1d8   : > { %9435 = vmatmul.mubr.f32.gmra.mrb[30].mxu0 %v11734_v14 }
 0x1d9   : > { %9439 = vmatprep.mubr.f32.mxu0 %v14665_v3 }
 0x1da   : > { %9724 = vmatmul.mubr.f32.gmra.mrb[20].mxu1 %v11415_v28  ;;  %v14671_v28 = vld [vmem:[#allocation26_spill] sm:$0xff] }
 0x1db   : > { %9726 = vmatprep.mubr.f32.mxu1 %v11473_v24  ;;  %v14670_v24 = vld [vmem:[#allocation20_spill] sm:$0xff] }
 0x1dc   : > { %9440 = vmatmul.mubr.f32.vlgmr.msra.gmra.mrb[0].mxu0 %v14666_v45 }
 0x1dd   : > { %9488 = vmatpush3.msra.mxu0 %v10980_v46  ;;  %9442 = vmatprep.mubr.f32.mxu0 %v14667_v7  ;;  %v14672_v46 = vld [vmem:[#allocation33_spill] sm:$0xff] }
 0x1de   : > { %9727 = vmatmul.mubr.f32.gmra.mrb[22].mxu1 %v11459_v57  ;;  %9537 = vmatprep.subr.mxu0 %v10902_v58  ;;  %v14673_v57 = vld [vmem:[#allocation39_spill] sm:$0xff] }
 0x1df   : > { %9729 = vmatprep.mubr.f32.mxu1 %v11516_v50  ;;  %v11937_v50 = vld [vmem:[%s14266_s7] ss:$0 sm:$0xff] }
 0x1e0   : > { %9443 = vmatmul.mubr.f32.gmra.mrb[2].mxu0 %v14668_v60  ;;  %14674 = vst [vmem:[#allocation36_spill] sm:$0xff] %v11937_v50 }
 0x1e1   : > { %9445 = vmatprep.mubr.f32.mxu0 %v14669_v33 }
 0x1e2   : > { %9730 = vmatmul.mubr.f32.gmra.mrb[24].mxu1 %v11502_v59  ;;  %v14675_v59 = vld [vmem:[#allocation37_spill] sm:$0xff] }
 0x1e3   : > { %9732 = vmatprep.mubr.f32.mxu1 %v11552_v42 }
 0x1e4   : > { %9446 = vmatmul.mubr.f32.gmra.mrb[4].mxu0 %v14670_v24 }
 0x1e5   : > { %9448 = vmatprep.mubr.f32.mxu0 %v14671_v28 }
 0x1e6   : > { %9733 = vmatmul.mubr.f32.gmra.mrb[26].mxu1 %v14618_v20 }
 0x1e7   : > { %9735 = vmatprep.mubr.f32.mxu1 %v11588_v26  ;;  %v14676_v26 = vld [vmem:[#allocation46_spill] sm:$0xff] }
 0x1e8   : > { %9449 = vmatmul.mubr.f32.gmra.mrb[6].mxu0 %v14672_v46 }
 0x1e9   : > { %9451 = vmatprep.mubr.f32.mxu0 %v14673_v57 }
 0x1ea   : > { %9736 = vmatmul.mubr.f32.gmra.mrb[28].mxu1 %v14621_v39  ;;  %v14677_v39 = vld [vmem:[#allocation44_spill] sm:$0xff] }
 0x1eb   : > { %9738 = vmatprep.mubr.f32.mxu1 %v11633_v54  ;;  %v9616_v42 = vpop.f32.mrb[0].mxu1 }
 0x1ec   : > { %9452 = vmatmul.mubr.f32.gmra.mrb[8].mxu0 %v14675_v59  ;;  %v10039_v20 = vadd.f32 %v9616_v42, %v11937_v50  ;;  %v3465_v28 = vpop.f32.mrb[1].mxu1  ;;  %v14678_v59 = vld [vmem:[#allocation53_spill] sm:$0xff] }
 0x1ed   : > { %9454 = vmatprep.mubr.f32.mxu0 %v14676_v26  ;;  %v10040_v46 = vadd.f32 %v11937_v50, %v3465_v28 }
 0x1ee   : > { %9739 = vmatmul.mubr.f32.gmra.mrb[30].mxu1 %v11628_v12  ;;  %v11946_v57 = vmul.f32 0.0, %v10039_v20 }
 0x1ef   : > { %9741 = vmatprep.mubr.f32.mxu1 %v11671_v2  ;;  %v11949_v24 = vmul.f32 0.0, %v10040_v46  ;;  %v14680_v2 = vld [vmem:[#allocation51_spill] sm:$0xff] }
 0x1f0   : > { %9455 = vmatmul.mubr.f32.gmra.mrb[10].mxu0 %v14677_v39  ;;  %v4013_v54 = vrot.slane %v11946_v57, 7  ;;  %v14481_v42 = vrot.slane %v11946_v57, 1 }
 0x1f1   : > { %9457 = vmatprep.mubr.f32.mxu0 %v14678_v59  ;;  %v14480_v28 = vrot.slane %v11949_v24, 7  ;;  %v4121_v12 = vrot.slane %v11949_v24, 1  ;;  %v14681_v59 = vld [vmem:[#allocation61_spill] sm:$0xff] }
 0x1f2   : > { %9742 = vmatmul.mubr.f32.gmra.mrb[32].mxu1 %v11690_v63  ;;  %v14682_v63 = vld [vmem:[#allocation59_spill] sm:$0xff] }
 0x1f3   : > { %9744 = vmatprep.mubr.f32.mxu1 %v11730_v62  ;;  %v11962_v20 = vsel %vm4011_vm3, %v14480_v28, %v4013_v54  ;;  %v11967_v46 = vsel %vm4120_vm2, %v4121_v12, %v14481_v42  ;;  %v14683_v62 = vld [vmem:[#allocation69_spill] sm:$0xff]  ;;  %v14684_v12 = vld [vmem:[#allocation67_spill] sm:$0xff]  ;;  %v14690_v42 = vld [vmem:[#allocation92_spill] sm:$0xff] }
 0x1f4   : > { %14679 = vst [vmem:[#allocation43_spill] sm:$0xff] %v11967_v46  ;;  %9458 = vmatmul.mubr.f32.gmra.mrb[12].mxu0 %v14680_v2  ;;  %v14685_v54 = vld [vmem:[#allocation77_spill] sm:$0xff] }
 0x1f5   : > { %9460 = vmatprep.mubr.f32.mxu0 %v14681_v59  ;;  %v14687_v28 = vld [vmem:[#allocation85_spill] sm:$0xff] }
 0x1f6   : > { %9745 = vmatmul.mubr.f32.gmra.mrb[34].mxu1 %v11726_v1 }
 0x1f7   : > { %9749 = vmatprep.mubr.f32.mxu1 %v14628_v37  ;;  %v14686_v37 = vld [vmem:[#allocation76_spill] sm:$0xff] }
 0x1f8   : > { %9461 = vmatmul.mubr.f32.gmra.mrb[14].mxu0 %v14682_v63 }
 0x1f9   : > { %9463 = vmatprep.mubr.f32.mxu0 %v14683_v62 }
 0x1fa   : > { %9750 = vmatmul.mubr.f32.vlgmr.msra.gmra.mrb[4].mxu1 %v14631_v49  ;;  %v14688_v49 = vld [vmem:[#allocation84_spill] sm:$0xff] }
 0x1fb   : > { %9752 = vmatprep.mubr.f32.mxu1 %v14632_v11  ;;  %9798 = vmatpush3.msra.mxu1 %v11781_v23  ;;  %v14689_v11 = vld [vmem:[#allocation94_spill] sm:$0xff] }
 0x1fc   : > { %9464 = vmatmul.mubr.f32.gmra.mrb[16].mxu0 %v14684_v12  ;;  %9847 = vmatprep.subr.mxu1 %v11793_v52 }
 0x1fd   : > { %9466 = vmatprep.mubr.f32.mxu0 %v14685_v54 }
 0x1fe   : > { %9753 = vmatmul.mubr.f32.gmra.mrb[6].mxu1 %v14635_v0  ;;  %v14691_v0 = vld [vmem:[#allocation98_spill] sm:$0xff] }
 0x1ff   : > { %9755 = vmatprep.mubr.f32.mxu1 %v14636_v36  ;;  %v14692_v36 = vld [vmem:[#allocation99_spill] sm:$0xff] }
 0x200   : > { %9467 = vmatmul.mubr.f32.gmra.mrb[18].mxu0 %v14686_v37 }
 0x201   : > { %9469 = vmatprep.mubr.f32.mxu0 %v14687_v28 }
 0x202   : > { %9756 = vmatmul.mubr.f32.gmra.mrb[8].mxu1 %v14638_v15  ;;  %v14693_v15 = vld [vmem:[#allocation107_spill] sm:$0xff] }
 0x203   : > { %9758 = vmatprep.mubr.f32.mxu1 %v14639_v9  ;;  %v14694_v9 = vld [vmem:[#allocation106_spill] sm:$0xff] }
 0x204   : > { %9470 = vmatmul.mubr.f32.gmra.mrb[20].mxu0 %v14688_v49 }
 0x205   : > { %9472 = vmatprep.mubr.f32.mxu0 %v14689_v11 }
 0x206   : > { %9759 = vmatmul.mubr.f32.gmra.mrb[10].mxu1 %v14641_v43  ;;  %v14698_v43 = vld [vmem:[#allocation11_spill] sm:$0xff] }
 0x207   : > { %9761 = vmatprep.mubr.f32.mxu1 %v14642_v10  ;;  %v14695_v10 = vld [vmem:[#allocation122_spill] sm:$0xff] }
 0x208   : > { %9473 = vmatmul.mubr.f32.gmra.mrb[22].mxu0 %v14690_v42 }
 0x209   : > { %9475 = vmatprep.mubr.f32.mxu0 %v14691_v0 }
 0x20a   : > { %9762 = vmatmul.mubr.f32.gmra.mrb[12].mxu1 %v14645_v6  ;;  %v14696_v6 = vld [vmem:[#allocation121_spill] sm:$0xff] }
 0x20b   : > { %9764 = vmatprep.mubr.f32.mxu1 %v14646_v18  ;;  %v14699_v18 = vld [vmem:[#allocation9_spill] sm:$0xff] }
 0x20c   : > { %9476 = vmatmul.mubr.f32.gmra.mrb[24].mxu0 %v14692_v36 }
 0x20d   : > { %9478 = vmatprep.mubr.f32.mxu0 %v14693_v15 }
 0x20e   : > { %9765 = vmatmul.mubr.f32.gmra.mrb[14].mxu1 %v14648_v27  ;;  %v14697_v27 = vld [vmem:[#allocation6_spill] sm:$0xff] }
 0x20f   : > { %9767 = vmatprep.mubr.f32.mxu1 %v14649_v4  ;;  %v14700_v4 = vld [vmem:[#allocation17_spill] sm:$0xff] }
 0x210   : > { %9479 = vmatmul.mubr.f32.gmra.mrb[26].mxu0 %v14694_v9 }
 0x211   : > { %9481 = vmatprep.mubr.f32.mxu0 %v11688_v25 }
 0x212   : > { %9768 = vmatmul.mubr.f32.gmra.mrb[16].mxu1 %v14650_v34  ;;  %v14701_v34 = vld [vmem:[#allocation16_spill] sm:$0xff] }
 0x213   : > { %9770 = vmatprep.mubr.f32.mxu1 %v14651_v22  ;;  %v14702_v22 = vld [vmem:[#allocation22_spill] sm:$0xff] }
 0x214   : > { %9482 = vmatmul.mubr.f32.gmra.mrb[28].mxu0 %v11714_v35 }
 0x215   : > { %9484 = vmatprep.mubr.f32.mxu0 %v14695_v10 }
 0x216   : > { %9771 = vmatmul.mubr.f32.gmra.mrb[18].mxu1 %v14652_v48  ;;  %v14718_v48 = vld [vmem:[#allocation86_spill] sm:$0xff] }
 0x217   : > { %9773 = vmatprep.mubr.f32.mxu1 %v14653_v17 }
 0x218   : > { %9485 = vmatmul.mubr.f32.gmra.mrb[30].mxu0 %v14696_v6 }
 0x219   : > { %9489 = vmatprep.mubr.f32.mxu0 %v11043_v32 }
 0x21a   : > { %9774 = vmatmul.mubr.f32.gmra.mrb[20].mxu1 %v14654_v21 }
 0x21b   : > { %9776 = vmatprep.mubr.f32.mxu1 %v14655_v19  ;;  %v14720_v19 = vld [vmem:[#allocation37_spill] sm:$0xff] }
 0x21c   : > { %9490 = vmatmul.mubr.f32.vlgmr.msra.gmra.mrb[0].mxu0 %v14697_v27 }
 0x21d   : > { %9538 = vmatpush3.msra.mxu0 %v10902_v58  ;;  %9492 = vmatprep.mubr.f32.mxu0 %v14698_v43  ;;  %v14703_v58 = vld [vmem:[#allocation40_spill] sm:$0xff] }
 0x21e   : > { %9777 = vmatmul.mubr.f32.gmra.mrb[22].mxu1 %v14656_v61  ;;  %9947 = vmatprep.subr.mxu0 %v11781_v23 }
 0x21f   : > { %9779 = vmatprep.mubr.f32.mxu1 %v14657_v51 }
 0x220   : > { %9493 = vmatmul.mubr.f32.gmra.mrb[2].mxu0 %v14699_v18 }
 0x221   : > { %9495 = vmatprep.mubr.f32.mxu0 %v14700_v4 }
 0x222   : > { %9780 = vmatmul.mubr.f32.gmra.mrb[24].mxu1 %v14658_v13  ;;  %v14706_v13 = vld [vmem:[#allocation54_spill] sm:$0xff] }
 0x223   : > { %9782 = vmatprep.mubr.f32.mxu1 %v14659_v38  ;;  %v14717_v38 = vld [vmem:[#allocation39_spill] sm:$0xff] }
 0x224   : > { %9496 = vmatmul.mubr.f32.gmra.mrb[4].mxu0 %v14701_v34 }
 0x225   : > { %9498 = vmatprep.mubr.f32.mxu0 %v14702_v22 }
 0x226   : > { %9783 = vmatmul.mubr.f32.gmra.mrb[26].mxu1 %v14660_v44  ;;  %v14704_v44 = vld [vmem:[#allocation48_spill] sm:$0xff] }
 0x227   : > { %9785 = vmatprep.mubr.f32.mxu1 %v14661_v5  ;;  %v14705_v5 = vld [vmem:[#allocation56_spill] sm:$0xff] }
 0x228   : > { %9499 = vmatmul.mubr.f32.gmra.mrb[6].mxu0 %v11212_v41 }
 0x229   : > { %9501 = vmatprep.mubr.f32.mxu0 %v11254_v31 }
 0x22a   : > { %9786 = vmatmul.mubr.f32.gmra.mrb[28].mxu1 %v14662_v56  ;;  %v14708_v56 = vld [vmem:[#allocation62_spill] sm:$0xff] }
 0x22b   : > { %9788 = vmatprep.mubr.f32.mxu1 %v14663_v16  ;;  %v14707_v16 = vld [vmem:[#allocation64_spill] sm:$0xff] }
 0x22c   : > { %9502 = vmatmul.mubr.f32.gmra.mrb[8].mxu0 %v11240_v8 }
 0x22d   : > { %9504 = vmatprep.mubr.f32.mxu0 %v11297_v53 }
 0x22e   : > { %9789 = vmatmul.mubr.f32.gmra.mrb[30].mxu1 %v14664_v29  ;;  %v14709_v29 = vld [vmem:[#allocation72_spill] sm:$0xff] }
 0x22f   : > { %9791 = vmatprep.mubr.f32.mxu1 %v11679_v55  ;;  %v14711_v55 = vld [vmem:[#allocation80_spill] sm:$0xff] }
 0x230   : > { %9505 = vmatmul.mubr.f32.gmra.mrb[10].mxu0 %v14703_v58 }
 0x231   : > { %9507 = vmatprep.mubr.f32.mxu0 %v14704_v44 }
 0x232   : > { %9792 = vmatmul.mubr.f32.gmra.mrb[32].mxu1 %v11702_v30  ;;  %v14712_v30 = vld [vmem:[#allocation20_spill] sm:$0xff] }
 0x233   : > { %9794 = vmatprep.mubr.f32.mxu1 %v11739_v40  ;;  %v14716_v40 = vld [vmem:[#allocation33_spill] sm:$0xff] }
 0x234   : > { %9508 = vmatmul.mubr.f32.gmra.mrb[12].mxu0 %v11327_v47 }
 0x235   : > { %9510 = vmatprep.mubr.f32.mxu0 %v14705_v5 }
 0x236   : > { %9795 = vmatmul.mubr.f32.gmra.mrb[34].mxu1 %v11734_v14  ;;  %v14715_v14 = vld [vmem:[#allocation88_spill] sm:$0xff] }
 0x237   : > { %9799 = vmatprep.mubr.f32.mxu1 %v14665_v3  ;;  %v14710_v3 = vld [vmem:[#allocation70_spill] sm:$0xff] }
 0x238   : > { %9511 = vmatmul.mubr.f32.gmra.mrb[14].mxu0 %v14706_v13 }
 0x239   : > { %9513 = vmatprep.mubr.f32.mxu0 %v14707_v16 }
 0x23a   : > { %9800 = vmatmul.mubr.f32.vlgmr.msra.gmra.mrb[4].mxu1 %v14666_v45  ;;  %v14713_v45 = vld [vmem:[#allocation26_spill] sm:$0xff] }
 0x23b   : > { %9802 = vmatprep.mubr.f32.mxu1 %v14667_v7  ;;  %9848 = vmatpush3.msra.mxu1 %v11793_v52  ;;  %v14714_v7 = vld [vmem:[#allocation78_spill] sm:$0xff] }
 0x23c   : > { %9514 = vmatmul.mubr.f32.gmra.mrb[16].mxu0 %v14708_v56  ;;  %9897 = vmatprep.subr.mxu1 %v11781_v23 }
 0x23d   : > { %9516 = vmatprep.mubr.f32.mxu0 %v14709_v29 }
 0x23e   : > { %9803 = vmatmul.mubr.f32.gmra.mrb[6].mxu1 %v14668_v60  ;;  %v14719_v60 = vld [vmem:[#allocation95_spill] sm:$0xff] }
 0x23f   : > { %9805 = vmatprep.mubr.f32.mxu1 %v14669_v33 }
 0x240   : > { %9517 = vmatmul.mubr.f32.gmra.mrb[18].mxu0 %v14710_v3 }
 0x241   : > { %9519 = vmatprep.mubr.f32.mxu0 %v14711_v55 }
 0x242   : > { %9806 = vmatmul.mubr.f32.gmra.mrb[8].mxu1 %v14712_v30  ;;  %v14721_v30 = vld [vmem:[#allocation93_spill] sm:$0xff] }
 0x243   : > { %9808 = vmatprep.mubr.f32.mxu1 %v14713_v45 }
 0x244   : > { %9520 = vmatmul.mubr.f32.gmra.mrb[20].mxu0 %v14714_v7 }
 0x245   : > { %9522 = vmatprep.mubr.f32.mxu0 %v14715_v14 }
 0x246   : > { %9809 = vmatmul.mubr.f32.gmra.mrb[10].mxu1 %v14716_v40  ;;  %v14722_v40 = vld [vmem:[#allocation103_spill] sm:$0xff] }
 0x247   : > { %9811 = vmatprep.mubr.f32.mxu1 %v14717_v38 }
 0x248   : > { %9523 = vmatmul.mubr.f32.gmra.mrb[22].mxu0 %v14718_v48 }
 0x249   : > { %9525 = vmatprep.mubr.f32.mxu0 %v14719_v60  ;;  %v9646_v33 = vpop.f32.mrb[2].mxu1 }
 0x24a   : > { %v10041_v17 = vadd.f32 %v9646_v33, %v11937_v50  ;;  %v3963_v21 = vpop.f32.mrb[3].mxu1  ;;  %9812 = vmatmul.mubr.f32.gmra.mrb[12].mxu1 %v14720_v19  ;;  %v14723_v19 = vld [vmem:[#allocation53_spill] sm:$0xff] }
 0x24b   : > { %v10042_v61 = vadd.f32 %v11937_v50, %v3963_v21  ;;  %9814 = vmatprep.mubr.f32.mxu1 %v14676_v26  ;;  %v14724_v26 = vld [vmem:[#allocation102_spill] sm:$0xff]  ;;  %v14725_v50 = vld [vmem:[#allocation111_spill] sm:$0xff] }
 0x24c   : > { %v12065_v51 = vmul.f32 0.0, %v10041_v17  ;;  %9526 = vmatmul.mubr.f32.gmra.mrb[24].mxu0 %v14721_v30 }
 0x24d   : > { %v12068_v45 = vmul.f32 0.0, %v10042_v61  ;;  %9528 = vmatprep.mubr.f32.mxu0 %v14722_v40 }
 0x24e   : > { %v4064_v38 = vrot.slane %v12065_v51, 7  ;;  %v4173_v46 = vrot.slane %v12065_v51, 1  ;;  %9815 = vmatmul.mubr.f32.gmra.mrb[14].mxu1 %v14677_v39  ;;  %v14726_v39 = vld [vmem:[#allocation115_spill] sm:$0xff] }
 0x24f   : > { %v4063_v33 = vrot.slane %v12068_v45, 7  ;;  %v4172_v21 = vrot.slane %v12068_v45, 1  ;;  %9817 = vmatprep.mubr.f32.mxu1 %v14723_v19  ;;  %v14727_v19 = vld [vmem:[#allocation120_spill] sm:$0xff] }
 0x250   : > { %9529 = vmatmul.mubr.f32.gmra.mrb[26].mxu0 %v14724_v26 }
 0x251   : > { %v12081_v17 = vsel %vm4011_vm3, %v4063_v33, %v4064_v38  ;;  %v12086_v61 = vsel %vm4120_vm2, %v4172_v21, %v4173_v46  ;;  %9531 = vmatprep.mubr.f32.mxu0 %v14725_v50  ;;  %v4119_v38 = vsel %vm4011_vm3, 0.0, %v4063_v33 }
 0x252   : > { %9818 = vmatmul.mubr.f32.gmra.mrb[16].mxu1 %v14680_v2  ;;  %v14729_v2 = vld [vmem:[#allocation30_spill] sm:$0xff] }
 0x253   : > { %9820 = vmatprep.mubr.f32.mxu1 %v14681_v59  ;;  %v14728_v59 = vld [vmem:[#allocation124_spill] sm:$0xff] }
 0x254   : > { %9532 = vmatmul.mubr.f32.gmra.mrb[28].mxu0 %v14726_v39 }
 0x255   : > { %9534 = vmatprep.mubr.f32.mxu0 %v14727_v19 }
 0x256   : > { %9821 = vmatmul.mubr.f32.gmra.mrb[18].mxu1 %v14682_v63  ;;  %v14731_v63 = vld [vmem:[#allocation23_spill] sm:$0xff] }
 0x257   : > { %9823 = vmatprep.mubr.f32.mxu1 %v14683_v62  ;;  %v14733_v62 = vld [vmem:[#allocation28_spill] sm:$0xff] }
 0x258   : > { %9535 = vmatmul.mubr.f32.gmra.mrb[30].mxu0 %v11726_v1 }
 0x259   : > { %9539 = vmatprep.mubr.f32.mxu0 %v11043_v32 }
 0x25a   : > { %9824 = vmatmul.mubr.f32.gmra.mrb[20].mxu1 %v14684_v12  ;;  %v14736_v12 = vld [vmem:[#allocation27_spill] sm:$0xff] }
 0x25b   : > { %9826 = vmatprep.mubr.f32.mxu1 %v14685_v54  ;;  %v14737_v54 = vld [vmem:[#allocation32_spill] sm:$0xff] }
 0x25c   : > { %9540 = vmatmul.mubr.f32.vlgmr.msra.gmra.mrb[0].mxu0 %v14697_v27 }
 0x25d   : > { %9948 = vmatpush3.msra.mxu0 %v11781_v23  ;;  %9542 = vmatprep.mubr.f32.mxu0 %v14698_v43 }
 0x25e   : > { %9827 = vmatmul.mubr.f32.gmra.mrb[22].mxu1 %v14686_v37  ;;  %9952 = vmatprep.subr.mxu0 %v14728_v59  ;;  %v14739_v37 = vld [vmem:[#allocation119_spill] sm:$0xff] }
 0x25f   : > { %9829 = vmatprep.mubr.f32.mxu1 %v14687_v28  ;;  %v14735_v28 = vld [vmem:[#allocation29_spill] sm:$0xff] }
 0x260   : > { %9543 = vmatmul.mubr.f32.gmra.mrb[2].mxu0 %v14699_v18 }
 0x261   : > { %9545 = vmatprep.mubr.f32.mxu0 %v14700_v4 }
 0x262   : > { %9830 = vmatmul.mubr.f32.gmra.mrb[24].mxu1 %v14688_v49  ;;  %v14740_v49 = vld [vmem:[#allocation110_spill] sm:$0xff] }
 0x263   : > { %9832 = vmatprep.mubr.f32.mxu1 %v14689_v11  ;;  %v14742_v11 = vld [vmem:[#allocation112_spill] sm:$0xff] }
 0x264   : > { %9546 = vmatmul.mubr.f32.gmra.mrb[4].mxu0 %v14701_v34 }
 0x265   : > { %9548 = vmatprep.mubr.f32.mxu0 %v14702_v22 }
 0x266   : > { %9833 = vmatmul.mubr.f32.gmra.mrb[26].mxu1 %v14690_v42  ;;  %v14734_v42 = vld [vmem:[#allocation25_spill] sm:$0xff] }
 0x267   : > { %9835 = vmatprep.mubr.f32.mxu1 %v14691_v0  ;;  %v1094_v0 = vld [vmem:[%s14264_s5] sm:$0xff] }
 0x268   : > { %9549 = vmatmul.mubr.f32.gmra.mrb[6].mxu0 %v11212_v41 }
 0x269   : > { %9551 = vmatprep.mubr.f32.mxu0 %v11254_v31 }
 0x26a   : > { %9836 = vmatmul.mubr.f32.gmra.mrb[28].mxu1 %v14692_v36 }
 0x26b   : > { %9838 = vmatprep.mubr.f32.mxu1 %v14693_v15 }
 0x26c   : > { %9552 = vmatmul.mubr.f32.gmra.mrb[8].mxu0 %v11240_v8 }
 0x26d   : > { %9554 = vmatprep.mubr.f32.mxu0 %v11297_v53 }
 0x26e   : > { %9839 = vmatmul.mubr.f32.gmra.mrb[30].mxu1 %v14694_v9 }
 0x26f   : > { %9841 = vmatprep.mubr.f32.mxu1 %v11688_v25  ;;  %v14730_v25 = vld [vmem:[#allocation34_spill] sm:$0xff] }
 0x270   : > { %9555 = vmatmul.mubr.f32.gmra.mrb[10].mxu0 %v14703_v58 }
 0x271   : > { %9557 = vmatprep.mubr.f32.mxu0 %v14704_v44 }
 0x272   : > { %9842 = vmatmul.mubr.f32.gmra.mrb[32].mxu1 %v11714_v35  ;;  %v14732_v35 = vld [vmem:[#allocation123_spill] sm:$0xff] }
 0x273   : > { %9844 = vmatprep.mubr.f32.mxu1 %v14695_v10 }
 0x274   : > { %9558 = vmatmul.mubr.f32.gmra.mrb[12].mxu0 %v11327_v47 }
 0x275   : > { %9560 = vmatprep.mubr.f32.mxu0 %v14705_v5 }
 0x276   : > { %9845 = vmatmul.mubr.f32.gmra.mrb[34].mxu1 %v14696_v6 }
 0x277   : > { %9849 = vmatprep.mubr.f32.mxu1 %v11043_v32 }
 0x278   : > { %9561 = vmatmul.mubr.f32.gmra.mrb[14].mxu0 %v14706_v13 }
 0x279   : > { %9563 = vmatprep.mubr.f32.mxu0 %v14707_v16 }
 0x27a   : > { %9850 = vmatmul.mubr.f32.vlgmr.msra.gmra.mrb[4].mxu1 %v14697_v27 }
 0x27b   : > { %9852 = vmatprep.mubr.f32.mxu1 %v14698_v43  ;;  %9898 = vmatpush3.msra.mxu1 %v11781_v23 }
 0x27c   : > { %9564 = vmatmul.mubr.f32.gmra.mrb[16].mxu0 %v14708_v56 }
 0x27d   : > { %9566 = vmatprep.mubr.f32.mxu0 %v14709_v29 }
 0x27e   : > { %9853 = vmatmul.mubr.f32.gmra.mrb[6].mxu1 %v14699_v18 }
 0x27f   : > { %9855 = vmatprep.mubr.f32.mxu1 %v14700_v4 }
 0x280   : > { %9567 = vmatmul.mubr.f32.gmra.mrb[18].mxu0 %v14710_v3 }
 0x281   : > { %9569 = vmatprep.mubr.f32.mxu0 %v14711_v55 }
 0x282   : > { %9856 = vmatmul.mubr.f32.gmra.mrb[8].mxu1 %v14701_v34 }
 0x283   : > { %9858 = vmatprep.mubr.f32.mxu1 %v14702_v22 }
 0x284   : > { %9570 = vmatmul.mubr.f32.gmra.mrb[20].mxu0 %v14714_v7 }
 0x285   : > { %9572 = vmatprep.mubr.f32.mxu0 %v14715_v14 }
 0x286   : > { %9859 = vmatmul.mubr.f32.gmra.mrb[10].mxu1 %v11212_v41 }
 0x287   : > { %9861 = vmatprep.mubr.f32.mxu1 %v11254_v31 }
 0x288   : > { %9573 = vmatmul.mubr.f32.gmra.mrb[22].mxu0 %v14718_v48 }
 0x289   : > { %9575 = vmatprep.mubr.f32.mxu0 %v14719_v60 }
 0x28a   : > { %9862 = vmatmul.mubr.f32.gmra.mrb[12].mxu1 %v11240_v8 }
 0x28b   : > { %9864 = vmatprep.mubr.f32.mxu1 %v11297_v53 }
 0x28c   : > { %9576 = vmatmul.mubr.f32.gmra.mrb[24].mxu0 %v14721_v30 }
 0x28d   : > { %9578 = vmatprep.mubr.f32.mxu0 %v14722_v40 }
 0x28e   : > { %9865 = vmatmul.mubr.f32.gmra.mrb[14].mxu1 %v14703_v58 }
 0x28f   : > { %9867 = vmatprep.mubr.f32.mxu1 %v14704_v44 }
 0x290   : > { %9579 = vmatmul.mubr.f32.gmra.mrb[26].mxu0 %v14724_v26 }
 0x291   : > { %9581 = vmatprep.mubr.f32.mxu0 %v14725_v50 }
 0x292   : > { %9868 = vmatmul.mubr.f32.gmra.mrb[16].mxu1 %v11327_v47 }
 0x293   : > { %9870 = vmatprep.mubr.f32.mxu1 %v14705_v5 }
 0x294   : > { %9582 = vmatmul.mubr.f32.gmra.mrb[28].mxu0 %v14726_v39 }
 0x295   : > { %9584 = vmatprep.mubr.f32.mxu0 %v14727_v19 }
 0x296   : > { %9871 = vmatmul.mubr.f32.gmra.mrb[18].mxu1 %v14706_v13 }
 0x297   : > { %9873 = vmatprep.mubr.f32.mxu1 %v14707_v16 }
 0x298   : > { %9585 = vmatmul.mubr.f32.gmra.mrb[30].mxu0 %v11726_v1 }
 0x299   : > { %9949 = vmatprep.mubr.f32.mxu0 %v14729_v2 }
 0x29a   : > { %9874 = vmatmul.mubr.f32.gmra.mrb[20].mxu1 %v14708_v56 }
 0x29b   : > { %9876 = vmatprep.mubr.f32.mxu1 %v14709_v29 }
 0x29c   : > { %9950 = vmatmul.mubr.f32.vlgmr.msra.gmra.mrb[32].mxu0 %v14730_v25 }
 0x29d   : > { %9953 = vmatpush3.msra.mxu0 %v14728_v59  ;;  %9954 = vmatprep.mubr.f32.mxu0 %v14731_v63 }
 0x29e   : > { %9877 = vmatmul.mubr.f32.gmra.mrb[22].mxu1 %v14710_v3  ;;  %9957 = vmatprep.subr.mxu0 %v14732_v35 }
 0x29f   : > { %9879 = vmatprep.mubr.f32.mxu1 %v14711_v55 }
 0x2a2   : > { %9880 = vmatmul.mubr.f32.gmra.mrb[24].mxu1 %v14714_v7 }
 0x2a3   : > { %9882 = vmatprep.mubr.f32.mxu1 %v14715_v14 }
 0x2a4   : > { %9955 = vmatmul.mubr.f32.vlgmr.msra.gmra.mrb[32].mxu0 %v14733_v62 }
 0x2a5   : > { %9958 = vmatpush3.msra.mxu0 %v14732_v35  ;;  %9959 = vmatprep.mubr.f32.mxu0 %v14734_v42 }
 0x2a6   : > { %9883 = vmatmul.mubr.f32.gmra.mrb[26].mxu1 %v14718_v48  ;;  %9962 = vmatprep.subr.mxu0 %v11781_v23 }
 0x2a7   : > { %9885 = vmatprep.mubr.f32.mxu1 %v14719_v60 }
 0x2aa   : > { %9886 = vmatmul.mubr.f32.gmra.mrb[28].mxu1 %v14721_v30 }
 0x2ab   : > { %9888 = vmatprep.mubr.f32.mxu1 %v14722_v40 }
 0x2ac   : > { %9960 = vmatmul.mubr.f32.vlgmr.msra.gmra.mrb[32].mxu0 %v14735_v28 }
 0x2ad   : > { %9963 = vmatpush3.msra.mxu0 %v11781_v23  ;;  %9964 = vmatprep.mubr.f32.mxu0 %v14736_v12 }
 0x2ae   : > { %9889 = vmatmul.mubr.f32.gmra.mrb[30].mxu1 %v14724_v26  ;;  %9967 = vmatprep.subr.mxu0 %v11793_v52 }
 0x2af   : > { %9891 = vmatprep.mubr.f32.mxu1 %v14725_v50 }
 0x2b2   : > { %9892 = vmatmul.mubr.f32.gmra.mrb[32].mxu1 %v14726_v39 }
 0x2b3   : > { %9894 = vmatprep.mubr.f32.mxu1 %v14727_v19 }
 0x2b4   : > { %9965 = vmatmul.mubr.f32.vlgmr.msra.gmra.mrb[32].mxu0 %v14737_v54 }
 0x2b5   : > { %9968 = vmatpush3.msra.mxu0 %v11793_v52  ;;  %9969 = vmatprep.mubr.f32.mxu0 %v14731_v63 }
 0x2b6   : > { %9895 = vmatmul.mubr.f32.gmra.mrb[34].mxu1 %v11726_v1  ;;  %9972 = vmatprep.subr.mxu0 %v11781_v23 }
 0x2b7   : > { %9899 = vmatprep.mubr.f32.mxu1 %v11043_v32  ;;  %v14738_v32 = vld [vmem:[#allocation117_spill] sm:$0xff] }
 0x2ba   : > { %9900 = vmatmul.mubr.f32.vlgmr.msra.gmra.mrb[4].mxu1 %v14697_v27  ;;  %v14747_v27 = vrot.slane %v11946_v57, 1 }
 0x2bb   : > { %9902 = vmatprep.mubr.f32.mxu1 %v14698_v43 }
 0x2bc   : > { %9970 = vmatmul.mubr.f32.vlgmr.msra.gmra.mrb[32].mxu0 %v14733_v62  ;;  %v4211_v43 = vsel %vm4120_vm2, %v14747_v27, 0.0 }
 0x2bd   : > { %9973 = vmatpush3.msra.mxu0 %v11781_v23  ;;  %9974 = vmatprep.mubr.f32.mxu0 %v14731_v63 }
 0x2be   : > { %9903 = vmatmul.mubr.f32.gmra.mrb[6].mxu1 %v14699_v18  ;;  %9977 = vmatprep.subr.mxu0 %v11781_v23  ;;  %v14748_v18 = vrot.slane %v11949_v24, 7 }
 0x2bf   : > { %9905 = vmatprep.mubr.f32.mxu1 %v14700_v4 }
 0x2c0   : > { %v4102_v4 = vsel %vm4011_vm3, 0.0, %v14748_v18 }
 0x2c2   : > { %9906 = vmatmul.mubr.f32.gmra.mrb[8].mxu1 %v14701_v34 }
 0x2c3   : > { %9908 = vmatprep.mubr.f32.mxu1 %v14702_v22 }
 0x2c4   : > { %9975 = vmatmul.mubr.f32.vlgmr.msra.gmra.mrb[32].mxu0 %v14733_v62 }
 0x2c5   : > { %9979 = vmatprep.mubr.f32.mxu0 %v14738_v32  ;;  %9978 = vmatpush3.msra.mxu0 %v11781_v23 }
 0x2c6   : > { %9909 = vmatmul.mubr.f32.gmra.mrb[10].mxu1 %v11212_v41  ;;  %9982 = vmatprep.subr.mxu0 %v14728_v59  ;;  %v14741_v41 = vld [vmem:[#allocation113_spill] sm:$0xff] }
 0x2c7   : > { %9911 = vmatprep.mubr.f32.mxu1 %v11254_v31  ;;  %v14743_v31 = vld [vmem:[#allocation116_spill] sm:$0xff] }
 0x2c8   : > { %9980 = vmatmul.mubr.f32.vlgmr.msra.gmra.mrb[34].mxu0 %v14739_v37 }
 0x2c9   : > { %9984 = vmatprep.mubr.f32.mxu0 %v14740_v49  ;;  %9983 = vmatpush3.msra.mxu0 %v14728_v59 }
 0x2ca   : > { %9912 = vmatmul.mubr.f32.gmra.mrb[12].mxu1 %v11240_v8  ;;  %9987 = vmatprep.subr.mxu0 %v14732_v35  ;;  %v14745_v8 = vld [vmem:[#allocation118_spill] sm:$0xff] }
 0x2cb   : > { %9914 = vmatprep.mubr.f32.mxu1 %v11297_v53  ;;  %v14744_v53 = vld [vmem:[#allocation114_spill] sm:$0xff] }
 0x2ce   : > { %9915 = vmatmul.mubr.f32.gmra.mrb[14].mxu1 %v14703_v58 }
 0x2cf   : > { %9917 = vmatprep.mubr.f32.mxu1 %v14704_v44 }
 0x2d0   : > { %9985 = vmatmul.mubr.f32.vlgmr.msra.gmra.mrb[34].mxu0 %v14741_v41 }
 0x2d1   : > { %9989 = vmatprep.mubr.f32.mxu0 %v14742_v11  ;;  %9988 = vmatpush3.msra.mxu0 %v14732_v35 }
 0x2d2   : > { %9918 = vmatmul.mubr.f32.gmra.mrb[16].mxu1 %v11327_v47  ;;  %9992 = vmatprep.subr.mxu0 %v11781_v23  ;;  %v4229_v47 = vlaneseq }
 0x2d3   : > { %9920 = vmatprep.mubr.f32.mxu1 %v14705_v5 }
 0x2d6   : > { %9921 = vmatmul.mubr.f32.gmra.mrb[18].mxu1 %v14706_v13 }
 0x2d7   : > { %9923 = vmatprep.mubr.f32.mxu1 %v14707_v16 }
 0x2d8   : > { %9990 = vmatmul.mubr.f32.vlgmr.msra.gmra.mrb[34].mxu0 %v14743_v31 }
 0x2d9   : > { %9994 = vmatprep.mubr.f32.mxu0 %v14744_v53  ;;  %9993 = vmatpush3.msra.mxu0 %v11781_v23 }
 0x2da   : > { %9924 = vmatmul.mubr.f32.gmra.mrb[20].mxu1 %v14708_v56  ;;  %9997 = vmatprep.subr.mxu0 %v11793_v52 }
 0x2db   : > { %9926 = vmatprep.mubr.f32.mxu1 %v14709_v29 }
 0x2de   : > { %9927 = vmatmul.mubr.f32.gmra.mrb[22].mxu1 %v14710_v3 }
 0x2df   : > { %9929 = vmatprep.mubr.f32.mxu1 %v14711_v55  ;;  %v14749_v55 = vld [vmem:[#allocation36_spill] sm:$0xff] }
 0x2e0   : > { %9995 = vmatmul.mubr.f32.vlgmr.msra.gmra.mrb[34].mxu0 %v14745_v8 }
 0x2e1   : > { %9999 = vmatprep.mubr.f32.mxu0 %v14740_v49  ;;  %9998 = vmatpush3.msra.mxu0 %v11793_v52  ;;  %v12255_v52 = vshrl.u32 %v4229_v47, 7 }
 0x2e2   : > { %9930 = vmatmul.mubr.f32.gmra.mrb[24].mxu1 %v14714_v7  ;;  %10002 = vmatprep.subr.mxu0 %v11781_v23 }
 0x2e3   : > { %9932 = vmatprep.mubr.f32.mxu1 %v14715_v14  ;;  %14746 = vst [vmem:[#allocation41_spill] sm:$0xff] %v12255_v52  ;;  %v14488_v36 = vsub.s32 2, %v12255_v52  ;;  %v14485_v15 = vsub.s32 7, %v12255_v52  ;;  %v14491_v34 = vsub.s32 4, %v12255_v52  ;;  %v14487_v58 = vsub.s32 3, %v12255_v52 }
 0x2e4   : > { %v14490_v56 = vsub.s32 5, %v12255_v52 }
 0x2e5   : > { %v12271_v10 = vrot.slane %v1094_v0, %v14488_v36  ;;  %v12286_v22 = vrot.slane %v1094_v0, %v14485_v15 }
 0x2e6   : > { %9933 = vmatmul.mubr.f32.gmra.mrb[26].mxu1 %v14718_v48 }
 0x2e7   : > { %9935 = vmatprep.mubr.f32.mxu1 %v14719_v60  ;;  %v12303_v29 = vmul.f32 %v12271_v10, %v4211_v43  ;;  %v12316_v60 = vld [vmem:[%s14264_s5 + $0x8] ss:$0 sm:$0xff]  ;;  %v12346_v33 = vmul.f32 %v12286_v22, %v12068_v45 }
 0x2e8   : > { %10000 = vmatmul.mubr.f32.vlgmr.msra.gmra.mrb[34].mxu0 %v14741_v41  ;;  %v12366_v11 = vmul.f32 %v12316_v60, %v12086_v61 }
 0x2e9   : > { %10004 = vmatprep.mubr.f32.mxu0 %v14740_v49  ;;  %10003 = vmatpush3.msra.mxu0 %v11781_v23  ;;  %v14489_v23 = vsub.s32 1, %v12255_v52  ;;  %14753 = vst [vmem:[#allocation58_spill] sm:$0xff] %v12346_v33 }
 0x2ea   : > { %9936 = vmatmul.mubr.f32.gmra.mrb[28].mxu1 %v14721_v30  ;;  %v4228_v30 = vsel %vm4120_vm2, %v4173_v46, 0.0  ;;  %v12339_v46 = vrot.slane %v1094_v0, %v14490_v56  ;;  %14756 = vst [vmem:[#allocation63_spill] sm:$0xff] %v12366_v11 }
 0x2eb   : > { %9938 = vmatprep.mubr.f32.mxu1 %v14722_v40  ;;  %v12266_v9 = vrot.slane %v1094_v0, %v14489_v23  ;;  %v12323_v40 = vrot.slane %v1094_v0, %v14491_v34  ;;  %v12342_v63 = vmul.f32 %v12316_v60, %v4228_v30 }
 0x2ed   : > { %v12291_v44 = vmul.f32 %v12266_v9, %v11946_v57  ;;  %v12295_v5 = vmul.f32 %v12266_v9, %v11949_v24  ;;  %v14750_v24 = vld [vmem:[#allocation43_spill] sm:$0xff]  ;;  %14752 = vst [vmem:[#allocation47_spill] sm:$0xff] %v12342_v63 }
 0x2ee   : > { %9939 = vmatmul.mubr.f32.gmra.mrb[30].mxu1 %v14724_v26  ;;  %v12311_v48 = vmul.f32 %v12271_v10, %v14750_v24 }
 0x2ef   : > { %9941 = vmatprep.mubr.f32.mxu1 %v14725_v50  ;;  %v14486_v50 = vsub.s32 0, %v12255_v52 }
 0x2f0   : > { %10005 = vmatmul.mubr.f32.vlgmr.msra.gmra.mrb[34].mxu0 %v14741_v41 }
 0x2f1   : > { %v12275_v6 = vrot.slane %v1094_v0, %v14486_v50 }
 0x2f2   : > { %9942 = vmatmul.mubr.f32.gmra.mrb[32].mxu1 %v14726_v39  ;;  %v12331_v39 = vrot.slane %v1094_v0, %v14487_v58 }
 0x2f3   : > { %9944 = vmatprep.mubr.f32.mxu1 %v14727_v19  ;;  %v4405_v3 = vmul.f32 %v12275_v6, %v4102_v4  ;;  %v4406_v57 = vmul.f32 %v12275_v6, %v11962_v20  ;;  %v12335_v19 = vmul.f32 %v12286_v22, %v12065_v51 }
 0x2f5   : > { %14751 = vst [vmem:[#allocation50_spill] sm:$0xff] %v12335_v19 }
 0x2f6   : > { %9945 = vmatmul.mubr.f32.gmra.mrb[34].mxu1 %v11726_v1  ;;  %v14484_v1 = vsub.s32 6, %v12255_v52 }
 0x2f8   : > { %v12299_v13 = vrot.slane %v1094_v0, %v14484_v1 }
 0x2fa   : > { %v12351_v42 = vmul.f32 %v12299_v13, %v4119_v38  ;;  %v12362_v41 = vmul.f32 %v12299_v13, %v12081_v17 }
 0x2fc   : > { %14754 = vst [vmem:[#allocation55_spill] sm:$0xff] %v12351_v42  ;;  %14755 = vst [vmem:[#allocation66_spill] sm:$0xff] %v12362_v41 }
 0x32f   : > { %v9541_v16 = vpop.f32.mrb[0].mxu0 }
 0x330   : > { %v10007_v7 = vadd.f32 %v9541_v16, %v14749_v55  ;;  %v2790_v14 = vpop.f32.mrb[1].mxu0 }
 0x331   : > { %v10008_v20 = vadd.f32 %v14749_v55, %v2790_v14 }
 0x332   : > { %v4016_v21 = vrot.slane %v10007_v7, 7  ;;  %v4125_v26 = vrot.slane %v10007_v7, 1  ;;  %v4270_v28 = vmul.f32 %v10007_v7, %v12323_v40  ;;  %v12370_v53 = vmul.f32 %v10007_v7, %v12266_v9 }
 0x333   : > { %v4015_v59 = vrot.slane %v10008_v20, 7  ;;  %v4124_v2 = vrot.slane %v10008_v20, 1  ;;  %v9544_v25 = vpop.f32.mrb[2].mxu0  ;;  %v4269_v49 = vmul.f32 %v10008_v20, %v12323_v40  ;;  %v12377_v17 = vmul.f32 %v10008_v20, %v12266_v9 }
 0x334   : > { %v4212_v35 = vsel %vm4120_vm2, %v4125_v26, 0.0  ;;  %v10009_v62 = vadd.f32 %v9544_v25, %v14749_v55  ;;  %v2802_v51 = vpop.f32.mrb[3].mxu0 }
 0x335   : > { %v4017_v12 = vsel %vm4011_vm3, %v4015_v59, %v4016_v21  ;;  %v4103_v54 = vsel %vm4011_vm3, 0.0, %v4015_v59  ;;  %v4126_v32 = vsel %vm4120_vm2, %v4124_v2, %v4125_v26  ;;  %v4338_v31 = vmul.f32 %v12339_v46, %v4212_v35 }
 0x336   : > { %v4233_v37 = vmul.f32 %v12331_v39, %v4103_v54  ;;  %v4234_v45 = vmul.f32 %v12331_v39, %v4017_v12  ;;  %v4337_v27 = vmul.f32 %v12339_v46, %v4126_v32  ;;  %v4128_v43 = vrot.slane %v10009_v62, 1 }
 0x337   : > { %v9547_v8 = vpop.f32.mrb[4].mxu0  ;;  %v12374_v4 = vmul.f32 %v12271_v10, %v4212_v35  ;;  %v4019_v61 = vrot.slane %v10009_v62, 7  ;;  %v10010_v16 = vadd.f32 %v14749_v55, %v2802_v51  ;;  %v4407_v7 = vmul.f32 %v12275_v6, %v4103_v54 }
 0x338   : > { %v4301_v47 = vadd.f32 %v4269_v49, %v4233_v37  ;;  %v4302_v0 = vadd.f32 %v4270_v28, %v4234_v45  ;;  %v2814_v18 = vpop.f32.mrb[5].mxu0  ;;  %v4408_v30 = vmul.f32 %v12275_v6, %v4017_v12  ;;  %v12383_v38 = vmul.f32 %v12271_v10, %v4126_v32 }
 0x339   : > { %v4272_v21 = vmul.f32 %v10009_v62, %v12323_v40  ;;  %v12387_v26 = vmul.f32 %v10009_v62, %v12266_v9  ;;  %v4018_v59 = vrot.slane %v10010_v16, 7  ;;  %v4213_v35 = vsel %vm4120_vm2, %v4128_v43, 0.0 }
 0x33a   : > { %v4369_v14 = vadd.f32 %v4337_v27, %v4301_v47  ;;  %v4370_v24 = vadd.f32 %v4338_v31, %v4302_v0  ;;  %v4127_v51 = vrot.slane %v10010_v16, 1  ;;  %v4271_v32 = vmul.f32 %v10010_v16, %v12323_v40 }
 0x33b   : > { %v12389_v20 = vpop.f32.mrb[6].mxu0  ;;  %v4020_v12 = vsel %vm4011_vm3, %v4018_v59, %v4019_v61  ;;  %v4104_v54 = vsel %vm4011_vm3, 0.0, %v4018_v59  ;;  %v10011_v37 = vadd.f32 %v9547_v8, %v14749_v55  ;;  %v4340_v31 = vmul.f32 %v12339_v46, %v4213_v35 }
 0x33c   : > { %v4437_v2 = vadd.f32 %v4405_v3, %v4369_v14  ;;  %v4438_v25 = vadd.f32 %v4406_v57, %v4370_v24  ;;  %v12392_v28 = vpop.f32.mrb[7].mxu0  ;;  %v4129_v3 = vsel %vm4120_vm2, %v4127_v51, %v4128_v43  ;;  %v4235_v57 = vmul.f32 %v12331_v39, %v4104_v54 }
 0x33d   : > { %v4678_v47 = vmul.f32 %v10009_v62, %v12286_v22  ;;  %v4236_v0 = vmul.f32 %v12331_v39, %v4020_v12  ;;  %v12406_v27 = vadd.f32 %v14749_v55, %v2814_v18  ;;  %v12416_v24 = vmul.f32 %v12271_v10, %v4213_v35 }
 0x33e   : > { %v4505_v45 = vadd.f32 %v12295_v5, %v4437_v2  ;;  %v4506_v49 = vadd.f32 %v12291_v44, %v4438_v25  ;;  %v4303_v5 = vadd.f32 %v4271_v32, %v4235_v57  ;;  %v4339_v44 = vmul.f32 %v12339_v46, %v4129_v3 }
 0x33f   : > { %v12408_v61 = vpop.f32.mrb[8].mxu0  ;;  %v4304_v62 = vadd.f32 %v4272_v21, %v4236_v0  ;;  %v4609_v59 = vmul.f32 %v12299_v13, %v4104_v54  ;;  %v4610_v18 = vmul.f32 %v12299_v13, %v4020_v12  ;;  %v4746_v2 = vmul.f32 %v12316_v60, %v4213_v35 }
 0x340   : > { %v4573_v8 = vadd.f32 %v12311_v48, %v4505_v45  ;;  %v4574_v43 = vadd.f32 %v12303_v29, %v4506_v49  ;;  %v12413_v14 = vpop.f32.mrb[9].mxu0  ;;  %v4371_v25 = vadd.f32 %v4339_v44, %v4303_v5  ;;  %v4022_v51 = vrot.slane %v10011_v37, 7 }
 0x341   : > { %v4131_v48 = vrot.slane %v10011_v37, 1  ;;  %v4372_v32 = vadd.f32 %v4340_v31, %v4304_v62  ;;  %v4677_v29 = vmul.f32 %v10010_v16, %v12286_v22  ;;  %v4409_v1 = vmul.f32 %v12275_v6, %v4104_v54 }
 0x342   : > { %v4641_v45 = vadd.f32 %v4609_v59, %v4573_v8  ;;  %v4642_v57 = vadd.f32 %v4610_v18, %v4574_v43  ;;  %v4439_v15 = vadd.f32 %v4407_v7, %v4371_v25  ;;  %v12426_v21 = vmul.f32 %v10010_v16, %v12266_v9 }
 0x343   : > { %v12422_v49 = vpop.f32.mrb[10].mxu0  ;;  %v4021_v0 = vrot.slane %v12406_v27, 7  ;;  %v4440_v35 = vadd.f32 %v4408_v30, %v4372_v32  ;;  %v4745_v31 = vmul.f32 %v12316_v60, %v4129_v3  ;;  %v4410_v8 = vmul.f32 %v12275_v6, %v4020_v12 }
 0x344   : > { %v12429_v50 = vpop.f32.mrb[11].mxu0  ;;  %v4709_v5 = vadd.f32 %v4677_v29, %v4641_v45  ;;  %v4710_v44 = vadd.f32 %v4678_v47, %v4642_v57  ;;  %v4214_v43 = vsel %vm4120_vm2, %v4131_v48, 0.0  ;;  %v4130_v59 = vrot.slane %v12406_v27, 1 }
 0x345   : > { %v4023_v62 = vsel %vm4011_vm3, %v4021_v0, %v4022_v51  ;;  %v4105_v7 = vsel %vm4011_vm3, 0.0, %v4021_v0  ;;  %v12443_v47 = vmul.f32 %v12271_v10, %v4129_v3  ;;  %v4274_v12 = vmul.f32 %v10011_v37, %v12323_v40 }
 0x346   : > { %v4777_v54 = vadd.f32 %v4745_v31, %v4709_v5  ;;  %v12436_v16 = vadd.f32 %v4746_v2, %v4710_v44  ;;  %v4237_v18 = vmul.f32 %v12331_v39, %v4105_v7  ;;  %v4238_v25 = vmul.f32 %v12331_v39, %v4023_v62 }
 0x347   : > { %v12440_v30 = vpop.f32.mrb[12].mxu0  ;;  %v4273_v51 = vmul.f32 %v12406_v27, %v12323_v40  ;;  %v4342_v2 = vmul.f32 %v12339_v46, %v4214_v43  ;;  %v12453_v45 = vmul.f32 %v10011_v37, %v12266_v9  ;;  %v4132_v57 = vsel %vm4120_vm2, %v4130_v59, %v4131_v48 }
 0x348   : > { %14757 = vst [vmem:[#allocation74_spill] sm:$0xff] %v12436_v16  ;;  %v12449_v32 = vpop.f32.mrb[13].mxu0  ;;  %v4507_v29 = vadd.f32 %v12377_v17, %v4439_v15  ;;  %v4306_v0 = vadd.f32 %v4274_v12, %v4238_v25  ;;  %v4341_v5 = vmul.f32 %v12339_v46, %v4132_v57  ;;  %v4508_v44 = vadd.f32 %v12370_v53, %v4440_v35  ;;  %v12482_v12 = vld [vmem:[%s14266_s7 + $0x2] ss:$0 sm:$0xff] }
 0x349   : > { %v4305_v3 = vadd.f32 %v4273_v51, %v4237_v18  ;;  %v12460_v31 = vmul.f32 %v12271_v10, %v4214_v43  ;;  %v4680_v58 = vmul.f32 %v10011_v37, %v12286_v22  ;;  %v4611_v23 = vmul.f32 %v12299_v13, %v4105_v7 }
 0x34a   : > { %v4575_v36 = vadd.f32 %v12383_v38, %v4507_v29  ;;  %v4374_v59 = vadd.f32 %v4342_v2, %v4306_v0  ;;  %v4576_v15 = vadd.f32 %v12374_v4, %v4508_v44  ;;  %v4612_v17 = vmul.f32 %v12299_v13, %v4023_v62 }
 0x34b   : > { %v12465_v56 = vpop.f32.mrb[14].mxu0  ;;  %v4373_v48 = vadd.f32 %v4341_v5, %v4305_v3  ;;  %v4679_v35 = vmul.f32 %v12406_v27, %v12286_v22  ;;  %v10013_v37 = vadd.f32 %v12389_v20, %v14749_v55  ;;  %v12477_v38 = vadd.f32 %v14749_v55, %v12392_v28 }
 0x34c   : > { %v12469_v18 = vpop.f32.mrb[15].mxu0  ;;  %v4643_v53 = vadd.f32 %v4611_v23, %v4575_v36  ;;  %v4748_v4 = vmul.f32 %v12316_v60, %v4214_v43  ;;  %v4442_v51 = vadd.f32 %v4410_v8, %v4374_v59  ;;  %v4644_v23 = vadd.f32 %v4612_v17, %v4576_v15 }
 0x34d   : > { %v4441_v25 = vadd.f32 %v4409_v1, %v4373_v48  ;;  %v4747_v2 = vmul.f32 %v12316_v60, %v4132_v57  ;;  %v4025_v29 = vrot.slane %v10013_v37, 7  ;;  %v4134_v3 = vrot.slane %v10013_v37, 1 }
 0x34e   : > { %v4711_v36 = vadd.f32 %v4679_v35, %v4643_v53  ;;  %v4411_v28 = vmul.f32 %v12275_v6, %v4105_v7  ;;  %v4412_v0 = vmul.f32 %v12275_v6, %v4023_v62  ;;  %v4712_v5 = vadd.f32 %v4680_v58, %v4644_v23 }
 0x34f   : > { %v12486_v20 = vpop.f32.mrb[16].mxu0  ;;  %v4024_v44 = vrot.slane %v12477_v38, 7  ;;  %v12494_v1 = vadd.f32 %v12482_v12, %v4777_v54  ;;  %v4479_v8 = vmul.f32 %v12406_v27, %v12266_v9  ;;  %v4133_v48 = vrot.slane %v12477_v38, 1 }
 0x350   : > { %v12491_v34 = vpop.f32.mrb[17].mxu0  ;;  %v4779_v43 = vadd.f32 %v4747_v2, %v4711_v36  ;;  %v12500_v59 = vmul.f32 %v12271_v10, %v4132_v57  ;;  %v4780_v7 = vadd.f32 %v4748_v4, %v4712_v5  ;;  %v4215_v62 = vsel %vm4120_vm2, %v4134_v3, 0.0 }
 0x351   : > { %14758 = vst [vmem:[#allocation5_spill] sm:$0xff] %v12494_v1  ;;  %v10015_v58 = vadd.f32 %v12408_v61, %v14749_v55  ;;  %v4276_v15 = vmul.f32 %v10013_v37, %v12323_v40  ;;  %v4026_v54 = vsel %vm4011_vm3, %v4024_v44, %v4025_v29  ;;  %v4106_v17 = vsel %vm4011_vm3, 0.0, %v4024_v44 }
 0x352   : > { %v4135_v27 = vsel %vm4120_vm2, %v4133_v48, %v4134_v3  ;;  %v12512_v35 = vmul.f32 %v10013_v37, %v12266_v9  ;;  %v4239_v57 = vmul.f32 %v12331_v39, %v4106_v17  ;;  %v4240_v4 = vmul.f32 %v12331_v39, %v4026_v54 }
 0x353   : > { %v12509_v53 = vpop.f32.mrb[18].mxu0  ;;  %v4275_v55 = vmul.f32 %v12477_v38, %v12323_v40  ;;  %v4344_v23 = vmul.f32 %v12339_v46, %v4215_v62  ;;  %v12522_v36 = vmul.f32 %v12271_v10, %v4215_v62  ;;  %v4682_v2 = vmul.f32 %v10013_v37, %v12286_v22 }
 0x354   : > { %v12518_v61 = vpop.f32.mrb[19].mxu0  ;;  %v4509_v29 = vadd.f32 %v12426_v21, %v4441_v25  ;;  %v4308_v5 = vadd.f32 %v4276_v15, %v4240_v4  ;;  %v4343_v44 = vmul.f32 %v12339_v46, %v4135_v27  ;;  %v4510_v48 = vadd.f32 %v12387_v26, %v4442_v51 }
 0x355   : > { %v4307_v3 = vadd.f32 %v4275_v55, %v4239_v57  ;;  %v12529_v63 = vadd.f32 %v12482_v12, %v4779_v43  ;;  %v4750_v11 = vmul.f32 %v12316_v60, %v4215_v62  ;;  %v4613_v41 = vmul.f32 %v12299_v13, %v4106_v17 }
 0x356   : > { %v4577_v19 = vadd.f32 %v12443_v47, %v4509_v29  ;;  %v4376_v16 = vadd.f32 %v4344_v23, %v4308_v5  ;;  %v4578_v21 = vadd.f32 %v12416_v24, %v4510_v48  ;;  %v4614_v25 = vmul.f32 %v12299_v13, %v4026_v54 }
 0x357   : > { %14759 = vst [vmem:[#allocation71_spill] sm:$0xff] %v12529_v63  ;;  %v12534_v1 = vpop.f32.mrb[20].mxu0  ;;  %v4375_v37 = vadd.f32 %v4343_v44, %v4307_v3  ;;  %v12541_v26 = vadd.f32 %v12482_v12, %v4780_v7  ;;  %v4413_v51 = vmul.f32 %v12275_v6, %v4106_v17  ;;  %v4681_v47 = vmul.f32 %v12477_v38, %v12286_v22  ;;  %v12550_v3 = vld [vmem:[%s14266_s7] ss:$0 sm:$0xff] }
 0x358   : > { %v12538_v15 = vpop.f32.mrb[21].mxu0  ;;  %v4645_v43 = vadd.f32 %v4613_v41, %v4577_v19  ;;  %v4444_v57 = vadd.f32 %v4412_v0, %v4376_v16  ;;  %v4646_v4 = vadd.f32 %v4614_v25, %v4578_v21  ;;  %v4137_v55 = vrot.slane %v10015_v58, 1 }
 0x359   : > { %14760 = vst [vmem:[#allocation82_spill] sm:$0xff] %v12541_v26  ;;  %v4443_v62 = vadd.f32 %v4411_v28, %v4375_v37  ;;  %v4749_v24 = vmul.f32 %v12316_v60, %v4135_v27  ;;  %v4028_v29 = vrot.slane %v10015_v58, 7  ;;  %v10016_v7 = vadd.f32 %v12550_v3, %v12413_v14 }
 0x35a   : > { %v4713_v23 = vadd.f32 %v4681_v47, %v4645_v43  ;;  %v4414_v41 = vmul.f32 %v12275_v6, %v4026_v54  ;;  %v12559_v16 = vmul.f32 %v12477_v38, %v12266_v9  ;;  %v12562_v28 = vmul.f32 %v12271_v10, %v4135_v27 }
 0x35b   : > { %v12554_v19 = vpop.f32.mrb[22].mxu0  ;;  %v4714_v0 = vadd.f32 %v4682_v2, %v4646_v4  ;;  %v4278_v44 = vmul.f32 %v10015_v58, %v12323_v40  ;;  %v4027_v48 = vrot.slane %v10016_v7, 7  ;;  %v4136_v37 = vrot.slane %v10016_v7, 1 }
 0x35c   : > { %v12564_v17 = vpop.f32.mrb[23].mxu0  ;;  %v4781_v5 = vadd.f32 %v4749_v24, %v4713_v23  ;;  %v4216_v21 = vsel %vm4120_vm2, %v4137_v55, 0.0  ;;  %v4511_v25 = vadd.f32 %v4479_v8, %v4443_v62  ;;  %v4512_v54 = vadd.f32 %v12453_v45, %v4444_v57 }
 0x35d   : > { %v4782_v14 = vadd.f32 %v4750_v11, %v4714_v0  ;;  %v12570_v38 = vmul.f32 %v10015_v58, %v12266_v9  ;;  %v4029_v27 = vsel %vm4011_vm3, %v4027_v48, %v4028_v29  ;;  %v4107_v2 = vsel %vm4011_vm3, 0.0, %v4027_v48 }
 0x35e   : > { %v4138_v43 = vsel %vm4120_vm2, %v4136_v37, %v4137_v55  ;;  %v4684_v4 = vmul.f32 %v10015_v58, %v12286_v22  ;;  %v4241_v11 = vmul.f32 %v12331_v39, %v4107_v2  ;;  %v4242_v23 = vmul.f32 %v12331_v39, %v4029_v27 }
 0x35f   : > { %v12575_v47 = vpop.f32.mrb[24].mxu0  ;;  %v4277_v8 = vmul.f32 %v10016_v7, %v12323_v40  ;;  %v4346_v62 = vmul.f32 %v12339_v46, %v4216_v21  ;;  %v12585_v57 = vmul.f32 %v12271_v10, %v4216_v21  ;;  %v4345_v24 = vmul.f32 %v12339_v46, %v4138_v43 }
 0x360   : > { %v12581_v45 = vpop.f32.mrb[25].mxu0  ;;  %v4579_v55 = vadd.f32 %v12500_v59, %v4511_v25  ;;  %v4310_v0 = vadd.f32 %v4278_v44, %v4242_v23  ;;  %v4580_v58 = vadd.f32 %v12460_v31, %v4512_v54  ;;  %v4615_v48 = vmul.f32 %v12299_v13, %v4107_v2 }
 0x361   : > { %14761 = vst [vmem:[#allocation8_spill] sm:$0xff] %v12581_v45  ;;  %v4309_v29 = vadd.f32 %v4277_v8, %v4241_v11  ;;  %v4752_v37 = vmul.f32 %v12316_v60, %v4216_v21  ;;  %v4616_v26 = vmul.f32 %v12299_v13, %v4029_v27  ;;  %v4683_v63 = vmul.f32 %v10016_v7, %v12286_v22 }
 0x362   : > { %v10017_v33 = vadd.f32 %v12550_v3, %v12422_v49  ;;  %v4378_v45 = vadd.f32 %v4346_v62, %v4310_v0  ;;  %v4647_v59 = vadd.f32 %v4615_v48, %v4579_v55  ;;  %v12600_v44 = vadd.f32 %v12550_v3, %v12429_v50 }
 0x363   : > { %v12596_v42 = vpop.f32.mrb[26].mxu0  ;;  %v4377_v52 = vadd.f32 %v4345_v24, %v4309_v29  ;;  %v12605_v21 = vmul.f32 %v10016_v7, %v12266_v9  ;;  %v4648_v25 = vadd.f32 %v4616_v26, %v4580_v58  ;;  %v12609_v62 = vadd.f32 %v12482_v12, %v4781_v5 }
 0x364   : > { %14762 = vst [vmem:[#allocation13_spill] sm:$0xff] %v12596_v42  ;;  %v12602_v31 = vpop.f32.mrb[27].mxu0  ;;  %v4031_v54 = vrot.slane %v10017_v33, 7  ;;  %v4140_v11 = vrot.slane %v10017_v33, 1  ;;  %v4446_v8 = vadd.f32 %v4414_v41, %v4378_v45  ;;  %v4715_v49 = vadd.f32 %v4683_v63, %v4647_v59 }
 0x365   : > { %v4445_v23 = vadd.f32 %v4413_v51, %v4377_v52  ;;  %v4751_v42 = vmul.f32 %v12316_v60, %v4138_v43  ;;  %14763 = vst [vmem:[#allocation79_spill] sm:$0xff] %v12609_v62  ;;  %v12612_v24 = vadd.f32 %v12482_v12, %v4782_v14  ;;  %v4716_v50 = vadd.f32 %v4684_v4, %v4648_v25 }
 0x366   : > { %v4030_v55 = vrot.slane %v12600_v44, 7  ;;  %v4415_v26 = vmul.f32 %v12275_v6, %v4107_v2  ;;  %v4416_v7 = vmul.f32 %v12275_v6, %v4029_v27  ;;  %v4217_v63 = vsel %vm4120_vm2, %v4140_v11, 0.0 }
 0x367   : > { %14764 = vst [vmem:[#allocation90_spill] sm:$0xff] %v12612_v24  ;;  %v12615_v29 = vpop.f32.mrb[28].mxu0  ;;  %v4783_v52 = vadd.f32 %v4751_v42, %v4715_v49  ;;  %v4784_v41 = vadd.f32 %v4752_v37, %v4716_v50  ;;  %v4139_v4 = vrot.slane %v12600_v44, 1  ;;  %v4280_v45 = vmul.f32 %v10017_v33, %v12323_v40 }
 0x368   : > { %v12620_v51 = vpop.f32.mrb[29].mxu0  ;;  %v4032_v5 = vsel %vm4011_vm3, %v4030_v55, %v4031_v54  ;;  %v4108_v14 = vsel %vm4011_vm3, 0.0, %v4030_v55  ;;  %v4279_v42 = vmul.f32 %v12600_v44, %v12323_v40  ;;  %v12631_v27 = vmul.f32 %v12271_v10, %v4138_v43 }
 0x369   : > { %v4243_v0 = vmul.f32 %v12331_v39, %v4108_v14  ;;  %v4244_v2 = vmul.f32 %v12331_v39, %v4032_v5  ;;  %v12634_v58 = vmul.f32 %v10017_v33, %v12266_v9  ;;  %v4686_v48 = vmul.f32 %v10017_v33, %v12286_v22 }
 0x36a   : > { %v4141_v37 = vsel %vm4120_vm2, %v4139_v4, %v4140_v11  ;;  %v4348_v25 = vmul.f32 %v12339_v46, %v4217_v63  ;;  %v12645_v43 = vmul.f32 %v12271_v10, %v4217_v63  ;;  %v4754_v24 = vmul.f32 %v12316_v60, %v4217_v63 }
 0x36b   : > { %v12638_v59 = vpop.f32.mrb[30].mxu0  ;;  %v4311_v54 = vadd.f32 %v4279_v42, %v4243_v0  ;;  %v4312_v49 = vadd.f32 %v4280_v45, %v4244_v2  ;;  %v4347_v50 = vmul.f32 %v12339_v46, %v4141_v37  ;;  %v4513_v62 = vadd.f32 %v12559_v16, %v4445_v23 }
 0x36c   : > { %14765 = vst [vmem:[#allocation12_spill] sm:$0xff] %v12638_v59  ;;  %v12642_v55 = vpop.f32.mrb[31].mxu0  ;;  %v4514_v33 = vadd.f32 %v12512_v35, %v4446_v8  ;;  %v12651_v11 = vadd.f32 %v12482_v12, %v4783_v52  ;;  %v4617_v45 = vmul.f32 %v12299_v13, %v4108_v14  ;;  %v4618_v42 = vmul.f32 %v12299_v13, %v4032_v5 }
 0x36d   : > { %14766 = vst [vmem:[#allocation19_spill] sm:$0xff] %v12642_v55  ;;  %v4379_v4 = vadd.f32 %v4347_v50, %v4311_v54  ;;  %v4380_v59 = vadd.f32 %v4348_v25, %v4312_v49  ;;  %v4581_v0 = vadd.f32 %v12562_v28, %v4513_v62  ;;  %v10019_v63 = vadd.f32 %v12550_v3, %v12440_v30 }
 0x36e   : > { %14767 = vst [vmem:[#allocation87_spill] sm:$0xff] %v12651_v11  ;;  %v4582_v2 = vadd.f32 %v12522_v36, %v4514_v33  ;;  %v4685_v35 = vmul.f32 %v12600_v44, %v12286_v22  ;;  %v10020_v23 = vadd.f32 %v12550_v3, %v12449_v32  ;;  %v12664_v28 = vadd.f32 %v12482_v12, %v4784_v41 }
 0x36f   : > { %v4447_v55 = vadd.f32 %v4415_v26, %v4379_v4  ;;  %v4448_v16 = vadd.f32 %v4416_v7, %v4380_v59  ;;  %v4649_v8 = vadd.f32 %v4617_v45, %v4581_v0  ;;  %v4034_v25 = vrot.slane %v10019_v63, 7 }
 0x370   : > { %v4650_v52 = vadd.f32 %v4618_v42, %v4582_v2  ;;  %v4143_v54 = vrot.slane %v10019_v63, 1  ;;  %14768 = vst [vmem:[#allocation18_spill] sm:$0xff] %v12664_v28  ;;  %v4417_v36 = vmul.f32 %v12275_v6, %v4108_v14  ;;  %v4418_v62 = vmul.f32 %v12275_v6, %v4032_v5 }
 0x371   : > { %v4033_v30 = vrot.slane %v10020_v23, 7  ;;  %v4717_v26 = vadd.f32 %v4685_v35, %v4649_v8  ;;  %v4753_v59 = vmul.f32 %v12316_v60, %v4141_v37  ;;  %v4142_v49 = vrot.slane %v10020_v23, 1 }
 0x372   : > { %v4718_v7 = vadd.f32 %v4686_v48, %v4650_v52  ;;  %v4485_v32 = vmul.f32 %v12600_v44, %v12266_v9  ;;  %v4553_v50 = vmul.f32 %v12271_v10, %v4141_v37  ;;  %v4218_v33 = vsel %vm4120_vm2, %v4143_v54, 0.0 }
 0x373   : > { %v4035_v41 = vsel %vm4011_vm3, %v4033_v30, %v4034_v25  ;;  %v4785_v4 = vadd.f32 %v4753_v59, %v4717_v26  ;;  %v4109_v14 = vsel %vm4011_vm3, 0.0, %v4033_v30  ;;  %v4144_v5 = vsel %vm4120_vm2, %v4142_v49, %v4143_v54 }
 0x374   : > { %v4786_v45 = vadd.f32 %v4754_v24, %v4718_v7  ;;  %v4282_v48 = vmul.f32 %v10019_v63, %v12323_v40  ;;  %v4245_v0 = vmul.f32 %v12331_v39, %v4109_v14  ;;  %v4246_v2 = vmul.f32 %v12331_v39, %v4035_v41 }
 0x375   : > { %v4281_v44 = vmul.f32 %v10020_v23, %v12323_v40  ;;  %v4350_v37 = vmul.f32 %v12339_v46, %v4218_v33  ;;  %v12682_v42 = vmul.f32 %v10019_v63, %v12266_v9  ;;  %v4688_v35 = vmul.f32 %v10019_v63, %v12286_v22 }
 0x376   : > { %v10021_v24 = vadd.f32 %v12550_v3, %v12465_v56  ;;  %v4314_v52 = vadd.f32 %v4282_v48, %v4246_v2  ;;  %v4349_v25 = vmul.f32 %v12339_v46, %v4144_v5  ;;  %v4515_v54 = vadd.f32 %v12605_v21, %v4447_v55 }
 0x377   : > { %v4313_v8 = vadd.f32 %v4281_v44, %v4245_v0  ;;  %v12690_v30 = vadd.f32 %v12482_v12, %v4785_v4  ;;  %v12693_v26 = vmul.f32 %v12271_v10, %v4218_v33  ;;  %v4756_v7 = vmul.f32 %v12316_v60, %v4218_v33 }
 0x378   : > { %v4516_v59 = vadd.f32 %v12570_v38, %v4448_v16  ;;  %v4382_v49 = vadd.f32 %v4350_v37, %v4314_v52  ;;  %v4583_v56 = vadd.f32 %v12631_v27, %v4515_v54  ;;  %v4619_v48 = vmul.f32 %v12299_v13, %v4109_v14 }
 0x379   : > { %14769 = vst [vmem:[#allocation24_spill] sm:$0xff] %v12690_v30  ;;  %v4381_v63 = vadd.f32 %v4349_v25, %v4313_v8  ;;  %v12700_v0 = vadd.f32 %v12482_v12, %v4786_v45  ;;  %v4620_v55 = vmul.f32 %v12299_v13, %v4035_v41  ;;  %v4146_v4 = vrot.slane %v10021_v24, 1 }
 0x37a   : > { %v4584_v21 = vadd.f32 %v12585_v57, %v4516_v59  ;;  %v4450_v44 = vadd.f32 %v4418_v62, %v4382_v49  ;;  %v4651_v30 = vadd.f32 %v4619_v48, %v4583_v56  ;;  %v4687_v33 = vmul.f32 %v10020_v23, %v12286_v22 }
 0x37b   : > { %14770 = vst [vmem:[#allocation100_spill] sm:$0xff] %v12700_v0  ;;  %v4449_v2 = vadd.f32 %v4417_v36, %v4381_v63  ;;  %v4419_v38 = vmul.f32 %v12275_v6, %v4109_v14  ;;  %v4420_v16 = vmul.f32 %v12275_v6, %v4035_v41  ;;  %v4487_v27 = vmul.f32 %v10020_v23, %v12266_v9 }
 0x37c   : > { %v4652_v37 = vadd.f32 %v4620_v55, %v4584_v21  ;;  %v4719_v8 = vadd.f32 %v4687_v33, %v4651_v30  ;;  %v4755_v45 = vmul.f32 %v12316_v60, %v4144_v5  ;;  %v4037_v52 = vrot.slane %v10021_v24, 7 }
 0x37d   : > { %v4219_v57 = vsel %vm4120_vm2, %v4146_v4, 0.0  ;;  %v10022_v36 = vadd.f32 %v12550_v3, %v12469_v18  ;;  %v4517_v62 = vadd.f32 %v4485_v32, %v4449_v2  ;;  %v4518_v54 = vadd.f32 %v12634_v58, %v4450_v44 }
 0x37e   : > { %v4720_v25 = vadd.f32 %v4688_v35, %v4652_v37  ;;  %v12714_v14 = vmul.f32 %v12271_v10, %v4144_v5  ;;  %v4787_v41 = vadd.f32 %v4755_v45, %v4719_v8  ;;  %v4284_v23 = vmul.f32 %v10021_v24, %v12323_v40 }
 0x37f   : > { %v12718_v30 = vmul.f32 %v10021_v24, %v12266_v9  ;;  %v4690_v63 = vmul.f32 %v10021_v24, %v12286_v22  ;;  %v4036_v49 = vrot.slane %v10022_v36, 7  ;;  %v4145_v35 = vrot.slane %v10022_v36, 1 }
 0x380   : > { %v4788_v59 = vadd.f32 %v4756_v7, %v4720_v25  ;;  %v4352_v56 = vmul.f32 %v12339_v46, %v4219_v57  ;;  %v12723_v18 = vmul.f32 %v12271_v10, %v4219_v57  ;;  %v4585_v58 = vadd.f32 %v4553_v50, %v4517_v62 }
 0x381   : > { %v4586_v32 = vadd.f32 %v12645_v43, %v4518_v54  ;;  %v4758_v5 = vmul.f32 %v12316_v60, %v4219_v57  ;;  %v4038_v48 = vsel %vm4011_vm3, %v4036_v49, %v4037_v52  ;;  %v4110_v21 = vsel %vm4011_vm3, 0.0, %v4036_v49 }
 0x382   : > { %v4147_v7 = vsel %vm4120_vm2, %v4145_v35, %v4146_v4  ;;  %v4247_v24 = vmul.f32 %v12331_v39, %v4110_v21  ;;  %v4248_v55 = vmul.f32 %v12331_v39, %v4038_v48  ;;  %v4283_v2 = vmul.f32 %v10022_v36, %v12323_v40 }
 0x383   : > { %v10023_v44 = vadd.f32 %v12550_v3, %v12486_v20  ;;  %v4621_v50 = vmul.f32 %v12299_v13, %v4110_v21  ;;  %v4622_v43 = vmul.f32 %v12299_v13, %v4038_v48  ;;  %v10024_v33 = vadd.f32 %v12550_v3, %v12491_v34 }
 0x384   : > { %v12741_v37 = vadd.f32 %v12550_v3, %v12509_v53  ;;  %v12744_v4 = vadd.f32 %v12482_v12, %v4787_v41  ;;  %v4315_v8 = vadd.f32 %v4283_v2, %v4247_v24  ;;  %v4316_v45 = vadd.f32 %v4284_v23, %v4248_v55 }
 0x385   : > { %v4351_v52 = vmul.f32 %v12339_v46, %v4147_v7  ;;  %v12748_v20 = vmul.f32 %v10022_v36, %v12266_v9  ;;  %v4653_v57 = vadd.f32 %v4621_v50, %v4585_v58  ;;  %v4654_v25 = vadd.f32 %v4622_v43, %v4586_v32 }
 0x386   : > { %14771 = vst [vmem:[#allocation31_spill] sm:$0xff] %v12744_v4  ;;  %v4689_v62 = vmul.f32 %v10022_v36, %v12286_v22  ;;  %v12752_v34 = vadd.f32 %v12482_v12, %v4788_v59  ;;  %v4384_v53 = vadd.f32 %v4352_v56, %v4316_v45  ;;  %v4149_v49 = vrot.slane %v10023_v44, 1 }
 0x387   : > { %v4383_v54 = vadd.f32 %v4351_v52, %v4315_v8  ;;  %v4722_v41 = vadd.f32 %v4690_v63, %v4654_v25  ;;  %v4757_v24 = vmul.f32 %v12316_v60, %v4147_v7  ;;  %v4040_v23 = vrot.slane %v10023_v44, 7 }
 0x388   : > { %14772 = vst [vmem:[#allocation38_spill] sm:$0xff] %v12752_v34  ;;  %v4721_v35 = vadd.f32 %v4689_v62, %v4653_v57  ;;  %v4421_v55 = vmul.f32 %v12275_v6, %v4110_v21  ;;  %v4422_v2 = vmul.f32 %v12275_v6, %v4038_v48  ;;  %v4452_v58 = vadd.f32 %v4420_v16, %v4384_v53 }
 0x389   : > { %v4451_v4 = vadd.f32 %v4419_v38, %v4383_v54  ;;  %v12758_v32 = vmul.f32 %v12271_v10, %v4147_v7  ;;  %v4790_v59 = vadd.f32 %v4758_v5, %v4722_v41  ;;  %v4039_v50 = vrot.slane %v10024_v33, 7 }
 0x38a   : > { %v4789_v36 = vadd.f32 %v4757_v24, %v4721_v35  ;;  %v4220_v56 = vsel %vm4120_vm2, %v4149_v49, 0.0  ;;  %v4286_v43 = vmul.f32 %v10023_v44, %v12323_v40  ;;  %v4148_v63 = vrot.slane %v10024_v33, 1 }
 0x38b   : > { %v4519_v8 = vadd.f32 %v4487_v27, %v4451_v4  ;;  %v12763_v45 = vmul.f32 %v10023_v44, %v12266_v9  ;;  %v4692_v21 = vmul.f32 %v10023_v44, %v12286_v22  ;;  %v4041_v38 = vsel %vm4011_vm3, %v4039_v50, %v4040_v23 }
 0x38c   : > { %v4111_v16 = vsel %vm4011_vm3, 0.0, %v4039_v50  ;;  %v4150_v5 = vsel %vm4120_vm2, %v4148_v63, %v4149_v49  ;;  %v4250_v52 = vmul.f32 %v12331_v39, %v4041_v38  ;;  %v4285_v57 = vmul.f32 %v10024_v33, %v12323_v40 }
 0x38d   : > { %v12768_v48 = vpop.f32.mrb[4].mxu1  ;;  %v4249_v7 = vmul.f32 %v12331_v39, %v4111_v16  ;;  %v4354_v4 = vmul.f32 %v12339_v46, %v4220_v56  ;;  %v12778_v44 = vmul.f32 %v12271_v10, %v4220_v56  ;;  %v4353_v25 = vmul.f32 %v12339_v46, %v4150_v5 }
 0x38e   : > { %v12774_v27 = vpop.f32.mrb[5].mxu1  ;;  %v4520_v62 = vadd.f32 %v12682_v42, %v4452_v58  ;;  %v4318_v53 = vadd.f32 %v4286_v43, %v4250_v52  ;;  %v4587_v49 = vadd.f32 %v12714_v14, %v4519_v8  ;;  %v4623_v35 = vmul.f32 %v12299_v13, %v4111_v16 }
 0x38f   : > { %v4317_v54 = vadd.f32 %v4285_v57, %v4249_v7  ;;  %v4760_v41 = vmul.f32 %v12316_v60, %v4220_v56  ;;  %v12786_v24 = vmul.f32 %v10024_v33, %v12266_v9  ;;  %v4624_v50 = vmul.f32 %v12299_v13, %v4041_v38 }
 0x390   : > { %v4588_v23 = vadd.f32 %v12693_v26, %v4520_v62  ;;  %v4386_v0 = vadd.f32 %v4354_v4, %v4318_v53  ;;  %v4655_v42 = vadd.f32 %v4623_v35, %v4587_v49  ;;  %v4691_v58 = vmul.f32 %v10024_v33, %v12286_v22 }
 0x391   : > { %v12790_v63 = vpop.f32.mrb[6].mxu1  ;;  %v4385_v34 = vadd.f32 %v4353_v25, %v4317_v54  ;;  %v12796_v14 = vadd.f32 %v12482_v12, %v4789_v36  ;;  %v12799_v56 = vadd.f32 %v12482_v12, %v4790_v59  ;;  %v4152_v26 = vrot.slane %v12741_v37, 1 }
 0x392   : > { %v12793_v43 = vpop.f32.mrb[7].mxu1  ;;  %v4656_v8 = vadd.f32 %v4624_v50, %v4588_v23  ;;  %v4454_v52 = vadd.f32 %v4422_v2, %v4386_v0  ;;  %v4723_v57 = vadd.f32 %v4691_v58, %v4655_v42  ;;  %v4759_v25 = vmul.f32 %v12316_v60, %v4150_v5 }
 0x393   : > { %14773 = vst [vmem:[#allocation101_spill] sm:$0xff] %v12796_v14  ;;  %14774 = vst [vmem:[#allocation109_spill] sm:$0xff] %v12799_v56  ;;  %v4453_v7 = vadd.f32 %v4421_v55, %v4385_v34  ;;  %v4423_v4 = vmul.f32 %v12275_v6, %v4111_v16  ;;  %v4043_v33 = vrot.slane %v12741_v37, 7  ;;  %v10026_v36 = vadd.f32 %v12550_v3, %v12518_v61 }
 0x394   : > { %v4724_v62 = vadd.f32 %v4692_v21, %v4656_v8  ;;  %v4424_v59 = vmul.f32 %v12275_v6, %v4041_v38  ;;  %v12811_v53 = vmul.f32 %v12271_v10, %v4150_v5  ;;  %v4791_v34 = vadd.f32 %v4759_v25, %v4723_v57 }
 0x395   : > { %v12807_v54 = vpop.f32.mrb[8].mxu1  ;;  %v4288_v0 = vmul.f32 %v12741_v37, %v12323_v40  ;;  %v4221_v21 = vsel %vm4120_vm2, %v4152_v26, 0.0  ;;  %v4042_v16 = vrot.slane %v10026_v36, 7  ;;  %v4151_v49 = vrot.slane %v10026_v36, 1 }
 0x396   : > { %v12815_v55 = vpop.f32.mrb[9].mxu1  ;;  %v4792_v2 = vadd.f32 %v4760_v41, %v4724_v62  ;;  %v12822_v61 = vmul.f32 %v12741_v37, %v12266_v9  ;;  %v4694_v38 = vmul.f32 %v12741_v37, %v12286_v22  ;;  %v4521_v5 = vadd.f32 %v12748_v20, %v4453_v7 }
 0x397   : > { %v12818_v35 = vpop.f32.mrb[32].mxu0  ;;  %v4522_v23 = vadd.f32 %v12718_v30, %v4454_v52  ;;  %v4044_v41 = vsel %vm4011_vm3, %v4042_v16, %v4043_v33  ;;  %v4112_v42 = vsel %vm4011_vm3, 0.0, %v4042_v16  ;;  %v4153_v58 = vsel %vm4120_vm2, %v4151_v49, %v4152_v26 }
 0x398   : > { %v12828_v50 = vpop.f32.mrb[33].mxu0  ;;  %v10027_v8 = vadd.f32 %v12550_v3, %v12534_v1  ;;  %v4356_v57 = vmul.f32 %v12339_v46, %v4221_v21  ;;  %v4251_v25 = vmul.f32 %v12331_v39, %v4112_v42  ;;  %v4252_v37 = vmul.f32 %v12331_v39, %v4044_v41 }
 0x399   : > { %14775 = vst [vmem:[#allocation35_spill] sm:$0xff] %v12828_v50  ;;  %v4287_v20 = vmul.f32 %v10026_v36, %v12323_v40  ;;  %v12839_v30 = vpop.f32.mrb[10].mxu1  ;;  %v12842_v7 = vmul.f32 %v12271_v10, %v4221_v21  ;;  %v4355_v52 = vmul.f32 %v12339_v46, %v4153_v58  ;;  %v4589_v26 = vadd.f32 %v12758_v32, %v4521_v5 }
 0x39a   : > { %14776 = vst [vmem:[#allocation45_spill] sm:$0xff] %v12839_v30  ;;  %v4590_v62 = vadd.f32 %v12723_v18, %v4522_v23  ;;  %v12847_v1 = vpop.f32.mrb[11].mxu1  ;;  %v4320_v16 = vadd.f32 %v4288_v0, %v4252_v37  ;;  %v4625_v49 = vmul.f32 %v12299_v13, %v4112_v42  ;;  %v4626_v56 = vmul.f32 %v12299_v13, %v4044_v41 }
 0x39b   : > { %v4319_v33 = vadd.f32 %v4287_v20, %v4251_v25  ;;  %v12852_v14 = vadd.f32 %v12482_v12, %v4791_v34  ;;  %v4762_v28 = vmul.f32 %v12316_v60, %v4221_v21  ;;  %v4693_v11 = vmul.f32 %v10026_v36, %v12286_v22 }
 0x39c   : > { %v4155_v30 = vrot.slane %v10027_v8, 1  ;;  %v4388_v32 = vadd.f32 %v4356_v57, %v4320_v16  ;;  %v4657_v5 = vadd.f32 %v4625_v49, %v4589_v26  ;;  %v4658_v18 = vadd.f32 %v4626_v56, %v4590_v62 }
 0x39d   : > { %14777 = vst [vmem:[#allocation108_spill] sm:$0xff] %v12852_v14  ;;  %v4387_v50 = vadd.f32 %v4355_v52, %v4319_v33  ;;  %v12856_v23 = vpop.f32.mrb[12].mxu1  ;;  %v12859_v0 = vadd.f32 %v12482_v12, %v4792_v2  ;;  %v4425_v25 = vmul.f32 %v12275_v6, %v4112_v42  ;;  %v12863_v37 = vmul.f32 %v10026_v36, %v12266_v9 }
 0x39e   : > { %v4761_v34 = vmul.f32 %v12316_v60, %v4153_v58  ;;  %v12866_v21 = vpop.f32.mrb[13].mxu1  ;;  %v4456_v14 = vadd.f32 %v4424_v59, %v4388_v32  ;;  %v4725_v52 = vadd.f32 %v4693_v11, %v4657_v5  ;;  %v4726_v57 = vadd.f32 %v4694_v38, %v4658_v18 }
 0x39f   : > { %14778 = vst [vmem:[#allocation42_spill] sm:$0xff] %v12859_v0  ;;  %14779 = vst [vmem:[#allocation52_spill] sm:$0xff] %v12866_v21  ;;  %v4455_v20 = vadd.f32 %v4423_v4, %v4387_v50  ;;  %v4426_v56 = vmul.f32 %v12275_v6, %v4044_v41  ;;  %v4046_v26 = vrot.slane %v10027_v8, 7  ;;  %v4222_v62 = vsel %vm4120_vm2, %v4155_v30, 0.0 }
 0x3a0   : > { %v10028_v2 = vadd.f32 %v12550_v3, %v12538_v15  ;;  %v4793_v42 = vadd.f32 %v4761_v34, %v4725_v52  ;;  %v4794_v33 = vadd.f32 %v4762_v28, %v4726_v57  ;;  %v4524_v60 = vadd.f32 %v12763_v45, %v4456_v14 }
 0x3a1   : > { %v4523_v36 = vadd.f32 %v12786_v24, %v4455_v20  ;;  %v12875_v16 = vmul.f32 %v12271_v10, %v4153_v58  ;;  %v4290_v11 = vmul.f32 %v10027_v8, %v12323_v40  ;;  %v12879_v38 = vmul.f32 %v10027_v8, %v12266_v9 }
 0x3a2   : > { %v4045_v4 = vrot.slane %v10028_v2, 7  ;;  %v4154_v59 = vrot.slane %v10028_v2, 1  ;;  %v4696_v50 = vmul.f32 %v10027_v8, %v12286_v22  ;;  %v4592_v28 = vadd.f32 %v12778_v44, %v4524_v60  ;;  %v12897_v44 = vld [vmem:[%s14264_s5 + $0x8] ss:$0 sm:$0xff] }
 0x3a3   : > { %v4591_v15 = vadd.f32 %v12811_v53, %v4523_v36  ;;  %v4358_v24 = vmul.f32 %v12339_v46, %v4222_v62  ;;  %v12889_v58 = vmul.f32 %v12271_v10, %v4222_v62  ;;  %v4289_v8 = vmul.f32 %v10028_v2, %v12323_v40 }
 0x3a4   : > { %v4047_v45 = vsel %vm4011_vm3, %v4045_v4, %v4046_v26  ;;  %v4113_v14 = vsel %vm4011_vm3, 0.0, %v4045_v4  ;;  %v4156_v41 = vsel %vm4120_vm2, %v4154_v59, %v4155_v30  ;;  %v4764_v53 = vmul.f32 %v12897_v44, %v4222_v62 }
 0x3a5   : > { %v4253_v49 = vmul.f32 %v12331_v39, %v4113_v14  ;;  %v4254_v32 = vmul.f32 %v12331_v39, %v4047_v45  ;;  %v12901_v5 = vmul.f32 %v10028_v2, %v12266_v9  ;;  %v4627_v30 = vmul.f32 %v12299_v13, %v4113_v14 }
 0x3a6   : > { %v4628_v18 = vmul.f32 %v12299_v13, %v4047_v45  ;;  %v4357_v52 = vmul.f32 %v12339_v46, %v4156_v41  ;;  %v10029_v57 = vadd.f32 %v12550_v3, %v12554_v19  ;;  %v12909_v26 = vadd.f32 %v12482_v12, %v4793_v42 }
 0x3a7   : > { %v4321_v34 = vadd.f32 %v4289_v8, %v4253_v49  ;;  %v4322_v20 = vadd.f32 %v4290_v11, %v4254_v32  ;;  %v4659_v36 = vadd.f32 %v4627_v30, %v4591_v15  ;;  %v4695_v62 = vmul.f32 %v10028_v2, %v12286_v22 }
 0x3a8   : > { %14780 = vst [vmem:[#allocation49_spill] sm:$0xff] %v12909_v26  ;;  %v4660_v60 = vadd.f32 %v4628_v18, %v4592_v28  ;;  %v4158_v0 = vrot.slane %v10029_v57, 1  ;;  %v10030_v21 = vadd.f32 %v12550_v3, %v12564_v17  ;;  %v12915_v11 = vadd.f32 %v12482_v12, %v4794_v33 }
 0x3a9   : > { %v4389_v4 = vadd.f32 %v4357_v52, %v4321_v34  ;;  %v4390_v59 = vadd.f32 %v4358_v24, %v4322_v20  ;;  %v4727_v49 = vadd.f32 %v4695_v62, %v4659_v36  ;;  %v4763_v19 = vmul.f32 %v12897_v44, %v4156_v41  ;;  %v12921_v34 = vpop.f32.mrb[14].mxu1 }
 0x3aa   : > { %14781 = vst [vmem:[#allocation60_spill] sm:$0xff] %v12915_v11  ;;  %v4728_v32 = vadd.f32 %v4696_v50, %v4660_v60  ;;  %v4427_v42 = vmul.f32 %v12275_v6, %v4113_v14  ;;  %v4049_v28 = vrot.slane %v10029_v57, 7  ;;  %v4428_v2 = vmul.f32 %v12275_v6, %v4047_v45  ;;  %v12926_v52 = vpop.f32.mrb[15].mxu1 }
 0x3ab   : > { %v4457_v8 = vadd.f32 %v4425_v25, %v4389_v4  ;;  %v4458_v15 = vadd.f32 %v4426_v56, %v4390_v59  ;;  %v4563_v24 = vmul.f32 %v12271_v10, %v4156_v41  ;;  %v4795_v30 = vadd.f32 %v4763_v19, %v4727_v49  ;;  %14782 = vst [vmem:[#allocation57_spill] sm:$0xff] %v12926_v52 }
 0x3ac   : > { %v4796_v18 = vadd.f32 %v4764_v53, %v4728_v32  ;;  %v4223_v17 = vsel %vm4120_vm2, %v4158_v0, 0.0  ;;  %v4048_v33 = vrot.slane %v10030_v21, 7  ;;  %v4157_v20 = vrot.slane %v10030_v21, 1 }
 0x3ad   : > { %v10031_v50 = vadd.f32 %v12550_v3, %v12575_v47  ;;  %v4292_v25 = vmul.f32 %v10029_v57, %v12323_v40  ;;  %v12930_v56 = vmul.f32 %v10029_v57, %v12266_v9  ;;  %v4698_v45 = vmul.f32 %v10029_v57, %v12286_v22 }
 0x3ae   : > { %v4525_v14 = vadd.f32 %v12863_v37, %v4457_v8  ;;  %v4050_v41 = vsel %vm4011_vm3, %v4048_v33, %v4049_v28  ;;  %v4114_v53 = vsel %vm4011_vm3, 0.0, %v4048_v33  ;;  %v4159_v36 = vsel %vm4120_vm2, %v4157_v20, %v4158_v0 }
 0x3af   : > { %v4526_v60 = vadd.f32 %v12822_v61, %v4458_v15  ;;  %v4360_v47 = vmul.f32 %v12339_v46, %v4223_v17  ;;  %v4255_v62 = vmul.f32 %v12331_v39, %v4114_v53  ;;  %v4256_v4 = vmul.f32 %v12331_v39, %v4050_v41 }
 0x3b0   : > { %v4291_v59 = vmul.f32 %v10030_v21, %v12323_v40  ;;  %v12943_v57 = vmul.f32 %v12271_v10, %v4223_v17  ;;  %v4359_v37 = vmul.f32 %v12339_v46, %v4159_v36  ;;  %v4593_v49 = vadd.f32 %v12875_v16, %v4525_v14 }
 0x3b1   : > { %v4594_v32 = vadd.f32 %v12842_v7, %v4526_v60  ;;  %v4324_v19 = vadd.f32 %v4292_v25, %v4256_v4  ;;  %v4629_v61 = vmul.f32 %v12299_v13, %v4114_v53  ;;  %v4630_v8 = vmul.f32 %v12299_v13, %v4050_v41 }
 0x3b2   : > { %v4323_v0 = vadd.f32 %v4291_v59, %v4255_v62  ;;  %v12951_v15 = vadd.f32 %v12482_v12, %v4795_v30  ;;  %v4766_v28 = vmul.f32 %v12897_v44, %v4223_v17  ;;  %v4697_v33 = vmul.f32 %v10030_v21, %v12286_v22 }
 0x3b3   : > { %v4161_v20 = vrot.slane %v10031_v50, 1  ;;  %v4392_v26 = vadd.f32 %v4360_v47, %v4324_v19  ;;  %v4661_v52 = vadd.f32 %v4629_v61, %v4593_v49  ;;  %v4662_v16 = vadd.f32 %v4630_v8, %v4594_v32  ;;  %v14785_v49 = vld [vmem:[#allocation8_spill] sm:$0xff] }
 0x3b4   : > { %14783 = vst [vmem:[#allocation68_spill] sm:$0xff] %v12951_v15  ;;  %v4391_v11 = vadd.f32 %v4359_v37, %v4323_v0  ;;  %v12956_v7 = vadd.f32 %v12482_v12, %v4796_v18  ;;  %v4429_v25 = vmul.f32 %v12275_v6, %v4114_v53  ;;  %v12960_v14 = vmul.f32 %v10030_v21, %v12266_v9 }
 0x3b5   : > { %v4765_v30 = vmul.f32 %v12897_v44, %v4159_v36  ;;  %v4460_v62 = vadd.f32 %v4428_v2, %v4392_v26  ;;  %v4729_v17 = vadd.f32 %v4697_v33, %v4661_v52  ;;  %v4730_v4 = vadd.f32 %v4698_v45, %v4662_v16  ;;  %v12973_v2 = vpop.f32.mrb[16].mxu1 }
 0x3b6   : > { %14784 = vst [vmem:[#allocation65_spill] sm:$0xff] %v12956_v7  ;;  %v4459_v60 = vadd.f32 %v4427_v42, %v4391_v11  ;;  %v4430_v59 = vmul.f32 %v12275_v6, %v4050_v41  ;;  %v4052_v37 = vrot.slane %v10031_v50, 7  ;;  %v4224_v47 = vsel %vm4120_vm2, %v4161_v20, 0.0  ;;  %14786 = vst [vmem:[#allocation75_spill] sm:$0xff] %v12973_v2 }
 0x3b7   : > { %v10032_v18 = vadd.f32 %v12550_v3, %v14785_v49  ;;  %v4797_v32 = vadd.f32 %v4765_v30, %v4729_v17  ;;  %v4798_v0 = vadd.f32 %v4766_v28, %v4730_v4  ;;  %v4528_v21 = vadd.f32 %v12879_v38, %v4460_v62 }
 0x3b8   : > { %v4527_v53 = vadd.f32 %v12901_v5, %v4459_v60  ;;  %v12970_v19 = vmul.f32 %v12271_v10, %v4159_v36  ;;  %v4294_v26 = vmul.f32 %v10031_v50, %v12323_v40  ;;  %v12976_v52 = vmul.f32 %v10031_v50, %v12266_v9  ;;  %v12980_v5 = vpop.f32.mrb[17].mxu1 }
 0x3b9   : > { %v4051_v11 = vrot.slane %v10032_v18, 7  ;;  %v4160_v42 = vrot.slane %v10032_v18, 1  ;;  %v4700_v45 = vmul.f32 %v10031_v50, %v12286_v22  ;;  %v4596_v61 = vadd.f32 %v12889_v58, %v4528_v21  ;;  %14787 = vst [vmem:[#allocation73_spill] sm:$0xff] %v12980_v5 }
 0x3ba   : > { %v4595_v41 = vadd.f32 %v4563_v24, %v4527_v53  ;;  %v4362_v38 = vmul.f32 %v12339_v46, %v4224_v47  ;;  %v12987_v33 = vmul.f32 %v12271_v10, %v4224_v47  ;;  %v4293_v24 = vmul.f32 %v10032_v18, %v12323_v40 }
 0x3bb   : > { %v4053_v36 = vsel %vm4011_vm3, %v4051_v11, %v4052_v37  ;;  %v4115_v8 = vsel %vm4011_vm3, 0.0, %v4051_v11  ;;  %v4162_v28 = vsel %vm4120_vm2, %v4160_v42, %v4161_v20  ;;  %v4768_v58 = vmul.f32 %v12897_v44, %v4224_v47  ;;  %v14788_v37 = vld [vmem:[#allocation13_spill] sm:$0xff] }
 0x3bc   : > { %v4257_v16 = vmul.f32 %v12331_v39, %v4115_v8  ;;  %v4258_v50 = vmul.f32 %v12331_v39, %v4053_v36  ;;  %v12994_v30 = vmul.f32 %v10032_v18, %v12266_v9  ;;  %v4631_v60 = vmul.f32 %v12299_v13, %v4115_v8 }
 0x3bd   : > { %v4632_v62 = vmul.f32 %v12299_v13, %v4053_v36  ;;  %v4361_v4 = vmul.f32 %v12339_v46, %v4162_v28  ;;  %v10033_v49 = vadd.f32 %v12550_v3, %v14788_v37  ;;  %v13002_v53 = vadd.f32 %v12482_v12, %v4797_v32 }
 0x3be   : > { %v4325_v17 = vadd.f32 %v4293_v24, %v4257_v16  ;;  %v4326_v20 = vadd.f32 %v4294_v26, %v4258_v50  ;;  %v4663_v21 = vadd.f32 %v4631_v60, %v4595_v41  ;;  %v4699_v47 = vmul.f32 %v10032_v18, %v12286_v22 }
 0x3bf   : > { %14789 = vst [vmem:[#allocation83_spill] sm:$0xff] %v13002_v53  ;;  %v4664_v11 = vadd.f32 %v4632_v62, %v4596_v61  ;;  %v4164_v15 = vrot.slane %v10033_v49, 1  ;;  %v10034_v5 = vadd.f32 %v12550_v3, %v12602_v31  ;;  %v13008_v26 = vadd.f32 %v12482_v12, %v4798_v0  ;;  %v14798_v53 = vld [vmem:[#allocation19_spill] sm:$0xff] }
 0x3c0   : > { %v4393_v42 = vadd.f32 %v4361_v4, %v4325_v17  ;;  %v4394_v7 = vadd.f32 %v4362_v38, %v4326_v20  ;;  %v4731_v16 = vadd.f32 %v4699_v47, %v4663_v21  ;;  %v4767_v24 = vmul.f32 %v12897_v44, %v4162_v28  ;;  %v13029_v20 = vpop.f32.mrb[18].mxu1 }
 0x3c1   : > { %14790 = vst [vmem:[#allocation81_spill] sm:$0xff] %v13008_v26  ;;  %v4732_v50 = vadd.f32 %v4700_v45, %v4664_v11  ;;  %v4431_v32 = vmul.f32 %v12275_v6, %v4115_v8  ;;  %v4055_v61 = vrot.slane %v10033_v49, 7  ;;  %v4432_v18 = vmul.f32 %v12275_v6, %v4053_v36  ;;  %14791 = vst [vmem:[#allocation91_spill] sm:$0xff] %v13029_v20  ;;  %v10583_v26 = vld [vmem:[%s14266_s7] ss:$0 sm:$0xff] }
 0x3c2   : > { %v4461_v37 = vadd.f32 %v4429_v25, %v4393_v42  ;;  %v4462_v41 = vadd.f32 %v4430_v59, %v4394_v7  ;;  %v4567_v38 = vmul.f32 %v12271_v10, %v4162_v28  ;;  %v4799_v60 = vadd.f32 %v4767_v24, %v4731_v16 }
 0x3c3   : > { %v4800_v62 = vadd.f32 %v4768_v58, %v4732_v50  ;;  %v4225_v31 = vsel %vm4120_vm2, %v4164_v15, 0.0  ;;  %v4054_v17 = vrot.slane %v10034_v5, 7  ;;  %v4163_v12 = vrot.slane %v10034_v5, 1 }
 0x3c4   : > { %v10035_v0 = vadd.f32 %v12550_v3, %v12615_v29  ;;  %v4296_v45 = vmul.f32 %v10033_v49, %v12323_v40  ;;  %v13019_v8 = vmul.f32 %v10033_v49, %v12266_v9  ;;  %v4702_v7 = vmul.f32 %v10033_v49, %v12286_v22 }
 0x3c5   : > { %v4529_v25 = vadd.f32 %v12960_v14, %v4461_v37  ;;  %v4056_v59 = vsel %vm4011_vm3, %v4054_v17, %v4055_v61  ;;  %v4116_v36 = vsel %vm4011_vm3, 0.0, %v4054_v17  ;;  %v13026_v28 = vsel %vm4120_vm2, %v4163_v12, %v4164_v15  ;;  %v13035_v14 = vpop.f32.mrb[19].mxu1  ;;  %v13049_v37 = vld [vmem:[%s14266_s7 + $0x2] ss:$0 sm:$0xff] }
 0x3c6   : > { %v4530_v58 = vadd.f32 %v12930_v56, %v4462_v41  ;;  %v4364_v29 = vmul.f32 %v12339_v46, %v4225_v31  ;;  %v4259_v4 = vmul.f32 %v12331_v39, %v4116_v36  ;;  %v4260_v21 = vmul.f32 %v12331_v39, %v4056_v59  ;;  %14792 = vst [vmem:[#allocation89_spill] sm:$0xff] %v13035_v14 }
 0x3c7   : > { %v4295_v49 = vmul.f32 %v10034_v5, %v12323_v40  ;;  %v13038_v11 = vmul.f32 %v12271_v10, %v4225_v31  ;;  %v4597_v15 = vadd.f32 %v12970_v19, %v4529_v25  ;;  %v4633_v56 = vmul.f32 %v12299_v13, %v4116_v36 }
 0x3c8   : > { %v4598_v47 = vadd.f32 %v12943_v57, %v4530_v58  ;;  %v4328_v16 = vadd.f32 %v4296_v45, %v4260_v21  ;;  %v4363_v50 = vmul.f32 %v12339_v46, %v13026_v28  ;;  %v4634_v24 = vmul.f32 %v12299_v13, %v4056_v59 }
 0x3c9   : > { %v4327_v42 = vadd.f32 %v4295_v49, %v4259_v4  ;;  %v13052_v41 = vadd.f32 %v13049_v37, %v4799_v60  ;;  %v4770_v19 = vmul.f32 %v12897_v44, %v4225_v31  ;;  %v4665_v57 = vadd.f32 %v4633_v56, %v4597_v15 }
 0x3ca   : > { %v4701_v61 = vmul.f32 %v10034_v5, %v12286_v22  ;;  %v4396_v12 = vadd.f32 %v4364_v29, %v4328_v16  ;;  %v4666_v45 = vadd.f32 %v4634_v24, %v4598_v47  ;;  %v4167_v25 = vrot.slane %v10035_v0, 1 }
 0x3cb   : > { %14793 = vst [vmem:[#allocation97_spill] sm:$0xff] %v13052_v41  ;;  %v4395_v17 = vadd.f32 %v4363_v50, %v4327_v42  ;;  %v13057_v58 = vadd.f32 %v13049_v37, %v4800_v62  ;;  %v13060_v4 = vmul.f32 %v10034_v5, %v12266_v9  ;;  %v4769_v60 = vmul.f32 %v12897_v44, %v13026_v28 }
 0x3cc   : > { %v4733_v21 = vadd.f32 %v4701_v61, %v4665_v57  ;;  %v4433_v49 = vmul.f32 %v12275_v6, %v4116_v36  ;;  %v4464_v15 = vadd.f32 %v4432_v18, %v4396_v12  ;;  %v4734_v56 = vadd.f32 %v4702_v7, %v4666_v45 }
 0x3cd   : > { %14794 = vst [vmem:[#allocation96_spill] sm:$0xff] %v13057_v58  ;;  %v4463_v31 = vadd.f32 %v4431_v32, %v4395_v17  ;;  %v4434_v42 = vmul.f32 %v12275_v6, %v4056_v59  ;;  %v4058_v47 = vrot.slane %v10035_v0, 7  ;;  %v10036_v62 = vadd.f32 %v12550_v3, %v12620_v51 }
 0x3ce   : > { %v13066_v29 = vadd.f32 %v4769_v60, %v4733_v21  ;;  %v13070_v16 = vadd.f32 %v4770_v19, %v4734_v56  ;;  %v4226_v5 = vsel %vm4120_vm2, %v4167_v25, 0.0  ;;  %v4532_v24 = vadd.f32 %v12976_v52, %v4464_v15  ;;  %v14795_v19 = vld [vmem:[#allocation12_spill] sm:$0xff] }
 0x3cf   : > { %v4531_v50 = vadd.f32 %v12994_v30, %v4463_v31  ;;  %v4298_v32 = vmul.f32 %v10035_v0, %v12323_v40  ;;  %v13077_v18 = vmul.f32 %v10035_v0, %v12266_v9  ;;  %v4057_v7 = vrot.slane %v10036_v62, 7 }
 0x3d0   : > { %v4166_v59 = vrot.slane %v10036_v62, 1  ;;  %v4704_v36 = vmul.f32 %v10035_v0, %v12286_v22  ;;  %v4600_v51 = vadd.f32 %v12987_v33, %v4532_v24  ;;  %v10037_v61 = vadd.f32 %v12550_v3, %v14795_v19  ;;  %v13096_v3 = vpop.f32.mrb[20].mxu1 }
 0x3d1   : > { %v4599_v57 = vadd.f32 %v4567_v38, %v4531_v50  ;;  %v4366_v17 = vmul.f32 %v12339_v46, %v4226_v5  ;;  %v4059_v30 = vsel %vm4011_vm3, %v4057_v7, %v4058_v47  ;;  %v13086_v52 = vsel %vm4011_vm3, 0.0, %v4057_v7  ;;  %14796 = vst [vmem:[#allocation105_spill] sm:$0xff] %v13096_v3  ;;  %v13105_v15 = vpop.f32.mrb[21].mxu1 }
 0x3d2   : > { %v4168_v12 = vsel %vm4120_vm2, %v4166_v59, %v4167_v25  ;;  %v13090_v45 = vmul.f32 %v12271_v10, %v4226_v5  ;;  %v4261_v38 = vmul.f32 %v12331_v39, %v13086_v52  ;;  %v4262_v33 = vmul.f32 %v12331_v39, %v4059_v30  ;;  %14797 = vst [vmem:[#allocation104_spill] sm:$0xff] %v13105_v15 }
 0x3d3   : > { %v4297_v0 = vmul.f32 %v10036_v62, %v12323_v40  ;;  %v4772_v21 = vmul.f32 %v12897_v44, %v4226_v5  ;;  %v13100_v60 = vmul.f32 %v10036_v62, %v12266_v9  ;;  %v4635_v25 = vmul.f32 %v12299_v13, %v13086_v52 }
 0x3d4   : > { %v4636_v31 = vmul.f32 %v12299_v13, %v4059_v30  ;;  %v4330_v47 = vadd.f32 %v4298_v32, %v4262_v33  ;;  %v4365_v50 = vmul.f32 %v12339_v46, %v4168_v12  ;;  %v4170_v24 = vrot.slane %v10037_v61, 1 }
 0x3d5   : > { %v4329_v56 = vadd.f32 %v4297_v0, %v4261_v38  ;;  %v4436_v7 = vmul.f32 %v12275_v6, %v4059_v30  ;;  %v4667_v59 = vadd.f32 %v4635_v25, %v4599_v57  ;;  %v4703_v5 = vmul.f32 %v10036_v62, %v12286_v22 }
 0x3d6   : > { %v4668_v19 = vadd.f32 %v4636_v31, %v4600_v51  ;;  %v4398_v58 = vadd.f32 %v4366_v17, %v4330_v47  ;;  %v4061_v41 = vrot.slane %v10037_v61, 7  ;;  %v10038_v15 = vadd.f32 %v10583_v26, %v14798_v53 }
 0x3d7   : > { %v4397_v9 = vadd.f32 %v4365_v50, %v4329_v56  ;;  %v4571_v32 = vmul.f32 %v12271_v10, %v4168_v12  ;;  %v4735_v38 = vadd.f32 %v4703_v5, %v4667_v59  ;;  %v4771_v0 = vmul.f32 %v12897_v44, %v4168_v12 }
 0x3d8   : > { %v4736_v33 = vadd.f32 %v4704_v36, %v4668_v19  ;;  %v4227_v57 = vsel %vm4120_vm2, %v4170_v24, 0.0  ;;  %v4300_v51 = vmul.f32 %v10037_v61, %v12323_v40  ;;  %v4060_v62 = vrot.slane %v10038_v15, 7 }
 0x3d9   : > { %v4169_v30 = vrot.slane %v10038_v15, 1  ;;  %v4803_v17 = vadd.f32 %v4771_v0, %v4735_v38  ;;  %v4465_v31 = vadd.f32 %v4433_v49, %v4397_v9  ;;  %v4466_v56 = vadd.f32 %v4434_v42, %v4398_v58  ;;  %v13131_v58 = vld [vmem:[%s14266_s7 + $0x1] ss:$0 sm:$0xff] }
 0x3da   : > { %v13118_v25 = vadd.f32 %v4772_v21, %v4736_v33  ;;  %v4706_v47 = vmul.f32 %v10037_v61, %v12286_v22  ;;  %v4062_v53 = vsel %vm4011_vm3, %v4060_v62, %v4061_v41  ;;  %v4118_v26 = vsel %vm4011_vm3, 0.0, %v4060_v62  ;;  %v13138_v21 = vpop.f32.mrb[22].mxu1 }
 0x3db   : > { %v4171_v36 = vsel %vm4120_vm2, %v4169_v30, %v4170_v24  ;;  %v4368_v12 = vmul.f32 %v12339_v46, %v4227_v57  ;;  %v4263_v50 = vmul.f32 %v12331_v39, %v4118_v26  ;;  %v4264_v59 = vmul.f32 %v12331_v39, %v4062_v53  ;;  %14800 = vst [vmem:[#allocation10_spill] sm:$0xff] %v13138_v21  ;;  %v13142_v9 = vpop.f32.mrb[23].mxu1 }
 0x3dc   : > { %14799 = vst [vmem:[#allocation7_spill] sm:$0xff] %v13118_v25  ;;  %v4299_v19 = vmul.f32 %v10038_v15, %v12323_v40  ;;  %v4774_v49 = vmul.f32 %v12897_v44, %v4227_v57  ;;  %v4533_v41 = vadd.f32 %v13060_v4, %v4465_v31  ;;  %v4534_v42 = vadd.f32 %v13019_v8, %v4466_v56  ;;  %v13149_v8 = vld [vmem:[%s14265_s6] sm:$0xff]  ;;  %v13157_v30 = vpop.f32.mrb[24].mxu1 }
 0x3dd   : > { %v4569_v61 = vmul.f32 %v12271_v10, %v13026_v28  ;;  %v4332_v39 = vadd.f32 %v4300_v51, %v4264_v59  ;;  %v4367_v40 = vmul.f32 %v12339_v46, %v4171_v36  ;;  %v4637_v5 = vmul.f32 %v12299_v13, %v4118_v26  ;;  %14801 = vst [vmem:[#allocation14_spill] sm:$0xff] %v13142_v9 }
 0x3de   : > { %v4331_v24 = vadd.f32 %v4299_v19, %v4263_v50  ;;  %v4602_v33 = vadd.f32 %v13038_v11, %v4534_v42  ;;  %v4638_v4 = vmul.f32 %v12299_v13, %v4062_v53  ;;  %v10043_v10 = vadd.f32 %v12768_v48, %v13131_v58  ;;  %14802 = vst [vmem:[#allocation15_spill] sm:$0xff] %v13157_v30  ;;  %v14803_v53 = vld [vmem:[#allocation41_spill] sm:$0xff]  ;;  %v13174_v50 = vpop.f32.mrb[25].mxu1 }
 0x3df   : > { %v4601_v38 = vadd.f32 %v4569_v61, %v4533_v41  ;;  %v4400_v0 = vadd.f32 %v4368_v12, %v4332_v39  ;;  %v4435_v46 = vmul.f32 %v12275_v6, %v13086_v52  ;;  %v4705_v57 = vmul.f32 %v10038_v15, %v12286_v22  ;;  %14807 = vst [vmem:[#allocation21_spill] sm:$0xff] %v13174_v50 }
 0x3e0   : > { %v4399_v28 = vadd.f32 %v4367_v40, %v4331_v24  ;;  %v4670_v62 = vadd.f32 %v4638_v4, %v4602_v33  ;;  %v4773_v11 = vmul.f32 %v12897_v44, %v4171_v36  ;;  %v7766_v13 = vrot.slane %v10043_v10, 1 }
 0x3e1   : > { %v4669_v51 = vadd.f32 %v4637_v5, %v4601_v38  ;;  %v4468_v56 = vadd.f32 %v4436_v7, %v4400_v0  ;;  %v14804_v26 = vsub.s32 4, %v14803_v53  ;;  %v14805_v12 = vsub.s32 5, %v14803_v53 }
 0x3e2   : > { %v4467_v31 = vadd.f32 %v4435_v46, %v4399_v28  ;;  %v4738_v52 = vadd.f32 %v4706_v47, %v4670_v62  ;;  %v7658_v15 = vrot.slane %v10043_v10, 7  ;;  %v14806_v44 = vsub.s32 1, %v14803_v53  ;;  %v14817_v62 = vld [vmem:[#allocation58_spill] sm:$0xff] }
 0x3e3   : > { %v13162_v48 = vrot.slane %v13149_v8, %v14804_v26  ;;  %v13167_v6 = vrot.slane %v13149_v8, %v14805_v12  ;;  %v4737_v22 = vadd.f32 %v4705_v57, %v4669_v51  ;;  %v4536_v59 = vadd.f32 %v13077_v18, %v4468_v56 }
 0x3e4   : > { %v13172_v36 = vrot.slane %v13149_v8, %v14806_v44  ;;  %v4535_v7 = vadd.f32 %v13100_v60, %v4467_v31  ;;  %v7853_v19 = vsel %vm4120_vm2, %v7766_v13, 0.0  ;;  %v10044_v41 = vadd.f32 %v13131_v58, %v12774_v27 }
 0x3e5   : > { %v4805_v42 = vadd.f32 %v4773_v11, %v4737_v22  ;;  %v13181_v61 = vadd.f32 %v4774_v49, %v4738_v52  ;;  %v14809_v47 = vsub.s32 2, %v14803_v53  ;;  %v14810_v39 = vsub.s32 3, %v14803_v53 }
 0x3e6   : > { %v4603_v60 = vadd.f32 %v4571_v32, %v4535_v7  ;;  %v13194_v18 = vadd.f32 %v13090_v45, %v4536_v59  ;;  %v7657_v5 = vrot.slane %v10044_v41, 7  ;;  %v7765_v38 = vrot.slane %v10044_v41, 1  ;;  %v14816_v45 = vld [vmem:[#allocation55_spill] sm:$0xff] }
 0x3e7   : > { %14808 = vst [vmem:[#allocation46_spill] sm:$0xff] %v13181_v61  ;;  %v13186_v24 = vrot.slane %v13149_v8, %v14809_v47  ;;  %v13191_v40 = vrot.slane %v13149_v8, %v14810_v39  ;;  %v13198_v27 = vadd.f32 %v13049_v37, %v13066_v29  ;;  %v13202_v49 = vadd.f32 %v13049_v37, %v13070_v16  ;;  %v13251_v39 = vpop.f32.mrb[26].mxu1 }
 0x3e8   : > { %14811 = vst [vmem:[#allocation44_spill] sm:$0xff] %v13194_v18  ;;  %v13205_v33 = vadd.f32 %v13049_v37, %v4803_v17  ;;  %v14815_v4 = vsub.s32 0, %v14803_v53  ;;  %v4671_v28 = vadd.f32 %v14816_v45, %v4603_v60  ;;  %v7659_v0 = vsel %vm4011_vm3, %v7657_v5, %v7658_v15  ;;  %14821 = vst [vmem:[#allocation77_spill] sm:$0xff] %v13251_v39 }
 0x3e9   : > { %14812 = vst [vmem:[#allocation51_spill] sm:$0xff] %v13198_v27  ;;  %14813 = vst [vmem:[#allocation61_spill] sm:$0xff] %v13202_v49  ;;  %v7745_v46 = vsel %vm4011_vm3, 0.0, %v7657_v5  ;;  %v13216_v29 = vsel %vm4120_vm2, %v7765_v38, %v7766_v13  ;;  %v7911_v16 = vmul.f32 %v10043_v10, %v13162_v48  ;;  %v13220_v57 = vmul.f32 %v13167_v6, %v7853_v19  ;;  %v14825_v27 = vld [vmem:[#allocation35_spill] sm:$0xff] }
 0x3ea   : > { %14814 = vst [vmem:[#allocation59_spill] sm:$0xff] %v13205_v33  ;;  %v13210_v32 = vrot.slane %v13149_v8, %v14815_v4  ;;  %v13223_v17 = vmul.f32 %v10043_v10, %v13172_v36  ;;  %v7875_v51 = vmul.f32 %v13191_v40, %v7659_v0  ;;  %v13227_v11 = vadd.f32 %v14817_v62, %v4671_v28 }
 0x3eb   : > { %v13230_v31 = vmul.f32 %v13186_v24, %v7853_v19  ;;  %v7874_v56 = vmul.f32 %v13191_v40, %v7745_v46  ;;  %v10045_v13 = vadd.f32 %v12790_v63, %v13131_v58  ;;  %v13236_v26 = vadd.f32 %v13049_v37, %v4805_v42 }
 0x3ec   : > { %14818 = vst [vmem:[#allocation69_spill] sm:$0xff] %v13227_v11  ;;  %v13238_v12 = vadd.f32 %v7911_v16, %v7875_v51  ;;  %v14820_v10 = vsub.s32 7, %v14803_v53  ;;  %v10046_v52 = vadd.f32 %v13131_v58, %v12793_v43  ;;  %v7910_v15 = vmul.f32 %v10044_v41, %v13162_v48 }
 0x3ed   : > { %14819 = vst [vmem:[#allocation67_spill] sm:$0xff] %v13236_v26  ;;  %v8048_v44 = vmul.f32 %v13210_v32, %v7745_v46  ;;  %v7661_v7 = vrot.slane %v10045_v13, 7  ;;  %v7769_v59 = vrot.slane %v10045_v13, 1  ;;  %v8049_v63 = vmul.f32 %v13210_v32, %v7659_v0  ;;  %v13270_v0 = vld [vmem:[%s14265_s6 + $0x8] ss:$0 sm:$0xff] }
 0x3ee   : > { %v13243_v22 = vrot.slane %v13149_v8, %v14820_v10  ;;  %v8116_v19 = vmul.f32 %v10044_v41, %v13172_v36  ;;  %v7660_v42 = vrot.slane %v10046_v52, 7  ;;  %v7768_v47 = vrot.slane %v10046_v52, 1 }
 0x3ef   : > { %v13253_v60 = vadd.f32 %v7910_v15, %v7874_v56  ;;  %v8184_v5 = vmul.f32 %v13186_v24, %v13216_v29  ;;  %v7854_v43 = vsel %vm4120_vm2, %v7769_v59, 0.0  ;;  %v7913_v38 = vmul.f32 %v10045_v13, %v13162_v48 }
 0x3f0   : > { %v13260_v4 = vmul.f32 %v10045_v13, %v13172_v36  ;;  %v13263_v45 = vmul.f32 %v10045_v13, %v13243_v22  ;;  %v7662_v41 = vsel %vm4011_vm3, %v7660_v42, %v7661_v7  ;;  %v7912_v28 = vmul.f32 %v10046_v52, %v13162_v48 }
 0x3f1   : > { %v13273_v46 = vsel %vm4011_vm3, 0.0, %v7660_v42  ;;  %v13276_v16 = vsel %vm4120_vm2, %v7768_v47, %v7769_v59  ;;  %v7877_v51 = vmul.f32 %v13191_v40, %v7662_v41  ;;  %v13280_v62 = vmul.f32 %v10046_v52, %v13172_v36  ;;  %v13293_v59 = vpop.f32.mrb[27].mxu1 }
 0x3f2   : > { %v7981_v56 = vmul.f32 %v13167_v6, %v7854_v43  ;;  %v7876_v13 = vmul.f32 %v13191_v40, %v13273_v46  ;;  %v14822_v10 = vsub.s32 6, %v14803_v53  ;;  %v13291_v7 = vmul.f32 %v10046_v52, %v13243_v22  ;;  %14823 = vst [vmem:[#allocation76_spill] sm:$0xff] %v13293_v59 }
 0x3f3   : > { %v13296_v42 = vmul.f32 %v13186_v24, %v7854_v43  ;;  %v7945_v47 = vadd.f32 %v7913_v38, %v7877_v51  ;;  %v10047_v26 = vadd.f32 %v12807_v54, %v13131_v58  ;;  %v10048_v61 = vadd.f32 %v13131_v58, %v12815_v55 }
 0x3f4   : > { %v13288_v15 = vrot.slane %v13149_v8, %v14822_v10  ;;  %v13303_v53 = vmul.f32 %v13270_v0, %v7854_v43  ;;  %v7944_v8 = vadd.f32 %v7912_v28, %v7876_v13  ;;  %v7980_v52 = vmul.f32 %v13167_v6, %v13276_v16 }
 0x3f5   : > { %v8051_v10 = vmul.f32 %v13210_v32, %v7662_v41  ;;  %v8013_v11 = vadd.f32 %v7981_v56, %v7945_v47  ;;  %v8050_v18 = vmul.f32 %v13210_v32, %v13273_v46  ;;  %v7664_v38 = vrot.slane %v10047_v26, 7  ;;  %v14824_v56 = vld [vmem:[#allocation74_spill] sm:$0xff] }
 0x3f6   : > { %v7772_v51 = vrot.slane %v10047_v26, 1  ;;  %v8012_v49 = vadd.f32 %v7980_v52, %v7944_v8  ;;  %v13312_v54 = vmul.f32 %v13186_v24, %v13276_v16  ;;  %v13315_v55 = vmul.f32 %v13288_v15, %v7662_v41 }
 0x3f7   : > { %v7663_v43 = vrot.slane %v10048_v61, 7  ;;  %v8081_v28 = vadd.f32 %v8049_v63, %v8013_v11  ;;  %v7771_v13 = vrot.slane %v10048_v61, 1  ;;  %v10075_v33 = vadd.f32 %v12818_v35, %v13131_v58 }
 0x3f8   : > { %v13321_v47 = vadd.f32 %v13049_v37, %v14824_v56  ;;  %v8080_v25 = vadd.f32 %v8048_v44, %v8012_v49  ;;  %v7855_v8 = vsel %vm4120_vm2, %v7772_v51, 0.0  ;;  %v7915_v52 = vmul.f32 %v10047_v26, %v13162_v48 }
 0x3f9   : > { %v10076_v59 = vadd.f32 %v13131_v58, %v14825_v27  ;;  %v13328_v41 = vmul.f32 %v10047_v26, %v13172_v36  ;;  %v7665_v11 = vsel %vm4011_vm3, %v7663_v43, %v7664_v38  ;;  %v7747_v63 = vsel %vm4011_vm3, 0.0, %v7663_v43 }
 0x3fa   : > { %v13333_v35 = vsel %vm4120_vm2, %v7771_v13, %v7772_v51  ;;  %v8321_v37 = vmul.f32 %v10047_v26, %v13243_v22  ;;  %v7878_v49 = vmul.f32 %v13191_v40, %v7747_v63  ;;  %v7879_v44 = vmul.f32 %v13191_v40, %v7665_v11  ;;  %v13345_v13 = vpop.f32.mrb[28].mxu1 }
 0x3fb   : > { %v7914_v56 = vmul.f32 %v10048_v61, %v13162_v48  ;;  %v7983_v27 = vmul.f32 %v13167_v6, %v7855_v8  ;;  %v8389_v39 = vmul.f32 %v13270_v0, %v7855_v8  ;;  %v8148_v50 = vadd.f32 %v8116_v19, %v8080_v25  ;;  %14826 = vst [vmem:[#allocation85_spill] sm:$0xff] %v13345_v13 }
 0x3fc   : > { %v8149_v38 = vadd.f32 %v13223_v17, %v8081_v28  ;;  %v7947_v43 = vadd.f32 %v7915_v52, %v7879_v44  ;;  %v7982_v51 = vmul.f32 %v13167_v6, %v13333_v35  ;;  %v8252_v26 = vmul.f32 %v13288_v15, %v7747_v63  ;;  %v13350_v28 = vpop.f32.mrb[29].mxu1 }
 0x3fd   : > { %v7946_v30 = vadd.f32 %v7914_v56, %v7878_v49  ;;  %v8216_v9 = vadd.f32 %v8184_v5, %v8148_v50  ;;  %v8253_v3 = vmul.f32 %v13288_v15, %v7665_v11  ;;  %v8320_v14 = vmul.f32 %v10048_v61, %v13243_v22 }
 0x3fe   : > { %v8217_v21 = vadd.f32 %v13230_v31, %v8149_v38  ;;  %v8015_v25 = vadd.f32 %v7983_v27, %v7947_v43  ;;  %v7126_v19 = vmul.f32 0.0, %v10075_v33  ;;  %v7125_v17 = vmul.f32 0.0, %v10076_v59 }
 0x3ff   : > { %v8014_v20 = vadd.f32 %v7982_v51, %v7946_v30  ;;  %v8284_v52 = vadd.f32 %v8252_v26, %v8216_v9  ;;  %v7978_v44 = vmul.f32 %v13167_v6, %v13216_v29  ;;  %v8011_v50 = vadd.f32 %v13220_v57, %v13238_v12  ;;  %v14828_v26 = vld [vmem:[#allocation71_spill] sm:$0xff] }
 0x400   : > { %v8285_v49 = vadd.f32 %v8253_v3, %v8217_v21  ;;  %v8083_v31 = vadd.f32 %v8051_v10, %v8015_v25  ;;  %v7655_v56 = vrot.slane %v7126_v19, 7  ;;  %v7763_v38 = vrot.slane %v7126_v19, 1  ;;  %v13364_v3 = vld [vmem:[%s14266_s7 + $0x3] ss:$0 sm:$0xff] }
 0x401   : > { %v8082_v5 = vadd.f32 %v8050_v18, %v8014_v20  ;;  %v8352_v13 = vadd.f32 %v8320_v14, %v8284_v52  ;;  %v8388_v30 = vmul.f32 %v13270_v0, %v13333_v35  ;;  %v7654_v33 = vrot.slane %v7125_v17, 7 }
 0x402   : > { %v8353_v2 = vadd.f32 %v8321_v37, %v8285_v49  ;;  %v13359_v59 = vmul.f32 %v13186_v24, %v7855_v8  ;;  %v13367_v20 = vmul.f32 %v10048_v61, %v13172_v36  ;;  %v7762_v21 = vrot.slane %v7125_v17, 1 }
 0x403   : > { %v8010_v14 = vadd.f32 %v7978_v44, %v13253_v60  ;;  %v13371_v9 = vmul.f32 %v13210_v32, %v7747_v63  ;;  %v8420_v18 = vadd.f32 %v8388_v30, %v8352_v13  ;;  %v7656_v57 = vsel %vm4011_vm3, %v7654_v33, %v7655_v56 }
 0x404   : > { %v8421_v29 = vadd.f32 %v8389_v39, %v8353_v2  ;;  %v13375_v12 = vmul.f32 %v13210_v32, %v7665_v11  ;;  %v7744_v10 = vsel %vm4011_vm3, 0.0, %v7654_v33  ;;  %v7764_v8 = vsel %vm4120_vm2, %v7762_v21, %v7763_v38  ;;  %v14827_v11 = vld [vmem:[#allocation45_spill] sm:$0xff] }
 0x405   : > { %v8047_v61 = vmul.f32 %v13210_v32, %v7656_v57  ;;  %v8456_v37 = vadd.f32 %v13364_v3, %v8420_v18  ;;  %v7852_v60 = vsel %vm4120_vm2, %v7763_v38, 0.0  ;;  %v8115_v63 = vmul.f32 %v13172_v36, %v7126_v19 }
 0x406   : > { %v8046_v27 = vmul.f32 %v13210_v32, %v7744_v10  ;;  %v8114_v39 = vmul.f32 %v13172_v36, %v7125_v17  ;;  %v10049_v43 = vadd.f32 %v14827_v11, %v13131_v58  ;;  %v13395_v51 = vadd.f32 %v13131_v58, %v12847_v1  ;;  %v13401_v17 = vpop.f32.mrb[30].mxu1 }
 0x407   : > { %v8079_v2 = vadd.f32 %v8047_v61, %v8011_v50  ;;  %v8488_v13 = vmul.f32 %v8456_v37, %v14828_v26  ;;  %v8150_v19 = vadd.f32 %v13280_v62, %v8082_v5  ;;  %v8151_v52 = vadd.f32 %v13260_v4, %v8083_v31 }
 0x408   : > { %v8078_v25 = vadd.f32 %v8046_v27, %v8010_v14  ;;  %v8183_v49 = vmul.f32 %v13186_v24, %v7852_v60  ;;  %v7667_v50 = vrot.slane %v10049_v43, 7  ;;  %v7775_v56 = vrot.slane %v10049_v43, 1 }
 0x409   : > { %v8147_v44 = vadd.f32 %v8115_v63, %v8079_v2  ;;  %v13405_v38 = vmul.f32 %v13186_v24, %v13333_v35  ;;  %8520 = vst.msk [vmem:[%s13388_s25 + $0x10] sm:$0xff] %vm548_vm0, %v8488_v13  ;;  %v8182_v30 = vmul.f32 %v13186_v24, %v7764_v8  ;;  %v8250_v62 = vmul.f32 %v13288_v15, %v13273_v46  ;;  %v13423_v8 = vpop.f32.mrb[31].mxu1 }
 0x40a   : > { %v8146_v1 = vadd.f32 %v8114_v39, %v8078_v25  ;;  %v8457_v4 = vadd.f32 %v13364_v3, %v8421_v29  ;;  %v7666_v31 = vrot.slane %v13395_v51, 7  ;;  %v7774_v33 = vrot.slane %v13395_v51, 1 }
 0x40b   : > { %v8215_v5 = vadd.f32 %v8183_v49, %v8147_v44  ;;  %v8386_v35 = vmul.f32 %v13270_v0, %v13276_v16  ;;  %v7856_v14 = vsel %vm4120_vm2, %v7775_v56, 0.0  ;;  %v7917_v18 = vmul.f32 %v10049_v43, %v13162_v48 }
 0x40c   : > { %v8214_v21 = vadd.f32 %v8182_v30, %v8146_v1  ;;  %v7668_v10 = vsel %vm4011_vm3, %v7666_v31, %v7667_v50  ;;  %v7748_v46 = vsel %vm4011_vm3, 0.0, %v7666_v31  ;;  %v7776_v29 = vsel %vm4120_vm2, %v7774_v33, %v7775_v56 }
 0x40d   : > { %v8283_v57 = vadd.f32 %v13315_v55, %v8215_v5  ;;  %v7880_v37 = vmul.f32 %v13191_v40, %v7748_v46  ;;  %v7881_v60 = vmul.f32 %v13191_v40, %v7668_v10  ;;  %v7916_v16 = vmul.f32 %v13395_v51, %v13162_v48 }
 0x40e   : > { %v8282_v61 = vadd.f32 %v8250_v62, %v8214_v21  ;;  %v8553_v63 = vsel %vm548_vm0, %v8488_v13, 0.0  ;;  %v7985_v27 = vmul.f32 %v13167_v6, %v7856_v14  ;;  %v13433_v2 = vmul.f32 %v10049_v43, %v13172_v36  ;;  %v14829_v21 = vld [vmem:[#allocation82_spill] sm:$0xff] }
 0x40f   : > { %v8351_v55 = vadd.f32 %v13263_v45, %v8283_v57  ;;  %v7948_v11 = vadd.f32 %v7916_v16, %v7880_v37  ;;  %v7949_v26 = vadd.f32 %v7917_v18, %v7881_v60  ;;  %v7984_v25 = vmul.f32 %v13167_v6, %v7776_v29  ;;  %v14830_v57 = vld [vmem:[#allocation5_spill] sm:$0xff]  ;;  %v14831_v60 = vld [vmem:[#allocation52_spill] sm:$0xff] }
 0x410   : > { %v8350_v39 = vadd.f32 %v13291_v7, %v8282_v61  ;;  %v8323_v44 = vmul.f32 %v10049_v43, %v13243_v22  ;;  %v8218_v50 = vadd.f32 %v13312_v54, %v8150_v19  ;;  %v8219_v13 = vadd.f32 %v13296_v42, %v8151_v52  ;;  %v13447_v43 = vpop.f32.mrb[34].mxu0 }
 0x411   : > { %v8419_v49 = vadd.f32 %v13303_v53, %v8351_v55  ;;  %v8016_v56 = vadd.f32 %v7984_v25, %v7948_v11  ;;  %v8017_v1 = vadd.f32 %v7985_v27, %v7949_v26  ;;  %v8254_v30 = vmul.f32 %v13288_v15, %v7748_v46 }
 0x412   : > { %v8418_v45 = vadd.f32 %v8386_v35, %v8350_v39  ;;  %v8255_v7 = vmul.f32 %v13288_v15, %v7668_v10  ;;  %v8322_v5 = vmul.f32 %v13395_v51, %v13243_v22  ;;  %v8390_v53 = vmul.f32 %v13270_v0, %v7776_v29 }
 0x413   : > { %v8455_v62 = vadd.f32 %v13364_v3, %v8419_v49  ;;  %v8084_v42 = vadd.f32 %v13371_v9, %v8016_v56  ;;  %v8085_v19 = vadd.f32 %v13375_v12, %v8017_v1  ;;  %v8286_v52 = vadd.f32 %v8254_v30, %v8218_v50  ;;  %v13490_v30 = vpop.f32.mrb[32].mxu1 }
 0x414   : > { %v8454_v54 = vadd.f32 %v13364_v3, %v8418_v45  ;;  %v8287_v33 = vadd.f32 %v8255_v7, %v8219_v13  ;;  %v8489_v35 = vmul.f32 %v8457_v4, %v14829_v21  ;;  %v10051_v18 = vadd.f32 %v12856_v23, %v13131_v58  ;;  %v13471_v23 = vpop.f32.mrb[35].mxu0 }
 0x415   : > { %v8487_v31 = vmul.f32 %v8455_v62, %v13321_v47  ;;  %v8354_v37 = vadd.f32 %v8322_v5, %v8286_v52  ;;  %v13459_v16 = vadd.f32 %v13131_v58, %v14831_v60  ;;  %v8152_v9 = vadd.f32 %v13367_v20, %v8084_v42  ;;  %v14832_v62 = vld [vmem:[#allocation79_spill] sm:$0xff]  ;;  %v13510_v60 = vpop.f32.mrb[33].mxu1 }
 0x416   : > { %v8486_v61 = vmul.f32 %v8454_v54, %v14830_v57  ;;  %v13466_v47 = vmul.f32 %v13186_v24, %v7856_v14  ;;  %v8391_v4 = vmul.f32 %v13270_v0, %v7856_v14  ;;  %v8355_v55 = vadd.f32 %v8323_v44, %v8287_v33  ;;  %8521 = vst.msk [vmem:[%s13388_s25 + $0x18] sm:$0xff] %vm548_vm0, %v8489_v35 }
 0x417   : > { %8519 = vst.msk [vmem:[%s13388_s25 + $0x8] sm:$0xff] %vm548_vm0, %v8487_v31  ;;  %v8551_v12 = vsel %vm548_vm0, %v8487_v31, 0.0  ;;  %v8422_v39 = vadd.f32 %v8390_v53, %v8354_v37  ;;  %v7670_v20 = vrot.slane %v10051_v18, 7  ;;  %v7778_v11 = vrot.slane %v10051_v18, 1 }
 0x418   : > { %8518 = vst.msk [vmem:[%s13388_s25] sm:$0xff] %vm548_vm0, %v8486_v61  ;;  %v8550_v27 = vsel %vm548_vm0, %v8486_v61, 0.0  ;;  %v8054_v25 = vmul.f32 %v13210_v32, %v7748_v46  ;;  %v8055_v49 = vmul.f32 %v13210_v32, %v7668_v10  ;;  %v8423_v50 = vadd.f32 %v8391_v4, %v8355_v55 }
 0x419   : > { %v8552_v26 = vadd.f32 %v8551_v12, %v8550_v27  ;;  %v13480_v14 = vmul.f32 %v13395_v51, %v13172_v36  ;;  %v8458_v44 = vadd.f32 %v13364_v3, %v8422_v39  ;;  %v7669_v13 = vrot.slane %v13459_v16, 7 }
 0x41a   : > { %v7777_v45 = vrot.slane %v13459_v16, 1  ;;  %v13486_v1 = vmul.f32 %v13186_v24, %v7776_v29  ;;  %v8555_v46 = vsel %vm548_vm0, %v8489_v35, 0.0  ;;  %v7919_v10 = vmul.f32 %v10051_v18, %v13162_v48 }
 0x41b   : > { %v8554_v56 = vadd.f32 %v8553_v63, %v8552_v26  ;;  %v8490_v51 = vmul.f32 %v8458_v44, %v14832_v62  ;;  %v7857_v7 = vsel %vm4120_vm2, %v7778_v11, 0.0  ;;  %v7671_v5 = vsel %vm4011_vm3, %v7669_v13, %v7670_v20 }
 0x41c   : > { %v7749_v53 = vsel %vm4011_vm3, 0.0, %v7669_v13  ;;  %v7779_v63 = vsel %vm4120_vm2, %v7777_v45, %v7778_v11  ;;  %v7883_v42 = vmul.f32 %v13191_v40, %v7671_v5  ;;  %v8459_v52 = vadd.f32 %v13364_v3, %v8423_v50  ;;  %v14833_v13 = vld [vmem:[#allocation90_spill] sm:$0xff] }
 0x41d   : > { %v8556_v54 = vadd.f32 %v8555_v46, %v8554_v56  ;;  %v7882_v29 = vmul.f32 %v13191_v40, %v7749_v53  ;;  %8522 = vst.msk [vmem:[%s13388_s25 + $0x20] sm:$0xff] %vm548_vm0, %v8490_v51  ;;  %v8557_v31 = vsel %vm548_vm0, %v8490_v51, 0.0  ;;  %v13504_v33 = vmul.f32 %v10051_v18, %v13172_v36 }
 0x41e   : > { %v7918_v21 = vmul.f32 %v13459_v16, %v13162_v48  ;;  %v7987_v57 = vmul.f32 %v13167_v6, %v7857_v7  ;;  %v8325_v61 = vmul.f32 %v10051_v18, %v13243_v22  ;;  %v7951_v37 = vadd.f32 %v7919_v10, %v7883_v42  ;;  %v13534_v42 = vpop.f32.mrb[34].mxu1 }
 0x41f   : > { %v8558_v35 = vadd.f32 %v8557_v31, %v8556_v54  ;;  %v7986_v4 = vmul.f32 %v13167_v6, %v7779_v63  ;;  %v8153_v55 = vadd.f32 %v13328_v41, %v8085_v19  ;;  %v8220_v27 = vadd.f32 %v13405_v38, %v8152_v9  ;;  %v14834_v9 = vld [vmem:[#allocation57_spill] sm:$0xff] }
 0x420   : > { %v7950_v12 = vadd.f32 %v7918_v21, %v7882_v29  ;;  %v13516_v39 = vmul.f32 %v13186_v24, %v7857_v7  ;;  %v8019_v20 = vadd.f32 %v7987_v57, %v7951_v37  ;;  %v8256_v11 = vmul.f32 %v13288_v15, %v7749_v53 }
 0x421   : > { %v8257_v26 = vmul.f32 %v13288_v15, %v7671_v5  ;;  %v8221_v50 = vadd.f32 %v13359_v59, %v8153_v55  ;;  %v8324_v44 = vmul.f32 %v13459_v16, %v13243_v22  ;;  %v8491_v45 = vmul.f32 %v8459_v52, %v14833_v13 }
 0x422   : > { %v8018_v18 = vadd.f32 %v7986_v4, %v7950_v12  ;;  %v8087_v41 = vadd.f32 %v8055_v49, %v8019_v20  ;;  %v8288_v19 = vadd.f32 %v8256_v11, %v8220_v27  ;;  %v10053_v38 = vadd.f32 %v12921_v34, %v13131_v58 }
 0x423   : > { %v13528_v56 = vadd.f32 %v13131_v58, %v14834_v9  ;;  %v8289_v10 = vadd.f32 %v8257_v26, %v8221_v50  ;;  %v8392_v62 = vmul.f32 %v13270_v0, %v7779_v63  ;;  %8523 = vst.msk [vmem:[%s13388_s25 + $0x28] sm:$0xff] %vm548_vm0, %v8491_v45  ;;  %v8559_v59 = vsel %vm548_vm0, %v8491_v45, 0.0  ;;  %v14836_v50 = vld [vmem:[#allocation87_spill] sm:$0xff] }
 0x424   : > { %v8086_v46 = vadd.f32 %v8054_v25, %v8018_v18  ;;  %v8356_v51 = vadd.f32 %v8324_v44, %v8288_v19  ;;  %v8560_v54 = vadd.f32 %v8559_v59, %v8558_v35  ;;  %v7673_v29 = vrot.slane %v10053_v38, 7 }
 0x425   : > { %v7781_v49 = vrot.slane %v10053_v38, 1  ;;  %v8393_v34 = vmul.f32 %v13270_v0, %v7857_v7  ;;  %v8056_v52 = vmul.f32 %v13210_v32, %v7749_v53  ;;  %v8057_v31 = vmul.f32 %v13210_v32, %v7671_v5  ;;  %v14835_v53 = vld [vmem:[#allocation75_spill] sm:$0xff] }
 0x426   : > { %v8357_v25 = vadd.f32 %v8325_v61, %v8289_v10  ;;  %v13541_v21 = vmul.f32 %v13459_v16, %v13172_v36  ;;  %v8424_v57 = vadd.f32 %v8392_v62, %v8356_v51  ;;  %v7672_v37 = vrot.slane %v13528_v56, 7 }
 0x427   : > { %v7780_v35 = vrot.slane %v13528_v56, 1  ;;  %v13546_v12 = vmul.f32 %v13186_v24, %v7779_v63  ;;  %v7858_v7 = vsel %vm4120_vm2, %v7781_v49, 0.0  ;;  %v13551_v55 = vadd.f32 %v14835_v53, %v13131_v58  ;;  %v14837_v53 = vld [vmem:[#allocation18_spill] sm:$0xff] }
 0x428   : > { %v8425_v4 = vadd.f32 %v8393_v34, %v8357_v25  ;;  %v8460_v5 = vadd.f32 %v13364_v3, %v8424_v57  ;;  %v7674_v16 = vsel %vm4011_vm3, %v7672_v37, %v7673_v29  ;;  %v7750_v61 = vsel %vm4011_vm3, 0.0, %v7672_v37 }
 0x429   : > { %v7782_v27 = vsel %vm4120_vm2, %v7780_v35, %v7781_v49  ;;  %v7921_v20 = vmul.f32 %v10053_v38, %v13162_v48  ;;  %v7884_v63 = vmul.f32 %v13191_v40, %v7750_v61  ;;  %v7885_v11 = vmul.f32 %v13191_v40, %v7674_v16 }
 0x42a   : > { %v7920_v26 = vmul.f32 %v13528_v56, %v13162_v48  ;;  %v8461_v18 = vadd.f32 %v13364_v3, %v8425_v4  ;;  %v8492_v44 = vmul.f32 %v8460_v5, %v14836_v50  ;;  %v7989_v13 = vmul.f32 %v13167_v6, %v7858_v7 }
 0x42b   : > { %v13566_v45 = vmul.f32 %v10053_v38, %v13172_v36  ;;  %v7953_v9 = vadd.f32 %v7921_v20, %v7885_v11  ;;  %v7988_v10 = vmul.f32 %v13167_v6, %v7782_v27  ;;  %v8154_v62 = vadd.f32 %v13480_v14, %v8086_v46 }
 0x42c   : > { %v7952_v19 = vadd.f32 %v7920_v26, %v7884_v63  ;;  %8524 = vst.msk [vmem:[%s13388_s25 + $0x30] sm:$0xff] %vm548_vm0, %v8492_v44  ;;  %v8561_v59 = vsel %vm548_vm0, %v8492_v44, 0.0  ;;  %v8327_v51 = vmul.f32 %v10053_v38, %v13243_v22  ;;  %v8155_v29 = vadd.f32 %v13433_v2, %v8087_v41  ;;  %v14838_v44 = vld [vmem:[#allocation73_spill] sm:$0xff] }
 0x42d   : > { %v8258_v49 = vmul.f32 %v13288_v15, %v7750_v61  ;;  %v8562_v34 = vadd.f32 %v8561_v59, %v8560_v54  ;;  %v8021_v57 = vadd.f32 %v7989_v13, %v7953_v9  ;;  %v8222_v37 = vadd.f32 %v13486_v1, %v8154_v62  ;;  %v13603_v9 = vpop.f32.mrb[35].mxu1 }
 0x42e   : > { %v8020_v25 = vadd.f32 %v7988_v10, %v7952_v19  ;;  %v13578_v35 = vmul.f32 %v13186_v24, %v7858_v7  ;;  %v8223_v14 = vadd.f32 %v13466_v47, %v8155_v29  ;;  %v8259_v46 = vmul.f32 %v13288_v15, %v7674_v16 }
 0x42f   : > { %v8326_v38 = vmul.f32 %v13528_v56, %v13243_v22  ;;  %v8089_v2 = vadd.f32 %v8057_v31, %v8021_v57  ;;  %v8290_v41 = vadd.f32 %v8258_v49, %v8222_v37  ;;  %v8493_v54 = vmul.f32 %v8461_v18, %v14837_v53 }
 0x430   : > { %v8088_v4 = vadd.f32 %v8056_v52, %v8020_v25  ;;  %v8395_v5 = vmul.f32 %v13270_v0, %v7858_v7  ;;  %v8058_v20 = vmul.f32 %v13210_v32, %v7750_v61  ;;  %v8059_v1 = vmul.f32 %v13210_v32, %v7674_v16 }
 0x431   : > { %v8291_v63 = vadd.f32 %v8259_v46, %v8223_v14  ;;  %v8358_v11 = vadd.f32 %v8326_v38, %v8290_v41  ;;  %v8394_v47 = vmul.f32 %v13270_v0, %v7782_v27  ;;  %8525 = vst.msk [vmem:[%s13388_s25 + $0x38] sm:$0xff] %vm548_vm0, %v8493_v54  ;;  %v8563_v26 = vsel %vm548_vm0, %v8493_v54, 0.0  ;;  %v14839_v46 = vld [vmem:[#allocation24_spill] sm:$0xff] }
 0x432   : > { %v7784_v52 = vrot.slane %v13551_v55, 1  ;;  %v8564_v50 = vadd.f32 %v8563_v26, %v8562_v34  ;;  %v7676_v18 = vrot.slane %v13551_v55, 7  ;;  %v10056_v7 = vadd.f32 %v13131_v58, %v14838_v44  ;;  %v14840_v44 = vld [vmem:[#allocation100_spill] sm:$0xff] }
 0x433   : > { %v8359_v31 = vadd.f32 %v8327_v51, %v8291_v63  ;;  %v8126_v16 = vmul.f32 %v13528_v56, %v13172_v36  ;;  %v13599_v61 = vmul.f32 %v13186_v24, %v7782_v27  ;;  %v8426_v13 = vadd.f32 %v8394_v47, %v8358_v11 }
 0x434   : > { %v7923_v19 = vmul.f32 %v13551_v55, %v13162_v48  ;;  %v13607_v62 = vmul.f32 %v13551_v55, %v13172_v36  ;;  %v7675_v59 = vrot.slane %v10056_v7, 7  ;;  %v7783_v51 = vrot.slane %v10056_v7, 1 }
 0x435   : > { %v8427_v10 = vadd.f32 %v8395_v5, %v8359_v31  ;;  %v8462_v29 = vadd.f32 %v13364_v3, %v8426_v13  ;;  %v7859_v56 = vsel %vm4120_vm2, %v7784_v52, 0.0  ;;  %v8156_v27 = vadd.f32 %v13541_v21, %v8088_v4 }
 0x436   : > { %v8157_v49 = vadd.f32 %v13504_v33, %v8089_v2  ;;  %v7677_v34 = vsel %vm4011_vm3, %v7675_v59, %v7676_v18  ;;  %v7751_v25 = vsel %vm4011_vm3, 0.0, %v7675_v59  ;;  %v7785_v57 = vsel %vm4120_vm2, %v7783_v51, %v7784_v52  ;;  %v14842_v51 = vld [vmem:[#allocation89_spill] sm:$0xff] }
 0x437   : > { %v7922_v37 = vmul.f32 %v10056_v7, %v13162_v48  ;;  %v8463_v14 = vadd.f32 %v13364_v3, %v8427_v10  ;;  %v8494_v38 = vmul.f32 %v8462_v29, %v14839_v46  ;;  %v7886_v41 = vmul.f32 %v13191_v40, %v7751_v25 }
 0x438   : > { %v7887_v53 = vmul.f32 %v13191_v40, %v7677_v34  ;;  %v7991_v21 = vmul.f32 %v13167_v6, %v7859_v56  ;;  %v8329_v33 = vmul.f32 %v13551_v55, %v13243_v22  ;;  %v7990_v4 = vmul.f32 %v13167_v6, %v7785_v57 }
 0x439   : > { %v8224_v2 = vadd.f32 %v13546_v12, %v8156_v27  ;;  %8526 = vst.msk [vmem:[%s13388_s25 + $0x40] sm:$0xff] %vm548_vm0, %v8494_v38  ;;  %v8565_v54 = vsel %vm548_vm0, %v8494_v38, 0.0  ;;  %v7954_v5 = vadd.f32 %v7922_v37, %v7886_v41  ;;  %v8225_v11 = vadd.f32 %v13516_v39, %v8157_v49 }
 0x43a   : > { %v7955_v63 = vadd.f32 %v7923_v19, %v7887_v53  ;;  %v8566_v47 = vadd.f32 %v8565_v54, %v8564_v50  ;;  %v13631_v26 = vmul.f32 %v13186_v24, %v7859_v56  ;;  %v8260_v52 = vmul.f32 %v13288_v15, %v7751_v25  ;;  %v14841_v19 = vld [vmem:[#allocation91_spill] sm:$0xff] }
 0x43b   : > { %v8261_v55 = vmul.f32 %v13288_v15, %v7677_v34  ;;  %v8022_v31 = vadd.f32 %v7990_v4, %v7954_v5  ;;  %v8328_v12 = vmul.f32 %v10056_v7, %v13243_v22  ;;  %v8495_v13 = vmul.f32 %v8463_v14, %v14840_v44 }
 0x43c   : > { %v8023_v18 = vadd.f32 %v7991_v21, %v7955_v63  ;;  %v8292_v10 = vadd.f32 %v8260_v52, %v8224_v2  ;;  %v10057_v39 = vadd.f32 %v14841_v19, %v13131_v58  ;;  %v10058_v50 = vadd.f32 %v13131_v58, %v14842_v51 }
 0x43d   : > { %v8293_v59 = vadd.f32 %v8261_v55, %v8225_v11  ;;  %v8397_v29 = vmul.f32 %v13270_v0, %v7859_v56  ;;  %v8090_v27 = vadd.f32 %v8058_v20, %v8022_v31  ;;  %8527 = vst.msk [vmem:[%s13388_s25 + $0x48] sm:$0xff] %vm548_vm0, %v8495_v13  ;;  %v8567_v37 = vsel %vm548_vm0, %v8495_v13, 0.0  ;;  %v14843_v11 = vld [vmem:[#allocation105_spill] sm:$0xff] }
 0x43e   : > { %v8091_v49 = vadd.f32 %v8059_v1, %v8023_v18  ;;  %v8360_v46 = vadd.f32 %v8328_v12, %v8292_v10  ;;  %v8396_v14 = vmul.f32 %v13270_v0, %v7785_v57  ;;  %v8568_v41 = vadd.f32 %v8567_v37, %v8566_v47  ;;  %v14844_v18 = vld [vmem:[#allocation31_spill] sm:$0xff] }
 0x43f   : > { %v8361_v38 = vadd.f32 %v8329_v33, %v8293_v59  ;;  %v8060_v53 = vmul.f32 %v13210_v32, %v7751_v25  ;;  %v13648_v21 = vmul.f32 %v10056_v7, %v13172_v36  ;;  %v7679_v4 = vrot.slane %v10057_v39, 7 }
 0x440   : > { %v7787_v2 = vrot.slane %v10057_v39, 1  ;;  %v8428_v54 = vadd.f32 %v8396_v14, %v8360_v46  ;;  %v7678_v20 = vrot.slane %v10058_v50, 7  ;;  %v7786_v1 = vrot.slane %v10058_v50, 1 }
 0x441   : > { %v8429_v56 = vadd.f32 %v8397_v29, %v8361_v38  ;;  %v8061_v5 = vmul.f32 %v13210_v32, %v7677_v34  ;;  %v13652_v63 = vmul.f32 %v13186_v24, %v7785_v57  ;;  %v8158_v33 = vadd.f32 %v8126_v16, %v8090_v27 }
 0x442   : > { %v13656_v47 = vadd.f32 %v14843_v11, %v13131_v58  ;;  %v8464_v25 = vadd.f32 %v13364_v3, %v8428_v54  ;;  %v7860_v7 = vsel %vm4120_vm2, %v7787_v2, 0.0  ;;  %v7925_v52 = vmul.f32 %v10057_v39, %v13162_v48 }
 0x443   : > { %v13662_v55 = vmul.f32 %v10057_v39, %v13172_v36  ;;  %v8331_v34 = vmul.f32 %v10057_v39, %v13243_v22  ;;  %v7680_v57 = vsel %vm4011_vm3, %v7678_v20, %v7679_v4  ;;  %v7752_v16 = vsel %vm4011_vm3, 0.0, %v7678_v20 }
 0x444   : > { %v7788_v31 = vsel %vm4120_vm2, %v7786_v1, %v7787_v2  ;;  %v8496_v12 = vmul.f32 %v8464_v25, %v14844_v18  ;;  %v7888_v44 = vmul.f32 %v13191_v40, %v7752_v16  ;;  %v7889_v13 = vmul.f32 %v13191_v40, %v7680_v57 }
 0x445   : > { %v7924_v10 = vmul.f32 %v10058_v50, %v13162_v48  ;;  %v8465_v59 = vadd.f32 %v13364_v3, %v8429_v56  ;;  %v7993_v19 = vmul.f32 %v13167_v6, %v7860_v7  ;;  %v7992_v39 = vmul.f32 %v13167_v6, %v7788_v31 }
 0x446   : > { %v8159_v51 = vadd.f32 %v13566_v45, %v8091_v49  ;;  %8528 = vst.msk [vmem:[%s13388_s25 + $0x50] sm:$0xff] %vm548_vm0, %v8496_v12  ;;  %v8569_v29 = vsel %vm548_vm0, %v8496_v12, 0.0  ;;  %v7957_v37 = vadd.f32 %v7925_v52, %v7889_v13  ;;  %v8226_v46 = vadd.f32 %v13599_v61, %v8158_v33 }
 0x447   : > { %v7956_v27 = vadd.f32 %v7924_v10, %v7888_v44  ;;  %v8570_v38 = vadd.f32 %v8569_v29, %v8568_v41  ;;  %v8262_v4 = vmul.f32 %v13288_v15, %v7752_v16  ;;  %v8263_v2 = vmul.f32 %v13288_v15, %v7680_v57  ;;  %v14845_v41 = vld [vmem:[#allocation38_spill] sm:$0xff] }
 0x448   : > { %v8227_v14 = vadd.f32 %v13578_v35, %v8159_v51  ;;  %v13684_v54 = vmul.f32 %v13186_v24, %v7860_v7  ;;  %v8025_v49 = vadd.f32 %v7993_v19, %v7957_v37  ;;  %v13687_v56 = vmul.f32 %v10058_v50, %v13172_v36 }
 0x449   : > { %v8024_v45 = vadd.f32 %v7992_v39, %v7956_v27  ;;  %v8294_v20 = vadd.f32 %v8262_v4, %v8226_v46  ;;  %v8330_v61 = vmul.f32 %v10058_v50, %v13243_v22  ;;  %v8497_v33 = vmul.f32 %v8465_v59, %v14845_v41  ;;  %v14846_v59 = vld [vmem:[#allocation104_spill] sm:$0xff] }
 0x44a   : > { %v8295_v1 = vadd.f32 %v8263_v2, %v8227_v14  ;;  %v8399_v35 = vmul.f32 %v13270_v0, %v7860_v7  ;;  %v8093_v25 = vadd.f32 %v8061_v5, %v8025_v49  ;;  %v8398_v52 = vmul.f32 %v13270_v0, %v7788_v31 }
 0x44b   : > { %v8092_v11 = vadd.f32 %v8060_v53, %v8024_v45  ;;  %v8362_v18 = vadd.f32 %v8330_v61, %v8294_v20  ;;  %8529 = vst.msk [vmem:[%s13388_s25 + $0x58] sm:$0xff] %vm548_vm0, %v8497_v33  ;;  %v8571_v44 = vsel %vm548_vm0, %v8497_v33, 0.0  ;;  %v7790_v13 = vrot.slane %v13656_v47, 1  ;;  %v14847_v45 = vld [vmem:[#allocation101_spill] sm:$0xff] }
 0x44c   : > { %v8363_v12 = vadd.f32 %v8331_v34, %v8295_v1  ;;  %v8062_v10 = vmul.f32 %v13210_v32, %v7752_v16  ;;  %v8572_v19 = vadd.f32 %v8571_v44, %v8570_v38  ;;  %v7682_v50 = vrot.slane %v13656_v47, 7 }
 0x44d   : > { %v10060_v7 = vadd.f32 %v13131_v58, %v14846_v59  ;;  %v8063_v53 = vmul.f32 %v13210_v32, %v7680_v57  ;;  %v13703_v5 = vmul.f32 %v13186_v24, %v7788_v31  ;;  %v8430_v34 = vadd.f32 %v8398_v52, %v8362_v18 }
 0x44e   : > { %v8431_v39 = vadd.f32 %v8399_v35, %v8363_v12  ;;  %v7927_v51 = vmul.f32 %v13656_v47, %v13162_v48  ;;  %v13709_v29 = vmul.f32 %v13656_v47, %v13172_v36  ;;  %v7861_v58 = vsel %vm4120_vm2, %v7790_v13, 0.0 }
 0x44f   : > { %v7681_v16 = vrot.slane %v10060_v7, 7  ;;  %v7789_v27 = vrot.slane %v10060_v7, 1  ;;  %v8466_v37 = vadd.f32 %v13364_v3, %v8430_v34  ;;  %v7926_v57 = vmul.f32 %v10060_v7, %v13162_v48 }
 0x450   : > { %v8160_v31 = vadd.f32 %v13648_v21, %v8092_v11  ;;  %v8161_v4 = vadd.f32 %v13607_v62, %v8093_v25  ;;  %v8467_v2 = vadd.f32 %v13364_v3, %v8431_v39  ;;  %v7995_v61 = vmul.f32 %v13167_v6, %v7861_v58 }
 0x451   : > { %v7683_v46 = vsel %vm4011_vm3, %v7681_v16, %v7682_v50  ;;  %v7753_v38 = vsel %vm4011_vm3, 0.0, %v7681_v16  ;;  %v7791_v14 = vsel %vm4120_vm2, %v7789_v27, %v7790_v13  ;;  %v8498_v49 = vmul.f32 %v8466_v37, %v14847_v45  ;;  %v14848_v50 = vld [vmem:[#allocation109_spill] sm:$0xff]  ;;  %v14850_v16 = vld [vmem:[#allocation14_spill] sm:$0xff] }
 0x452   : > { %v7890_v20 = vmul.f32 %v13191_v40, %v7753_v38  ;;  %v7891_v1 = vmul.f32 %v13191_v40, %v7683_v46  ;;  %v8333_v21 = vmul.f32 %v13656_v47, %v13243_v22  ;;  %v7994_v41 = vmul.f32 %v13167_v6, %v7791_v14 }
 0x453   : > { %v8228_v33 = vadd.f32 %v13652_v63, %v8160_v31  ;;  %8530 = vst.msk [vmem:[%s13388_s25 + $0x60] sm:$0xff] %vm548_vm0, %v8498_v49  ;;  %v8573_v62 = vsel %vm548_vm0, %v8498_v49, 0.0  ;;  %v8229_v25 = vadd.f32 %v13631_v26, %v8161_v4  ;;  %v13733_v18 = vmul.f32 %v13186_v24, %v7861_v58  ;;  %v13742_v26 = vld [vmem:[%s14266_s7 + $0x1] ss:$0 sm:$0xff] }
 0x454   : > { %v7958_v35 = vadd.f32 %v7926_v57, %v7890_v20  ;;  %v7959_v11 = vadd.f32 %v7927_v51, %v7891_v1  ;;  %v8574_v52 = vadd.f32 %v8573_v62, %v8572_v19  ;;  %v8264_v12 = vmul.f32 %v13288_v15, %v7753_v38  ;;  %v14849_v19 = vld [vmem:[#allocation10_spill] sm:$0xff] }
 0x455   : > { %v8265_v47 = vmul.f32 %v13288_v15, %v7683_v46  ;;  %v8332_v63 = vmul.f32 %v10060_v7, %v13243_v22  ;;  %v8499_v59 = vmul.f32 %v8467_v2, %v14848_v50  ;;  %v10061_v51 = vadd.f32 %v13742_v26, %v14849_v19 }
 0x456   : > { %v8026_v44 = vadd.f32 %v7994_v41, %v7958_v35  ;;  %v8027_v13 = vadd.f32 %v7995_v61, %v7959_v11  ;;  %v8296_v34 = vadd.f32 %v8264_v12, %v8228_v33  ;;  %v10062_v27 = vadd.f32 %v13742_v26, %v14850_v16 }
 0x457   : > { %v8297_v39 = vadd.f32 %v8265_v47, %v8229_v25  ;;  %v8401_v37 = vmul.f32 %v13270_v0, %v7861_v58  ;;  %8531 = vst.msk [vmem:[%s13388_s25 + $0x68] sm:$0xff] %vm548_vm0, %v8499_v59  ;;  %v8575_v4 = vsel %vm548_vm0, %v8499_v59, 0.0  ;;  %v8400_v49 = vmul.f32 %v13270_v0, %v7791_v14  ;;  %v14851_v25 = vld [vmem:[#allocation15_spill] sm:$0xff] }
 0x458   : > { %v8094_v57 = vadd.f32 %v8062_v10, %v8026_v44  ;;  %v8095_v31 = vadd.f32 %v8063_v53, %v8027_v13  ;;  %v8364_v2 = vadd.f32 %v8332_v63, %v8296_v34  ;;  %v8576_v20 = vadd.f32 %v8575_v4, %v8574_v52  ;;  %v14852_v13 = vld [vmem:[#allocation108_spill] sm:$0xff] }
 0x459   : > { %v8365_v45 = vadd.f32 %v8333_v21, %v8297_v39  ;;  %v8064_v1 = vmul.f32 %v13210_v32, %v7753_v38  ;;  %v13755_v61 = vmul.f32 %v10060_v7, %v13172_v36  ;;  %v7685_v41 = vrot.slane %v10061_v51, 7 }
 0x45a   : > { %v7793_v33 = vrot.slane %v10061_v51, 1  ;;  %v8432_v62 = vadd.f32 %v8400_v49, %v8364_v2  ;;  %v7684_v10 = vrot.slane %v10062_v27, 7  ;;  %v7792_v53 = vrot.slane %v10062_v27, 1 }
 0x45b   : > { %v8433_v58 = vadd.f32 %v8401_v37, %v8365_v45  ;;  %v8065_v35 = vmul.f32 %v13210_v32, %v7683_v46  ;;  %v13759_v11 = vmul.f32 %v13186_v24, %v7791_v14  ;;  %v8162_v21 = vadd.f32 %v13687_v56, %v8094_v57 }
 0x45c   : > { %v13764_v52 = vadd.f32 %v13742_v26, %v14851_v25  ;;  %v8468_v7 = vadd.f32 %v13364_v3, %v8432_v62  ;;  %v7862_v38 = vsel %vm4120_vm2, %v7793_v33, 0.0  ;;  %v7929_v12 = vmul.f32 %v10061_v51, %v13162_v48 }
 0x45d   : > { %v13770_v47 = vmul.f32 %v10061_v51, %v13172_v36  ;;  %v8335_v46 = vmul.f32 %v10061_v51, %v13243_v22  ;;  %v7686_v14 = vsel %vm4011_vm3, %v7684_v10, %v7685_v41  ;;  %v7754_v56 = vsel %vm4011_vm3, 0.0, %v7684_v10 }
 0x45e   : > { %v7794_v44 = vsel %vm4120_vm2, %v7792_v53, %v7793_v33  ;;  %v8500_v63 = vmul.f32 %v8468_v7, %v14852_v13  ;;  %v7892_v50 = vmul.f32 %v13191_v40, %v7754_v56  ;;  %v7893_v59 = vmul.f32 %v13191_v40, %v7686_v14 }
 0x45f   : > { %v7928_v34 = vmul.f32 %v10062_v27, %v13162_v48  ;;  %v8469_v39 = vadd.f32 %v13364_v3, %v8433_v58  ;;  %v7997_v19 = vmul.f32 %v13167_v6, %v7862_v38  ;;  %v7996_v51 = vmul.f32 %v13167_v6, %v7794_v44 }
 0x460   : > { %v8163_v16 = vadd.f32 %v13662_v55, %v8095_v31  ;;  %8532 = vst.msk [vmem:[%s13388_s25 + $0x70] sm:$0xff] %vm548_vm0, %v8500_v63  ;;  %v8577_v37 = vsel %vm548_vm0, %v8500_v63, 0.0  ;;  %v7961_v4 = vadd.f32 %v7929_v12, %v7893_v59  ;;  %v8230_v2 = vadd.f32 %v13703_v5, %v8162_v21 }
 0x461   : > { %v7960_v57 = vadd.f32 %v7928_v34, %v7892_v50  ;;  %v8578_v45 = vadd.f32 %v8577_v37, %v8576_v20  ;;  %v8266_v41 = vmul.f32 %v13288_v15, %v7754_v56  ;;  %v8267_v33 = vmul.f32 %v13288_v15, %v7686_v14  ;;  %v14853_v20 = vld [vmem:[#allocation42_spill] sm:$0xff] }
 0x462   : > { %v8231_v49 = vadd.f32 %v13684_v54, %v8163_v16  ;;  %v13792_v62 = vmul.f32 %v13186_v24, %v7862_v38  ;;  %v8029_v31 = vadd.f32 %v7997_v19, %v7961_v4  ;;  %v13795_v58 = vmul.f32 %v10062_v27, %v13172_v36 }
 0x463   : > { %v8028_v55 = vadd.f32 %v7996_v51, %v7960_v57  ;;  %v8298_v10 = vadd.f32 %v8266_v41, %v8230_v2  ;;  %v8334_v5 = vmul.f32 %v10062_v27, %v13243_v22  ;;  %v8501_v21 = vmul.f32 %v8469_v39, %v14853_v20  ;;  %v14854_v39 = vld [vmem:[#allocation21_spill] sm:$0xff] }
 0x464   : > { %v8299_v53 = vadd.f32 %v8267_v33, %v8231_v49  ;;  %v8403_v54 = vmul.f32 %v13270_v0, %v7862_v38  ;;  %v8097_v7 = vadd.f32 %v8065_v35, %v8029_v31  ;;  %v8402_v12 = vmul.f32 %v13270_v0, %v7794_v44 }
 0x465   : > { %v8096_v25 = vadd.f32 %v8064_v1, %v8028_v55  ;;  %v8366_v13 = vadd.f32 %v8334_v5, %v8298_v10  ;;  %8533 = vst.msk [vmem:[%s13388_s25 + $0x78] sm:$0xff] %vm548_vm0, %v8501_v21  ;;  %v8579_v50 = vsel %vm548_vm0, %v8501_v21, 0.0  ;;  %v7796_v59 = vrot.slane %v13764_v52, 1  ;;  %v14855_v55 = vld [vmem:[#allocation49_spill] sm:$0xff] }
 0x466   : > { %v8367_v63 = vadd.f32 %v8335_v46, %v8299_v53  ;;  %v8066_v34 = vmul.f32 %v13210_v32, %v7754_v56  ;;  %v8580_v19 = vadd.f32 %v8579_v50, %v8578_v45  ;;  %v7688_v27 = vrot.slane %v13764_v52, 7 }
 0x467   : > { %v10064_v38 = vadd.f32 %v13742_v26, %v14854_v39  ;;  %v8067_v1 = vmul.f32 %v13210_v32, %v7686_v14  ;;  %v13811_v0 = vmul.f32 %v13186_v24, %v7794_v44  ;;  %v8434_v35 = vadd.f32 %v8402_v12, %v8366_v13 }
 0x468   : > { %v8435_v46 = vadd.f32 %v8403_v54, %v8367_v63  ;;  %v7931_v51 = vmul.f32 %v13764_v52, %v13162_v48  ;;  %v13817_v16 = vmul.f32 %v13764_v52, %v13172_v36  ;;  %v7863_v4 = vsel %vm4120_vm2, %v7796_v59, 0.0 }
 0x469   : > { %v7687_v56 = vrot.slane %v10064_v38, 7  ;;  %v7795_v37 = vrot.slane %v10064_v38, 1  ;;  %v8470_v57 = vadd.f32 %v13364_v3, %v8434_v35  ;;  %v7930_v14 = vmul.f32 %v10064_v38, %v13162_v48 }
 0x46a   : > { %v8164_v44 = vadd.f32 %v13755_v61, %v8096_v25  ;;  %v8165_v41 = vadd.f32 %v13709_v29, %v8097_v7  ;;  %v8471_v33 = vadd.f32 %v13364_v3, %v8435_v46  ;;  %v7999_v5 = vmul.f32 %v13167_v6, %v7863_v4 }
 0x46b   : > { %v7689_v2 = vsel %vm4011_vm3, %v7687_v56, %v7688_v27  ;;  %v7755_v45 = vsel %vm4011_vm3, 0.0, %v7687_v56  ;;  %v7797_v49 = vsel %vm4120_vm2, %v7795_v37, %v7796_v59  ;;  %v8502_v31 = vmul.f32 %v8470_v57, %v14855_v55  ;;  %v14856_v27 = vld [vmem:[#allocation60_spill] sm:$0xff]  ;;  %v13854_v37 = vld [vmem:[%s14265_s6 + $0x8] ss:$0 sm:$0xff] }
 0x46c   : > { %v7894_v10 = vmul.f32 %v13191_v40, %v7755_v45  ;;  %v7895_v53 = vmul.f32 %v13191_v40, %v7689_v2  ;;  %v8337_v61 = vmul.f32 %v13764_v52, %v13243_v22  ;;  %v7998_v20 = vmul.f32 %v13167_v6, %v7797_v49 }
 0x46d   : > { %v8232_v21 = vadd.f32 %v13759_v11, %v8164_v44  ;;  %8534 = vst.msk [vmem:[%s13388_s25 + $0x80] sm:$0xff] %vm548_vm0, %v8502_v31  ;;  %v8581_v29 = vsel %vm548_vm0, %v8502_v31, 0.0  ;;  %v8233_v7 = vadd.f32 %v13733_v18, %v8165_v41  ;;  %v13841_v13 = vmul.f32 %v13186_v24, %v7863_v4 }
 0x46e   : > { %v7962_v54 = vadd.f32 %v7930_v14, %v7894_v10  ;;  %v7963_v25 = vadd.f32 %v7931_v51, %v7895_v53  ;;  %v8582_v12 = vadd.f32 %v8581_v29, %v8580_v19  ;;  %v8268_v63 = vmul.f32 %v13288_v15, %v7755_v45  ;;  %v14857_v51 = vld [vmem:[#allocation77_spill] sm:$0xff]  ;;  %v14858_v19 = vld [vmem:[#allocation76_spill] sm:$0xff] }
 0x46f   : > { %v8269_v52 = vmul.f32 %v13288_v15, %v7689_v2  ;;  %v8336_v11 = vmul.f32 %v10064_v38, %v13243_v22  ;;  %v8503_v39 = vmul.f32 %v8471_v33, %v14856_v27  ;;  %v10065_v18 = vadd.f32 %v13742_v26, %v14857_v51 }
 0x470   : > { %v8030_v50 = vadd.f32 %v7998_v20, %v7962_v54  ;;  %v8031_v59 = vadd.f32 %v7999_v5, %v7963_v25  ;;  %v8300_v35 = vadd.f32 %v8268_v63, %v8232_v21  ;;  %v10066_v56 = vadd.f32 %v13742_v26, %v14858_v19 }
 0x471   : > { %v8301_v46 = vadd.f32 %v8269_v52, %v8233_v7  ;;  %v8405_v57 = vmul.f32 %v13854_v37, %v7863_v4  ;;  %8535 = vst.msk [vmem:[%s13388_s25 + $0x88] sm:$0xff] %vm548_vm0, %v8503_v39  ;;  %v8583_v41 = vsel %vm548_vm0, %v8503_v39, 0.0  ;;  %v8404_v31 = vmul.f32 %v13854_v37, %v7797_v49  ;;  %v14859_v7 = vld [vmem:[#allocation85_spill] sm:$0xff] }
 0x472   : > { %v8098_v14 = vadd.f32 %v8066_v34, %v8030_v50  ;;  %v8099_v44 = vadd.f32 %v8067_v1, %v8031_v59  ;;  %v8368_v33 = vadd.f32 %v8336_v11, %v8300_v35  ;;  %v8584_v10 = vadd.f32 %v8583_v41, %v8582_v12  ;;  %v14860_v59 = vld [vmem:[#allocation68_spill] sm:$0xff] }
 0x473   : > { %v8369_v55 = vadd.f32 %v8337_v61, %v8301_v46  ;;  %v8068_v53 = vmul.f32 %v13210_v32, %v7755_v45  ;;  %v13863_v5 = vmul.f32 %v10064_v38, %v13172_v36  ;;  %v7691_v20 = vrot.slane %v10065_v18, 7 }
 0x474   : > { %v7799_v21 = vrot.slane %v10065_v18, 1  ;;  %v8436_v29 = vadd.f32 %v8404_v31, %v8368_v33  ;;  %v7690_v34 = vrot.slane %v10066_v56, 7  ;;  %v7798_v1 = vrot.slane %v10066_v56, 1 }
 0x475   : > { %v8437_v4 = vadd.f32 %v8405_v57, %v8369_v55  ;;  %v8069_v54 = vmul.f32 %v13210_v32, %v7689_v2  ;;  %v13867_v25 = vmul.f32 %v13186_v24, %v7797_v49  ;;  %v8166_v61 = vadd.f32 %v13795_v58, %v8098_v14 }
 0x476   : > { %v13872_v12 = vadd.f32 %v13742_v26, %v14859_v7  ;;  %v8472_v38 = vadd.f32 %v13364_v3, %v8436_v29  ;;  %v7864_v45 = vsel %vm4120_vm2, %v7799_v21, 0.0  ;;  %v7933_v63 = vmul.f32 %v10065_v18, %v13162_v48 }
 0x477   : > { %v13878_v52 = vmul.f32 %v10065_v18, %v13172_v36  ;;  %v8339_v2 = vmul.f32 %v10065_v18, %v13243_v22  ;;  %v7692_v49 = vsel %vm4011_vm3, %v7690_v34, %v7691_v20  ;;  %v7756_v58 = vsel %vm4011_vm3, 0.0, %v7690_v34 }
 0x478   : > { %v7800_v50 = vsel %vm4120_vm2, %v7798_v1, %v7799_v21  ;;  %v8504_v11 = vmul.f32 %v8472_v38, %v14860_v59  ;;  %v7896_v27 = vmul.f32 %v13191_v40, %v7756_v58  ;;  %v7897_v39 = vmul.f32 %v13191_v40, %v7692_v49 }
 0x479   : > { %v7932_v35 = vmul.f32 %v10066_v56, %v13162_v48  ;;  %v8473_v46 = vadd.f32 %v13364_v3, %v8437_v4  ;;  %v8001_v51 = vmul.f32 %v13167_v6, %v7864_v45  ;;  %v8000_v18 = vmul.f32 %v13167_v6, %v7800_v50 }
 0x47a   : > { %v8167_v19 = vadd.f32 %v13770_v47, %v8099_v44  ;;  %8536 = vst.msk [vmem:[%s13388_s25 + $0x90] sm:$0xff] %vm548_vm0, %v8504_v11  ;;  %v8585_v57 = vsel %vm548_vm0, %v8504_v11, 0.0  ;;  %v7965_v41 = vadd.f32 %v7933_v63, %v7897_v39  ;;  %v8234_v33 = vadd.f32 %v13811_v0, %v8166_v61 }
 0x47b   : > { %v7964_v14 = vadd.f32 %v7932_v35, %v7896_v27  ;;  %v8586_v55 = vadd.f32 %v8585_v57, %v8584_v10  ;;  %v8270_v20 = vmul.f32 %v13288_v15, %v7756_v58  ;;  %v8271_v3 = vmul.f32 %v13288_v15, %v7692_v49  ;;  %v14861_v10 = vld [vmem:[#allocation65_spill] sm:$0xff] }
 0x47c   : > { %v8235_v31 = vadd.f32 %v13792_v62, %v8167_v19  ;;  %v13900_v21 = vmul.f32 %v13186_v24, %v7864_v45  ;;  %v8033_v44 = vadd.f32 %v8001_v51, %v7965_v41  ;;  %v13903_v29 = vmul.f32 %v10066_v56, %v13172_v36 }
 0x47d   : > { %v8032_v47 = vadd.f32 %v8000_v18, %v7964_v14  ;;  %v8302_v4 = vadd.f32 %v8270_v20, %v8234_v33  ;;  %v8338_v0 = vmul.f32 %v10066_v56, %v13243_v22  ;;  %v8505_v1 = vmul.f32 %v8473_v46, %v14861_v10 }
 0x47e   : > { %v8303_v34 = vadd.f32 %v8271_v3, %v8235_v31  ;;  %v8407_v62 = vmul.f32 %v13854_v37, %v7864_v45  ;;  %v8101_v7 = vadd.f32 %v8069_v54, %v8033_v44  ;;  %v8406_v38 = vmul.f32 %v13854_v37, %v7800_v50  ;;  %v14862_v3 = vld [vmem:[#allocation83_spill] sm:$0xff] }
 0x47f   : > { %v8100_v61 = vadd.f32 %v8068_v53, %v8032_v47  ;;  %v8370_v63 = vadd.f32 %v8338_v0, %v8302_v4  ;;  %8537 = vst.msk [vmem:[%s13388_s25 + $0x98] sm:$0xff] %vm548_vm0, %v8505_v1  ;;  %v8587_v11 = vsel %vm548_vm0, %v8505_v1, 0.0  ;;  %v7802_v27 = vrot.slane %v13872_v12, 1 }
 0x480   : > { %v8371_v59 = vadd.f32 %v8339_v2, %v8303_v34  ;;  %v8070_v39 = vmul.f32 %v13210_v32, %v7756_v58  ;;  %v8588_v35 = vadd.f32 %v8587_v11, %v8586_v55  ;;  %v7694_v56 = vrot.slane %v13872_v12, 7 }
 0x481   : > { %v10068_v45 = vadd.f32 %v13742_v26, %v13350_v28  ;;  %v8071_v53 = vmul.f32 %v13210_v32, %v7692_v49  ;;  %v13919_v54 = vmul.f32 %v13186_v24, %v7800_v50  ;;  %v8438_v2 = vadd.f32 %v8406_v38, %v8370_v63  ;;  %v13930_v28 = vld [vmem:[%s14266_s7 + $0x3] ss:$0 sm:$0xff] }
 0x482   : > { %v8439_v46 = vadd.f32 %v8407_v62, %v8371_v59  ;;  %v7935_v51 = vmul.f32 %v13872_v12, %v13162_v48  ;;  %v13925_v18 = vmul.f32 %v13872_v12, %v13172_v36  ;;  %v7865_v50 = vsel %vm4120_vm2, %v7802_v27, 0.0 }
 0x483   : > { %v7693_v58 = vrot.slane %v10068_v45, 7  ;;  %v7801_v19 = vrot.slane %v10068_v45, 1  ;;  %v8474_v49 = vadd.f32 %v13930_v28, %v8438_v2  ;;  %v7934_v57 = vmul.f32 %v10068_v45, %v13162_v48 }
 0x484   : > { %v8168_v14 = vadd.f32 %v13863_v5, %v8100_v61  ;;  %v8169_v31 = vadd.f32 %v13817_v16, %v8101_v7  ;;  %v8475_v20 = vadd.f32 %v13930_v28, %v8439_v46  ;;  %v8003_v34 = vmul.f32 %v13167_v6, %v7865_v50 }
 0x485   : > { %v7695_v41 = vsel %vm4011_vm3, %v7693_v58, %v7694_v56  ;;  %v7757_v33 = vsel %vm4011_vm3, 0.0, %v7693_v58  ;;  %v7803_v55 = vsel %vm4120_vm2, %v7801_v19, %v7802_v27  ;;  %v8506_v47 = vmul.f32 %v8474_v49, %v14862_v3  ;;  %v14863_v27 = vld [vmem:[#allocation81_spill] sm:$0xff] }
 0x486   : > { %v7898_v44 = vmul.f32 %v13191_v40, %v7757_v33  ;;  %v7899_v4 = vmul.f32 %v13191_v40, %v7695_v41  ;;  %v8341_v5 = vmul.f32 %v13872_v12, %v13243_v22  ;;  %v8002_v0 = vmul.f32 %v13167_v6, %v7803_v55 }
 0x487   : > { %v8236_v10 = vadd.f32 %v13867_v25, %v8168_v14  ;;  %8538 = vst.msk [vmem:[%s13388_s25 + $0xa0] sm:$0xff] %vm548_vm0, %v8506_v47  ;;  %v8589_v16 = vsel %vm548_vm0, %v8506_v47, 0.0  ;;  %v8237_v61 = vadd.f32 %v13841_v13, %v8169_v31  ;;  %v13954_v38 = vmul.f32 %v13186_v24, %v7865_v50 }
 0x488   : > { %v7966_v1 = vadd.f32 %v7934_v57, %v7898_v44  ;;  %v7967_v62 = vadd.f32 %v7935_v51, %v7899_v4  ;;  %v8590_v7 = vadd.f32 %v8589_v16, %v8588_v35  ;;  %v8272_v63 = vmul.f32 %v13288_v15, %v7757_v33 }
 0x489   : > { %v8273_v12 = vmul.f32 %v13288_v15, %v7695_v41  ;;  %v8340_v25 = vmul.f32 %v10068_v45, %v13243_v22  ;;  %v8507_v56 = vmul.f32 %v8475_v20, %v14863_v27  ;;  %v13962_v13 = vadd.f32 %v13742_v26, %v13401_v17 }
 0x48a   : > { %v8034_v59 = vadd.f32 %v8002_v0, %v7966_v1  ;;  %v8035_v11 = vadd.f32 %v8003_v34, %v7967_v62  ;;  %v8304_v2 = vadd.f32 %v8272_v63, %v8236_v10  ;;  %v13966_v35 = vadd.f32 %v13742_v26, %v13423_v8  ;;  %v14864_v62 = vld [vmem:[#allocation97_spill] sm:$0xff] }
 0x48b   : > { %v8305_v46 = vadd.f32 %v8273_v12, %v8237_v61  ;;  %v8409_v51 = vmul.f32 %v13854_v37, %v7865_v50  ;;  %8539 = vst.msk [vmem:[%s13388_s25 + $0xa8] sm:$0xff] %vm548_vm0, %v8507_v56  ;;  %v8591_v49 = vsel %vm548_vm0, %v8507_v56, 0.0  ;;  %v8408_v31 = vmul.f32 %v13854_v37, %v7803_v55 }
 0x48c   : > { %v8102_v58 = vadd.f32 %v8070_v39, %v8034_v59  ;;  %v8103_v19 = vadd.f32 %v8071_v53, %v8035_v11  ;;  %v8372_v57 = vadd.f32 %v8340_v25, %v8304_v2  ;;  %v8592_v20 = vadd.f32 %v8591_v49, %v8590_v7 }
 0x48d   : > { %v8373_v14 = vadd.f32 %v8341_v5, %v8305_v46  ;;  %v8072_v17 = vmul.f32 %v13210_v32, %v7757_v33  ;;  %v13975_v3 = vmul.f32 %v10068_v45, %v13172_v36  ;;  %v7697_v8 = vrot.slane %v13962_v13, 7 }
 0x48e   : > { %v7805_v50 = vrot.slane %v13962_v13, 1  ;;  %v8440_v39 = vadd.f32 %v8408_v31, %v8372_v57  ;;  %v7696_v47 = vrot.slane %v13966_v35, 7  ;;  %v7804_v44 = vrot.slane %v13966_v35, 1 }
 0x48f   : > { %v8441_v53 = vadd.f32 %v8409_v51, %v8373_v14  ;;  %v8073_v4 = vmul.f32 %v13210_v32, %v7695_v41  ;;  %v13983_v34 = vmul.f32 %v13186_v24, %v7803_v55  ;;  %v8170_v33 = vadd.f32 %v13903_v29, %v8102_v58 }
 0x490   : > { %v10077_v45 = vadd.f32 %v13742_v26, %v13447_v43  ;;  %v8476_v5 = vadd.f32 %v13930_v28, %v8440_v39  ;;  %v7866_v0 = vsel %vm4120_vm2, %v7805_v50, 0.0  ;;  %v7937_v10 = vmul.f32 %v13962_v13, %v13162_v48 }
 0x491   : > { %v8343_v16 = vmul.f32 %v13962_v13, %v13243_v22  ;;  %v7698_v41 = vsel %vm4011_vm3, %v7696_v47, %v7697_v8  ;;  %v7758_v55 = vsel %vm4011_vm3, 0.0, %v7696_v47  ;;  %v13997_v29 = vsel %vm4120_vm2, %v7804_v44, %v7805_v50  ;;  %v14865_v8 = vld [vmem:[#allocation96_spill] sm:$0xff] }
 0x492   : > { %v7936_v43 = vmul.f32 %v13966_v35, %v13162_v48  ;;  %v8477_v1 = vadd.f32 %v13930_v28, %v8441_v53  ;;  %v8508_v61 = vmul.f32 %v8476_v5, %v14864_v62  ;;  %v7900_v7 = vmul.f32 %v13191_v40, %v7758_v55 }
 0x493   : > { %v7901_v63 = vmul.f32 %v13191_v40, %v7698_v41  ;;  %v8005_v12 = vmul.f32 %v13167_v6, %v7866_v0  ;;  %v8004_v59 = vmul.f32 %v13167_v6, %v13997_v29  ;;  %v8171_v11 = vadd.f32 %v13878_v52, %v8103_v19 }
 0x494   : > { %v8238_v25 = vadd.f32 %v13919_v54, %v8170_v33  ;;  %8540 = vst.msk [vmem:[%s13388_s25 + $0xb0] sm:$0xff] %vm548_vm0, %v8508_v61  ;;  %v8593_v27 = vsel %vm548_vm0, %v8508_v61, 0.0  ;;  %v7968_v56 = vadd.f32 %v7936_v43, %v7900_v7  ;;  %v8274_v46 = vmul.f32 %v13288_v15, %v7758_v55 }
 0x495   : > { %v7969_v2 = vadd.f32 %v7937_v10, %v7901_v63  ;;  %v8594_v51 = vadd.f32 %v8593_v27, %v8592_v20  ;;  %v8239_v58 = vadd.f32 %v13900_v21, %v8171_v11  ;;  %v8275_v49 = vmul.f32 %v13288_v15, %v7698_v41 }
 0x496   : > { %v8342_v57 = vmul.f32 %v13966_v35, %v13243_v22  ;;  %v8036_v52 = vadd.f32 %v8004_v59, %v7968_v56  ;;  %v8306_v54 = vadd.f32 %v8274_v46, %v8238_v25  ;;  %v8410_v14 = vmul.f32 %v13854_v37, %v13997_v29 }
 0x497   : > { %v8037_v19 = vadd.f32 %v8005_v12, %v7969_v2  ;;  %v8307_v31 = vadd.f32 %v8275_v49, %v8239_v58  ;;  %v8509_v50 = vmul.f32 %v8477_v1, %v14865_v8  ;;  %v14021_v39 = vmul.f32 0.0, %v10077_v45 }
 0x498   : > { %v10078_v21 = vadd.f32 %v13742_v26, %v13471_v23  ;;  %v8104_v20 = vadd.f32 %v8072_v17, %v8036_v52  ;;  %v8374_v47 = vadd.f32 %v8342_v57, %v8306_v54  ;;  %v10071_v44 = vadd.f32 %v13742_v26, %v13490_v30 }
 0x499   : > { %v8105_v53 = vadd.f32 %v8073_v4, %v8037_v19  ;;  %v8411_v33 = vmul.f32 %v13854_v37, %v7866_v0  ;;  %v8375_v5 = vadd.f32 %v8343_v16, %v8307_v31  ;;  %8541 = vst.msk [vmem:[%s13388_s25 + $0xb8] sm:$0xff] %vm548_vm0, %v8509_v50  ;;  %v8595_v10 = vsel %vm548_vm0, %v8509_v50, 0.0 }
 0x49a   : > { %v7814_v43 = vrot.slane %v14021_v39, 1  ;;  %v8442_v45 = vadd.f32 %v8410_v14, %v8374_v47  ;;  %v8596_v1 = vadd.f32 %v8595_v10, %v8594_v51  ;;  %v7706_v62 = vrot.slane %v14021_v39, 7  ;;  %v14097_v47 = vld [vmem:[%s14266_s7 + $0x2] ss:$0 sm:$0xff] }
 0x49b   : > { %v14033_v23 = vmul.f32 0.0, %v10078_v21  ;;  %v14037_v17 = vmul.f32 %v13962_v13, %v13172_v36  ;;  %v14041_v30 = vmul.f32 %v13966_v35, %v13172_v36  ;;  %v8443_v4 = vadd.f32 %v8411_v33, %v8375_v5  ;;  %v14867_v33 = vld [vmem:[#allocation7_spill] sm:$0xff] }
 0x49c   : > { %v7808_v16 = vrot.slane %v10071_v44, 1  ;;  %v14044_v61 = vmul.f32 %v13186_v24, %v7866_v0  ;;  %v8478_v7 = vadd.f32 %v13930_v28, %v8442_v45  ;;  %v14050_v59 = vmul.f32 %v13210_v32, %v7758_v55  ;;  %v14866_v0 = vld [vmem:[#allocation51_spill] sm:$0xff] }
 0x49d   : > { %v7705_v63 = vrot.slane %v14033_v23, 7  ;;  %v7813_v12 = vrot.slane %v14033_v23, 1  ;;  %v14053_v13 = vmul.f32 %v13210_v32, %v7698_v41  ;;  %v14056_v35 = vsel %vm4120_vm2, %v7814_v43, 0.0 }
 0x49e   : > { %v7867_v11 = vsel %vm4120_vm2, %v7808_v16, 0.0  ;;  %v8510_v25 = vmul.f32 %v8478_v7, %v14866_v0  ;;  %v14068_v55 = vadd.f32 %v13930_v28, %v8443_v4  ;;  %v7700_v46 = vrot.slane %v10071_v44, 7 }
 0x49f   : > { %v14061_v27 = vsel %vm4011_vm3, %v7705_v63, %v7706_v62  ;;  %v7761_v56 = vsel %vm4011_vm3, 0.0, %v7705_v63  ;;  %v14065_v2 = vsel %vm4120_vm2, %v7813_v12, %v7814_v43  ;;  %v7939_v51 = vmul.f32 %v10071_v44, %v13162_v48 }
 0x4a0   : > { %v14071_v41 = vmul.f32 %v13288_v15, %v7761_v56  ;;  %8542 = vst.msk [vmem:[%s13388_s25 + $0xc0] sm:$0xff] %vm548_vm0, %v8510_v25  ;;  %v8597_v58 = vsel %vm548_vm0, %v8510_v25, 0.0  ;;  %v8007_v49 = vmul.f32 %v13167_v6, %v7867_v11  ;;  %v14079_v57 = vmul.f32 %v10071_v44, %v13172_v36 }
 0x4a1   : > { %v14082_v52 = vmul.f32 %v13186_v24, %v7867_v11  ;;  %v14084_v19 = vadd.f32 %v8597_v58, %v8596_v1  ;;  %v8345_v54 = vmul.f32 %v10071_v44, %v13243_v22  ;;  %v10072_v14 = vadd.f32 %v13742_v26, %v13510_v60 }
 0x4a2   : > { %v8172_v31 = vadd.f32 %v13975_v3, %v8104_v20  ;;  %v8413_v8 = vmul.f32 %v13854_v37, %v7867_v11  ;;  %v8173_v50 = vadd.f32 %v13925_v18, %v8105_v53  ;;  %v10073_v21 = vadd.f32 %v13742_v26, %v13534_v42 }
 0x4a3   : > { %v14101_v44 = vadd.f32 %v14097_v47, %v14867_v33  ;;  %v7699_v5 = vrot.slane %v10072_v14, 7  ;;  %v7807_v60 = vrot.slane %v10072_v14, 1  ;;  %v7938_v3 = vmul.f32 %v10072_v14, %v13162_v48 }
 0x4a4   : > { %v10074_v20 = vadd.f32 %v13742_v26, %v13603_v9  ;;  %v14107_v18 = vmul.f32 %v10072_v14, %v13172_v36  ;;  %v8240_v42 = vadd.f32 %v13983_v34, %v8172_v31  ;;  %v8241_v53 = vadd.f32 %v13954_v38, %v8173_v50 }
 0x4a5   : > { %v8344_v10 = vmul.f32 %v10072_v14, %v13243_v22  ;;  %v7701_v43 = vsel %vm4011_vm3, %v7699_v5, %v7700_v46  ;;  %v7759_v45 = vsel %vm4011_vm3, 0.0, %v7699_v5  ;;  %v7809_v1 = vsel %vm4120_vm2, %v7807_v60, %v7808_v16 }
 0x4a6   : > { %v7811_v62 = vrot.slane %v10073_v21, 1  ;;  %v7902_v4 = vmul.f32 %v13191_v40, %v7759_v45  ;;  %v7903_v9 = vmul.f32 %v13191_v40, %v7701_v43  ;;  %v8006_v36 = vmul.f32 %v13167_v6, %v7809_v1 }
 0x4a7   : > { %v7703_v26 = vrot.slane %v10073_v21, 7  ;;  %v8077_v34 = vmul.f32 %v13210_v32, %v7701_v43  ;;  %v14120_v38 = vmul.f32 %v13186_v24, %v7809_v1  ;;  %v8276_v7 = vmul.f32 %v13288_v15, %v7759_v45 }
 0x4a8   : > { %v8277_v63 = vmul.f32 %v13288_v15, %v7701_v43  ;;  %v7970_v12 = vadd.f32 %v7938_v3, %v7902_v4  ;;  %v7971_v11 = vadd.f32 %v7939_v51, %v7903_v9  ;;  %v8412_v16 = vmul.f32 %v13854_v37, %v7809_v1 }
 0x4a9   : > { %v7868_v0 = vsel %vm4120_vm2, %v7811_v62, 0.0  ;;  %v8308_v25 = vadd.f32 %v8276_v7, %v8240_v42  ;;  %v7941_v46 = vmul.f32 %v10073_v21, %v13162_v48  ;;  %v8347_v50 = vmul.f32 %v10073_v21, %v13243_v22 }
 0x4aa   : > { %v8309_v56 = vadd.f32 %v8277_v63, %v8241_v53  ;;  %v8009_v58 = vmul.f32 %v13167_v6, %v7868_v0  ;;  %v8038_v14 = vadd.f32 %v8006_v36, %v7970_v12  ;;  %v8039_v31 = vadd.f32 %v8007_v49, %v7971_v11 }
 0x4ab   : > { %v7702_v33 = vrot.slane %v10074_v20, 7  ;;  %v8376_v5 = vadd.f32 %v8344_v10, %v8308_v25  ;;  %v8415_v3 = vmul.f32 %v13854_v37, %v7868_v0  ;;  %v7810_v51 = vrot.slane %v10074_v20, 1 }
 0x4ac   : > { %v8377_v60 = vadd.f32 %v8345_v54, %v8309_v56  ;;  %v7940_v42 = vmul.f32 %v10074_v20, %v13162_v48  ;;  %v8106_v53 = vadd.f32 %v14050_v59, %v8038_v14  ;;  %v8076_v54 = vmul.f32 %v13210_v32, %v7759_v45  ;;  %v14868_v45 = vld [vmem:[#allocation59_spill] sm:$0xff]  ;;  %v14871_v14 = vld [vmem:[#allocation66_spill] sm:$0xff] }
 0x4ad   : > { %v7704_v43 = vsel %vm4011_vm3, %v7702_v33, %v7703_v26  ;;  %v7760_v1 = vsel %vm4011_vm3, 0.0, %v7702_v33  ;;  %v8444_v4 = vadd.f32 %v8412_v16, %v8376_v5  ;;  %v7812_v49 = vsel %vm4120_vm2, %v7810_v51, %v7811_v62  ;;  %v14872_v51 = vld [vmem:[#allocation50_spill] sm:$0xff] }
 0x4ae   : > { %v8445_v9 = vadd.f32 %v8413_v8, %v8377_v60  ;;  %v7904_v21 = vmul.f32 %v13191_v40, %v7760_v1  ;;  %v7905_v10 = vmul.f32 %v13191_v40, %v7704_v43  ;;  %v8107_v36 = vadd.f32 %v14053_v13, %v8039_v31 }
 0x4af   : > { %v8174_v26 = vadd.f32 %v14041_v30, %v8106_v53  ;;  %v8480_v7 = vadd.f32 %v13930_v28, %v8444_v4  ;;  %v8008_v59 = vmul.f32 %v13167_v6, %v7812_v49  ;;  %v8210_v8 = vmul.f32 %v13186_v24, %v13997_v29  ;;  %v14869_v24 = vld [vmem:[#allocation61_spill] sm:$0xff] }
 0x4b0   : > { %v7972_v48 = vadd.f32 %v7940_v42, %v7904_v21  ;;  %v7973_v62 = vadd.f32 %v7941_v46, %v7905_v10  ;;  %v8175_v63 = vadd.f32 %v14037_v17, %v8107_v36  ;;  %v8278_v40 = vmul.f32 %v13288_v15, %v7760_v1  ;;  %v14870_v46 = vld [vmem:[#allocation44_spill] sm:$0xff] }
 0x4b1   : > { %v8279_v32 = vmul.f32 %v13288_v15, %v7704_v43  ;;  %v8512_v13 = vmul.f32 %v8480_v7, %v14868_v45  ;;  %v8242_v12 = vadd.f32 %v8210_v8, %v8174_v26  ;;  %v8346_v11 = vmul.f32 %v10074_v20, %v13243_v22 }
 0x4b2   : > { %v8040_v30 = vadd.f32 %v8008_v59, %v7972_v48  ;;  %v8041_v16 = vadd.f32 %v8009_v58, %v7973_v62  ;;  %v8243_v6 = vadd.f32 %v14044_v61, %v8175_v63  ;;  %v8481_v0 = vadd.f32 %v13930_v28, %v8445_v9  ;;  %v14876_v48 = vld [vmem:[#allocation46_spill] sm:$0xff] }
 0x4b3   : > { %v8511_v29 = vmul.f32 %v14068_v55, %v14869_v24  ;;  %8544 = vst.msk [vmem:[%s13388_s25 + $0xd0] sm:$0xff] %vm548_vm0, %v8512_v13  ;;  %v8310_v25 = vadd.f32 %v8278_v40, %v8242_v12  ;;  %v8414_v56 = vmul.f32 %v13854_v37, %v7812_v49  ;;  %v4672_v31 = vadd.f32 %v14871_v14, %v14870_v46 }
 0x4b4   : > { %v8108_v17 = vadd.f32 %v8076_v54, %v8040_v30  ;;  %v8109_v33 = vadd.f32 %v8077_v34, %v8041_v16  ;;  %v8311_v20 = vadd.f32 %v8279_v32, %v8243_v6  ;;  %v8513_v58 = vmul.f32 %v8481_v0, %v14101_v44  ;;  %v14873_v34 = vld [vmem:[#allocation69_spill] sm:$0xff]  ;;  %v14874_v44 = vld [vmem:[#allocation63_spill] sm:$0xff] }
 0x4b5   : > { %8543 = vst.msk [vmem:[%s13388_s25 + $0xc8] sm:$0xff] %vm548_vm0, %v8511_v29  ;;  %v8599_v61 = vsel %vm548_vm0, %v8511_v29, 0.0  ;;  %v8378_v5 = vadd.f32 %v8346_v11, %v8310_v25  ;;  %v4740_v43 = vadd.f32 %v14872_v51, %v4672_v31  ;;  %v8601_v1 = vsel %vm548_vm0, %v8512_v13, 0.0 }
 0x4b6   : > { %v8176_v55 = vadd.f32 %v14107_v18, %v8108_v17  ;;  %v8600_v60 = vadd.f32 %v8599_v61, %v14084_v19  ;;  %v8177_v42 = vadd.f32 %v14079_v57, %v8109_v33  ;;  %v8379_v53 = vadd.f32 %v8347_v50, %v8311_v20  ;;  %8545 = vst.msk [vmem:[%s13388_s25 + $0xd8] sm:$0xff] %vm548_vm0, %v8513_v58  ;;  %v14875_v18 = vld [vmem:[#allocation47_spill] sm:$0xff] }
 0x4b7   : > { %v4807_v4 = vadd.f32 %v14874_v44, %v14873_v34  ;;  %v8446_v49 = vadd.f32 %v8414_v56, %v8378_v5  ;;  %v4808_v10 = vadd.f32 %v14875_v18, %v4740_v43  ;;  %v8281_v19 = vmul.f32 %v13288_v15, %v14061_v27 }
 0x4b8   : > { %v8244_v9 = vadd.f32 %v14120_v38, %v8176_v55  ;;  %v8602_v21 = vadd.f32 %v8601_v1, %v8600_v60  ;;  %v8245_v54 = vadd.f32 %v14082_v52, %v8177_v42  ;;  %v8447_v36 = vadd.f32 %v8415_v3, %v8379_v53 }
 0x4b9   : > { %v8603_v57 = vsel %vm548_vm0, %v8513_v58, 0.0  ;;  %v8348_v50 = vmul.f32 %v13243_v22, %v14033_v23  ;;  %v8482_v38 = vadd.f32 %v13930_v28, %v8446_v49  ;;  %v4842_v59 = vadd.f32 %v14097_v47, %v14876_v48  ;;  %v14877_v23 = vld [vmem:[#allocation67_spill] sm:$0xff] }
 0x4ba   : > { %v8312_v26 = vadd.f32 %v14071_v41, %v8244_v9  ;;  %v8604_v7 = vadd.f32 %v8603_v57, %v8602_v21  ;;  %v8349_v15 = vmul.f32 %v13243_v22, %v14021_v39  ;;  %v8483_v27 = vadd.f32 %v13930_v28, %v8447_v36 }
 0x4bb   : > { %v8313_v52 = vadd.f32 %v8281_v19, %v8245_v54  ;;  %v8416_v3 = vmul.f32 %v13854_v37, %v14065_v2  ;;  %v8514_v62 = vmul.f32 %v8482_v38, %v14877_v23  ;;  %v8417_v41 = vmul.f32 %v13854_v37, %v14056_v35 }
 0x4bc   : > { %v8380_v8 = vadd.f32 %v8348_v50, %v8312_v26  ;;  %v8515_v40 = vmul.f32 %v8483_v27, %v4842_v59  ;;  %v4843_v2 = vadd.f32 %v14097_v47, %v4807_v4  ;;  %v4844_v35 = vadd.f32 %v14097_v47, %v4808_v10 }
 0x4bd   : > { %v8381_v63 = vadd.f32 %v8349_v15, %v8313_v52  ;;  %8546 = vst.msk [vmem:[%s13388_s25 + $0xe0] sm:$0xff] %vm548_vm0, %v8514_v62  ;;  %v8605_v22 = vsel %vm548_vm0, %v8514_v62, 0.0 }
 0x4be   : > { %v8448_v39 = vadd.f32 %v8416_v3, %v8380_v8  ;;  %v8606_v32 = vadd.f32 %v8605_v22, %v8604_v7  ;;  %8547 = vst.msk [vmem:[%s13388_s25 + $0xe8] sm:$0xff] %vm548_vm0, %v8515_v40  ;;  %v8607_v37 = vsel %vm548_vm0, %v8515_v40, 0.0 }
 0x4bf   : > { %v8449_v45 = vadd.f32 %v8417_v41, %v8381_v63 }
 0x4c0   : > { %v8484_v13 = vadd.f32 %v13930_v28, %v8448_v39  ;;  %v8608_v12 = vadd.f32 %v8607_v37, %v8606_v32 }
 0x4c1   : > { %v8485_v30 = vadd.f32 %v13930_v28, %v8449_v45 }
 0x4c2   : > { %v8516_v11 = vmul.f32 %v8484_v13, %v4843_v2 }
 0x4c3   : > { %v8517_v16 = vmul.f32 %v8485_v30, %v4844_v35 }
 0x4c4   : > { %8548 = vst.msk [vmem:[%s13388_s25 + $0xf0] sm:$0xff] %vm548_vm0, %v8516_v11  ;;  %v8609_v6 = vsel %vm548_vm0, %v8516_v11, 0.0 }
 0x4c5   : > { %8549 = vst.msk [vmem:[%s13388_s25 + $0xf8] sm:$0xff] %vm548_vm0, %v8517_v16  ;;  %v8610_v0 = vadd.f32 %v8609_v6, %v8608_v12  ;;  %v8611_v24 = vsel %vm548_vm0, %v8517_v16, 0.0  ;;  %s14212_s25 = scalar_lea.hbm %s14268_s9, %s8810_s23 }
 0x4c7   : > { %v8612_v29 = vadd.f32 %v8611_v24, %v8610_v0 }
 0x4c9   : > { %v8613_v17 = vrot.slane %v8612_v29, 4 }
 0x4cb   : > { %v8614_v47 = vadd.f32 %v8613_v17, %v8612_v29 }
 0x4cd   : > { %v8615_v25 = vrot.slane %v8614_v47, 2 }
 0x4cf   : > { %v8616_v56 = vadd.f32 %v8615_v25, %v8614_v47 }
 0x4d1   : > { %v8617_v28 = vrot.slane %v8616_v56, 1 }
 0x4d3   : > { %v8618_v46 = vadd.f32 %v8617_v28, %v8616_v56 }
 0x4d5   : > { %8620 = vst.msk [vmem:[%s455_s24] sm:$0x1] %vm8619_vm4, %v8618_v46 }
 0x4d6   : > { %10601 = shalt.err (!%p10598_p5)
}
 0x4d7   : > { %s10602_s20 = scalar_lea.hbm %s14212_s25, 16  ;;  %s10606_s27 = scalar_lea.hbm %s14268_s9, 32 }
 0x4d8   : > { %p10603_p6 = scmp.ne.s32.totalorder %s14212_s25, %s10602_s20  ;;  %p10607_p10 = scmp.lt.u32.totalorder %s14212_s25, %s14268_s9 }
 0x4d9   : > { %p10608_p11 = scmp.lt.u32.totalorder %s10606_s27, %s10602_s20  ;;  %p10610_p13 = scmp.lt.u32.totalorder %s10602_s20, %s14212_s25 }
 0x4da   : > { %p10604_p7 = pnand %p10603_p6, %p10759_p4 }
 0x4db   : > { %p10609_p12 = por %p10608_p11, %p10607_p10 }
 0x4dc   : > { %p10605_p9 = pneg %p10604_p7 }
 0x4dd   : > { %p10611_p0 = por %p10610_p13, %p10609_p12 }
 0x4df   : > { %p10612_p1 = pnand %p10611_p0, %p10605_p9 }
 0x4e1   : > { %10615 = shalt.err (!%p10612_p1)
}
 0x4e2   : > { %10439 = dma.vmem_to_hbm [thread:$0]  (%p10759_p4), %s14214_s26, 16, %s14212_s25, %s8631_s29  }
 0x4e3 PF: > { %p10445_p2 = scmp.ge.s32.totalorder %s10666_s14, 2  ;;  %s8672_s15 = sand.u32 1, %s10646_s30  }
 0x4e4   : > { %s8673_s16 = scalar_lea.sflag [#allocation3], %s8672_s15 }
 0x4e5   : > { %p10442_p3 = pnand %p10445_p2, %p10766_p8 }
 0x4e7   : > { %10641 = dma.done.wait (!%p10442_p3), %s8673_s16, 16  }
 0x4e8   : > { %10643 = vsyncadd (!%p10442_p3), %s8673_s16, 4294967280  ;;  %s23_s14 = sadd.s32 1, %s10666_s14   ;;  %s14878_s30 = smov %s10650_s10 }
 0x4e9   : > { %p20_p5 = scmp.ge.s32.totalorder %s23_s14, 4   ;;  %s14879_s10 = smov %s10654_s11 }
 0x4ea   : > { %s14880_s11 = smov %s10772_s22  ;;  %s14881_s12 = smov %s10662_s13 }
 0x4eb   : > { %s14882_s13 = smov %s14884_s17  ;;  %22 = sbr.rel (!%p20_p5) target bundleno = 4 (0x4), region = 105 }
 0x4f2   :  { %8677 = vsyncpa [#allocation3], 1 }
 0x4f3   :  { %8679 = vsyncpa [#allocation3 + $0x1], 1 }

</bundles_post_ra>
